<compile_context>
chip_gen: v7x
topology: tpu7x:2x2x1
jax: 0.10.0
libtpu: 0.0.40
codegen_flags: <defaults>
</compile_context>

<pallas_src>
import jax
import jax.numpy as jnp
import numpy as np
from jax.experimental import pallas as pl
from jax.experimental.pallas import tpu as pltpu


D_IN = 28 * 28        # 784
H1 = 1000
H2 = 2000
N_CLASSES = 10

H1P = 1024            # hidden dims padded to lane-dense multiples of 128
H2P = 2048
NCP = 128             # logits padded to a full 128-lane vreg width
NEG_INF = -1e30       # bias on padded logit lanes -> exp() underflows to 0 in log_softmax

H1_CHUNK = 256        # fc1 column chunk (EUP sigmoid <-> MXU matmul overlap)
N_H1_CHUNKS = H1P // H1_CHUNK
W2_CHUNK = 512        # H2 streaming chunk (inner grid axis)
N_J = H2P // W2_CHUNK


# ---------------------------- Pallas kernel ----------------------------

def fcnet_kernel(x_ref, w1_ref, b1_ref, w2_ref, b2_ref, w3_ref, b3_ref, o_ref,
                 h1_ref, acc_ref):
    """One (batch-tile i, H2-chunk j) grid step of the fused FCNet forward."""
    j = pl.program_id(1)

    # ---- j == 0: fc1 + sigmoid (chunked over H1) and logits-accumulator init ----
    @pl.when(j == 0)
    def _():
        # Initialize the fc3 accumulator with the (padded) fc3 bias.
        acc_ref[...] = jnp.broadcast_to(b3_ref[...], acc_ref.shape)

        x = x_ref[...].astype(jnp.bfloat16)                       # in-kernel cast (VPU)
        # Statically unrolled so the EUP sigmoid of chunk k overlaps the MXU
        # fc1 matmul of chunk k+1 in separate VLIW slots.
        for k in range(N_H1_CHUNKS):
            c0, c1 = k * H1_CHUNK, (k + 1) * H1_CHUNK
            h = jnp.dot(x, w1_ref[:, c0:c1],
                        preferred_element_type=jnp.float32) + b1_ref[:, c0:c1]
            h = 0.5 * (jnp.tanh(0.5 * h) + 1.0)                   # sigmoid via one tanh
            h1_ref[:, c0:c1] = h.astype(jnp.bfloat16)

    # ---- every j: fc2 column-chunk + relu + fc3 partial accumulation ----
    h2 = jnp.dot(h1_ref[...], w2_ref[...],
                 preferred_element_type=jnp.float32) + b2_ref[...]
    h2 = jnp.maximum(h2, 0.0)
    acc_ref[...] += jnp.dot(h2.astype(jnp.bfloat16), w3_ref[...],
                            preferred_element_type=jnp.float32)

    # ---- last j: numerically stable log_softmax over the 128 padded lanes ----
    @pl.when(j == pl.num_programs(1) - 1)
    def _():
        logits = acc_ref[...]
        m = jnp.max(logits, axis=-1, keepdims=True)
        lse = jnp.log(jnp.sum(jnp.exp(logits - m), axis=-1, keepdims=True)) + m
        o_ref[...] = logits - lse


# ---------------------------- wrapper ----------------------------

def fcnet_forward(x, params, *, tb_max=256):
    B = x.shape[0]
    xf = x.reshape(B, -1)                       # torch.flatten(x, start_dim=1); stays f32

    # pad batch to a sublane-aligned tile multiple (only the remainder rows)
    Bp = max(8, ((B + 7) // 8) * 8)
    TB = min(tb_max, Bp)
    Bp = ((Bp + TB - 1) // TB) * TB
    if Bp != B:
        xf = jnp.pad(xf, ((0, Bp - B), (0, 0)))

    out = pl.pallas_call(
        fcnet_kernel,
        out_shape=jax.ShapeDtypeStruct((Bp, NCP), jnp.float32),
        grid=(Bp // TB, N_J),
        in_specs=[
            pl.BlockSpec((TB, D_IN), lambda i, j: (i, 0)),          # x tile (f32)
            pl.BlockSpec((D_IN, H1P), lambda i, j: (0, 0)),         # w1 (resident)
            pl.BlockSpec((1, H1P), lambda i, j: (0, 0)),            # b1 (resident)
            pl.BlockSpec((H1P, W2_CHUNK), lambda i, j: (0, j)),     # w2 column chunk j
            pl.BlockSpec((1, W2_CHUNK), lambda i, j: (0, j)),       # b2 chunk j
            pl.BlockSpec((W2_CHUNK, NCP), lambda i, j: (j, 0)),     # w3 row chunk j
            pl.BlockSpec((1, NCP), lambda i, j: (0, 0)),            # b3 (resident)
        ],
        out_specs=pl.BlockSpec((TB, NCP), lambda i, j: (i, 0)),     # lane-dense output
        scratch_shapes=[
            pltpu.VMEM((TB, H1P), jnp.bfloat16),                    # h1 = sigmoid(fc1)
            pltpu.VMEM((TB, NCP), jnp.float32),                     # fc3 logits accumulator
        ],
        compiler_params=pltpu.CompilerParams(
            dimension_semantics=("parallel", "arbitrary"),
            vmem_limit_bytes=32 * 1024 * 1024,
        ),
    )(xf, params["w1"], params["b1"], params["w2"], params["b2"],
      params["w3"], params["b3"])

    return out[:B, :N_CLASSES]


# ---------------------------- params ----------------------------

def init_params(key):
    ks = jax.random.split(key, 6)

    def u(k, shape, fan_in):
        bound = 1.0 / np.sqrt(fan_in)
        return jax.random.uniform(k, shape, jnp.float32, -bound, bound)

    # torch-layout parameters: nn.Linear weight is (out, in)
    w1_t = u(ks[0], (H1, D_IN), D_IN)
    b1 = u(ks[1], (H1,), D_IN)
    w2_t = u(ks[2], (H2, H1), H1)
    b2 = u(ks[3], (H2,), H1)
    w3_t = u(ks[4], (N_CLASSES, H2), H2)
    b3 = u(ks[5], (N_CLASSES,), H2)

    # kernel layouts: (in, out), zero-padded to lane-dense widths, bf16 matmul inputs.
    # Padded H1 lanes get bias 0 -> sigmoid = 0.5, but the matching w2 rows are zero.
    # Padded H2 lanes are exactly 0 after relu. Padded logit lanes get -1e30 bias (f32).
    w1 = jnp.pad(w1_t.T, ((0, 0), (0, H1P - H1))).astype(jnp.bfloat16)
    b1p = jnp.pad(b1, (0, H1P - H1)).reshape(1, H1P)
    w2 = jnp.pad(w2_t.T, ((0, H1P - H1), (0, H2P - H2))).astype(jnp.bfloat16)
    b2p = jnp.pad(b2, (0, H2P - H2)).reshape(1, H2P)
    w3 = jnp.pad(w3_t.T, ((0, H2P - H2), (0, NCP - N_CLASSES))).astype(jnp.bfloat16)
    b3p = jnp.pad(b3, (0, NCP - N_CLASSES), constant_values=NEG_INF).reshape(1, NCP)

    params = dict(w1=w1, b1=b1p, w2=w2, b2=b2p, w3=w3, b3=b3p)
    torch_params = dict(w1=w1_t, b1=b1, w2=w2_t, b2=b2, w3=w3_t, b3=b3)
    return params, torch_params


# ---------------------------- pure-JAX f32 reference ----------------------------

def reference_forward(x, tp):
    prec = jax.lax.Precision.HIGHEST
    xf = x.reshape(x.shape[0], -1)
    h1 = 1.0 / (1.0 + jnp.exp(-(jnp.dot(xf, tp["w1"].T, precision=prec) + tp["b1"])))
    h2 = jnp.maximum(jnp.dot(h1, tp["w2"].T, precision=prec) + tp["b2"], 0.0)
    logits = jnp.dot(h2, tp["w3"].T, precision=prec) + tp["b3"]
    return jax.nn.log_softmax(logits, axis=-1)


# ---------------------------- main ----------------------------

if __name__ == "__main__":
    key = jax.random.PRNGKey(0)
    kx, kp = jax.random.split(key)
    # 28x28 input implied by fc in_features = 784 (MNIST-style NCHW)
    x = jax.random.normal(kx, (2, 1, 28, 28), jnp.float32)
    params, torch_params = init_params(kp)

    out = jax.block_until_ready(fcnet_forward(x, params))
    ref = jax.block_until_ready(reference_forward(x, torch_params))

    assert out.shape == (2, 10)
    # bf16 matmul inputs with f32 accumulation vs f32 HIGHEST-precision reference
    np.testing.assert_allclose(np.asarray(out), np.asarray(ref), rtol=3e-2, atol=3e-2)
    assert np.allclose(np.exp(np.asarray(out)).sum(axis=1), 1.0, atol=1e-3)
    print("KERNEL_OK")
</pallas_src>

<mosaic_0001>
module attributes {stable_mosaic.version = 11 : i64} {
  func.func @fcnet_kernel(%arg0: i32, %arg1: i32, %arg2: memref<8x784xf32, #tpu.memory_space<vmem>>, %arg3: memref<784x1024xbf16, #tpu.memory_space<vmem>>, %arg4: memref<1x1024xf32, #tpu.memory_space<vmem>>, %arg5: memref<1024x512xbf16, #tpu.memory_space<vmem>>, %arg6: memref<1x512xf32, #tpu.memory_space<vmem>>, %arg7: memref<512x128xbf16, #tpu.memory_space<vmem>>, %arg8: memref<1x128xf32, #tpu.memory_space<vmem>>, %arg9: memref<8x128xf32, #tpu.memory_space<vmem>>, %arg10: memref<8x1024xbf16, #tpu.memory_space<vmem>>, %arg11: memref<8x128xf32, #tpu.memory_space<vmem>>) attributes {dimension_semantics = [#tpu.dimension_semantics<parallel>, #tpu.dimension_semantics<arbitrary>], iteration_bounds = array<i64: 1, 4>, scalar_prefetch = 0 : i64, scratch_operands = 2 : i64, tpu.core_type = #tpu.core_type<tc>, window_params = [{transform_indices = @transform_0, window_bounds = array<i64: 8, 784>}, {pipeline_mode = #tpu.pipeline_mode<synchronous>, transform_indices = @transform_1, window_bounds = array<i64: 784, 1024>}, {pipeline_mode = #tpu.pipeline_mode<synchronous>, transform_indices = @transform_2, window_bounds = array<i64: 1, 1024>}, {transform_indices = @transform_3, window_bounds = array<i64: 1024, 512>}, {transform_indices = @transform_4, window_bounds = array<i64: 1, 512>}, {transform_indices = @transform_5, window_bounds = array<i64: 512, 128>}, {pipeline_mode = #tpu.pipeline_mode<synchronous>, transform_indices = @transform_6, window_bounds = array<i64: 1, 128>}, {transform_indices = @transform_7, window_bounds = array<i64: 8, 128>}]} {
    %c0_i32 = arith.constant 0 : i32
    %0 = arith.cmpi eq, %arg1, %c0_i32 : i32
    %1 = arith.extui %0 : i1 to i32
    %c0_i32_0 = arith.constant 0 : i32
    %2 = arith.cmpi ne, %1, %c0_i32_0 : i32
    scf.if %2 {
      %c0_15 = arith.constant 0 : index
      %c0_16 = arith.constant 0 : index
      %20 = vector.load %arg8[%c0_15, %c0_16] : memref<1x128xf32, #tpu.memory_space<vmem>>, vector<1x128xf32>
      %21 = vector.shape_cast %20 : vector<1x128xf32> to vector<1x128xf32>
      %22 = vector.broadcast %21 : vector<1x128xf32> to vector<8x128xf32>
      %c0_17 = arith.constant 0 : index
      %c0_18 = arith.constant 0 : index
      %23 = vector.load %arg11[%c0_17, %c0_18] : memref<8x128xf32, #tpu.memory_space<vmem>>, vector<8x128xf32>
      tpu.vector_store %arg11[%c0_17, %c0_18], %22 {strides = array<i32>} : memref<8x128xf32, #tpu.memory_space<vmem>>, vector<8x128xf32>,
      %c0_19 = arith.constant 0 : index
      %c0_20 = arith.constant 0 : index
      %24 = vector.load %arg2[%c0_19, %c0_20] : memref<8x784xf32, #tpu.memory_space<vmem>>, vector<8x784xf32>
      %25 = arith.truncf %24 : vector<8x784xf32> to vector<8x784xbf16>
      %c0_21 = arith.constant 0 : index
      %c0_22 = arith.constant 0 : index
      %26 = vector.load %arg3[%c0_21, %c0_22] : memref<784x1024xbf16, #tpu.memory_space<vmem>>, vector<784x256xbf16>
      %cst_23 = arith.constant dense<0.000000e+00> : vector<8x256xf32>
      %27 = tpu.matmul %25, %26, %cst_23 {dimension_numbers = #tpu.dot_dimension_numbers<[1], [0], [0], [1], [0, 0, 1, 1], [], []>} : vector<8x784xbf16>, vector<784x256xbf16>, vector<8x256xf32> -> vector<8x256xf32>
      %c0_24 = arith.constant 0 : index
      %c0_25 = arith.constant 0 : index
      %28 = vector.load %arg4[%c0_24, %c0_25] : memref<1x1024xf32, #tpu.memory_space<vmem>>, vector<1x256xf32>
      %29 = vector.broadcast %28 : vector<1x256xf32> to vector<8x256xf32>
      %30 = arith.addf %27, %29 : vector<8x256xf32>
      %cst_26 = arith.constant 5.000000e-01 : f32
      %31 = vector.broadcast %cst_26 : f32 to vector<8x256xf32>
      %32 = arith.mulf %31, %30 : vector<8x256xf32>
      %33 = math.tanh %32 : vector<8x256xf32>
      %cst_27 = arith.constant 1.000000e+00 : f32
      %34 = vector.broadcast %cst_27 : f32 to vector<8x256xf32>
      %35 = arith.addf %33, %34 : vector<8x256xf32>
      %cst_28 = arith.constant 5.000000e-01 : f32
      %36 = vector.broadcast %cst_28 : f32 to vector<8x256xf32>
      %37 = arith.mulf %36, %35 : vector<8x256xf32>
      %38 = arith.truncf %37 : vector<8x256xf32> to vector<8x256xbf16>
      %c0_29 = arith.constant 0 : index
      %c0_30 = arith.constant 0 : index
      %39 = vector.load %arg10[%c0_29, %c0_30] : memref<8x1024xbf16, #tpu.memory_space<vmem>>, vector<8x256xbf16>
      tpu.vector_store %arg10[%c0_29, %c0_30], %38 {strides = array<i32>} : memref<8x1024xbf16, #tpu.memory_space<vmem>>, vector<8x256xbf16>,
      %c0_31 = arith.constant 0 : index
      %c256 = arith.constant 256 : index
      %40 = vector.load %arg3[%c0_31, %c256] : memref<784x1024xbf16, #tpu.memory_space<vmem>>, vector<784x256xbf16>
      %cst_32 = arith.constant dense<0.000000e+00> : vector<8x256xf32>
      %41 = tpu.matmul %25, %40, %cst_32 {dimension_numbers = #tpu.dot_dimension_numbers<[1], [0], [0], [1], [0, 0, 1, 1], [], []>} : vector<8x784xbf16>, vector<784x256xbf16>, vector<8x256xf32> -> vector<8x256xf32>
      %c0_33 = arith.constant 0 : index
      %c256_34 = arith.constant 256 : index
      %42 = vector.load %arg4[%c0_33, %c256_34] : memref<1x1024xf32, #tpu.memory_space<vmem>>, vector<1x256xf32>
      %43 = vector.broadcast %42 : vector<1x256xf32> to vector<8x256xf32>
      %44 = arith.addf %41, %43 : vector<8x256xf32>
      %cst_35 = arith.constant 5.000000e-01 : f32
      %45 = vector.broadcast %cst_35 : f32 to vector<8x256xf32>
      %46 = arith.mulf %45, %44 : vector<8x256xf32>
      %47 = math.tanh %46 : vector<8x256xf32>
      %cst_36 = arith.constant 1.000000e+00 : f32
      %48 = vector.broadcast %cst_36 : f32 to vector<8x256xf32>
      %49 = arith.addf %47, %48 : vector<8x256xf32>
      %cst_37 = arith.constant 5.000000e-01 : f32
      %50 = vector.broadcast %cst_37 : f32 to vector<8x256xf32>
      %51 = arith.mulf %50, %49 : vector<8x256xf32>
      %52 = arith.truncf %51 : vector<8x256xf32> to vector<8x256xbf16>
      %c0_38 = arith.constant 0 : index
      %c256_39 = arith.constant 256 : index
      %53 = vector.load %arg10[%c0_38, %c256_39] : memref<8x1024xbf16, #tpu.memory_space<vmem>>, vector<8x256xbf16>
      tpu.vector_store %arg10[%c0_38, %c256_39], %52 {strides = array<i32>} : memref<8x1024xbf16, #tpu.memory_space<vmem>>, vector<8x256xbf16>,
      %c0_40 = arith.constant 0 : index
      %c512 = arith.constant 512 : index
      %54 = vector.load %arg3[%c0_40, %c512] : memref<784x1024xbf16, #tpu.memory_space<vmem>>, vector<784x256xbf16>
      %cst_41 = arith.constant dense<0.000000e+00> : vector<8x256xf32>
      %55 = tpu.matmul %25, %54, %cst_41 {dimension_numbers = #tpu.dot_dimension_numbers<[1], [0], [0], [1], [0, 0, 1, 1], [], []>} : vector<8x784xbf16>, vector<784x256xbf16>, vector<8x256xf32> -> vector<8x256xf32>
      %c0_42 = arith.constant 0 : index
      %c512_43 = arith.constant 512 : index
      %56 = vector.load %arg4[%c0_42, %c512_43] : memref<1x1024xf32, #tpu.memory_space<vmem>>, vector<1x256xf32>
      %57 = vector.broadcast %56 : vector<1x256xf32> to vector<8x256xf32>
      %58 = arith.addf %55, %57 : vector<8x256xf32>
      %cst_44 = arith.constant 5.000000e-01 : f32
      %59 = vector.broadcast %cst_44 : f32 to vector<8x256xf32>
      %60 = arith.mulf %59, %58 : vector<8x256xf32>
      %61 = math.tanh %60 : vector<8x256xf32>
      %cst_45 = arith.constant 1.000000e+00 : f32
      %62 = vector.broadcast %cst_45 : f32 to vector<8x256xf32>
      %63 = arith.addf %61, %62 : vector<8x256xf32>
      %cst_46 = arith.constant 5.000000e-01 : f32
      %64 = vector.broadcast %cst_46 : f32 to vector<8x256xf32>
      %65 = arith.mulf %64, %63 : vector<8x256xf32>
      %66 = arith.truncf %65 : vector<8x256xf32> to vector<8x256xbf16>
      %c0_47 = arith.constant 0 : index
      %c512_48 = arith.constant 512 : index
      %67 = vector.load %arg10[%c0_47, %c512_48] : memref<8x1024xbf16, #tpu.memory_space<vmem>>, vector<8x256xbf16>
      tpu.vector_store %arg10[%c0_47, %c512_48], %66 {strides = array<i32>} : memref<8x1024xbf16, #tpu.memory_space<vmem>>, vector<8x256xbf16>,
      %c0_49 = arith.constant 0 : index
      %c768 = arith.constant 768 : index
      %68 = vector.load %arg3[%c0_49, %c768] : memref<784x1024xbf16, #tpu.memory_space<vmem>>, vector<784x256xbf16>
      %cst_50 = arith.constant dense<0.000000e+00> : vector<8x256xf32>
      %69 = tpu.matmul %25, %68, %cst_50 {dimension_numbers = #tpu.dot_dimension_numbers<[1], [0], [0], [1], [0, 0, 1, 1], [], []>} : vector<8x784xbf16>, vector<784x256xbf16>, vector<8x256xf32> -> vector<8x256xf32>
      %c0_51 = arith.constant 0 : index
      %c768_52 = arith.constant 768 : index
      %70 = vector.load %arg4[%c0_51, %c768_52] : memref<1x1024xf32, #tpu.memory_space<vmem>>, vector<1x256xf32>
      %71 = vector.broadcast %70 : vector<1x256xf32> to vector<8x256xf32>
      %72 = arith.addf %69, %71 : vector<8x256xf32>
      %cst_53 = arith.constant 5.000000e-01 : f32
      %73 = vector.broadcast %cst_53 : f32 to vector<8x256xf32>
      %74 = arith.mulf %73, %72 : vector<8x256xf32>
      %75 = math.tanh %74 : vector<8x256xf32>
      %cst_54 = arith.constant 1.000000e+00 : f32
      %76 = vector.broadcast %cst_54 : f32 to vector<8x256xf32>
      %77 = arith.addf %75, %76 : vector<8x256xf32>
      %cst_55 = arith.constant 5.000000e-01 : f32
      %78 = vector.broadcast %cst_55 : f32 to vector<8x256xf32>
      %79 = arith.mulf %78, %77 : vector<8x256xf32>
      %80 = arith.truncf %79 : vector<8x256xf32> to vector<8x256xbf16>
      %c0_56 = arith.constant 0 : index
      %c768_57 = arith.constant 768 : index
      %81 = vector.load %arg10[%c0_56, %c768_57] : memref<8x1024xbf16, #tpu.memory_space<vmem>>, vector<8x256xbf16>
      tpu.vector_store %arg10[%c0_56, %c768_57], %80 {strides = array<i32>} : memref<8x1024xbf16, #tpu.memory_space<vmem>>, vector<8x256xbf16>,
    } else {
    }
    %c0 = arith.constant 0 : index
    %c0_1 = arith.constant 0 : index
    %3 = vector.load %arg10[%c0, %c0_1] : memref<8x1024xbf16, #tpu.memory_space<vmem>>, vector<8x1024xbf16>
    %c0_2 = arith.constant 0 : index
    %c0_3 = arith.constant 0 : index
    %4 = vector.load %arg5[%c0_2, %c0_3] : memref<1024x512xbf16, #tpu.memory_space<vmem>>, vector<1024x512xbf16>
    %cst = arith.constant dense<0.000000e+00> : vector<8x512xf32>
    %5 = tpu.matmul %3, %4, %cst {dimension_numbers = #tpu.dot_dimension_numbers<[1], [0], [0], [1], [0, 0, 1, 1], [], []>} : vector<8x1024xbf16>, vector<1024x512xbf16>, vector<8x512xf32> -> vector<8x512xf32>
    %c0_4 = arith.constant 0 : index
    %c0_5 = arith.constant 0 : index
    %6 = vector.load %arg6[%c0_4, %c0_5] : memref<1x512xf32, #tpu.memory_space<vmem>>, vector<1x512xf32>
    %7 = vector.broadcast %6 : vector<1x512xf32> to vector<8x512xf32>
    %8 = arith.addf %5, %7 : vector<8x512xf32>
    %cst_6 = arith.constant 0.000000e+00 : f32
    %9 = vector.broadcast %cst_6 : f32 to vector<8x512xf32>
    %10 = arith.maximumf %8, %9 : vector<8x512xf32>
    %c0_7 = arith.constant 0 : index
    %c0_8 = arith.constant 0 : index
    %11 = vector.load %arg11[%c0_7, %c0_8] : memref<8x128xf32, #tpu.memory_space<vmem>>, vector<8x128xf32>
    %12 = arith.truncf %10 : vector<8x512xf32> to vector<8x512xbf16>
    %c0_9 = arith.constant 0 : index
    %c0_10 = arith.constant 0 : index
    %13 = vector.load %arg7[%c0_9, %c0_10] : memref<512x128xbf16, #tpu.memory_space<vmem>>, vector<512x128xbf16>
    %cst_11 = arith.constant dense<0.000000e+00> : vector<8x128xf32>
    %14 = tpu.matmul %12, %13, %cst_11 {dimension_numbers = #tpu.dot_dimension_numbers<[1], [0], [0], [1], [0, 0, 1, 1], [], []>} : vector<8x512xbf16>, vector<512x128xbf16>, vector<8x128xf32> -> vector<8x128xf32>
    %15 = arith.addf %11, %14 : vector<8x128xf32>
    %c0_12 = arith.constant 0 : index
    %c0_13 = arith.constant 0 : index
    %16 = vector.load %arg11[%c0_12, %c0_13] : memref<8x128xf32, #tpu.memory_space<vmem>>, vector<8x128xf32>
    tpu.vector_store %arg11[%c0_12, %c0_13], %15 {strides = array<i32>} : memref<8x128xf32, #tpu.memory_space<vmem>>, vector<8x128xf32>,
    %c3_i32 = arith.constant 3 : i32
    %17 = arith.cmpi eq, %arg1, %c3_i32 : i32
    %18 = arith.extui %17 : i1 to i32
    %c0_i32_14 = arith.constant 0 : i32
    %19 = arith.cmpi ne, %18, %c0_i32_14 : i32
    scf.if %19 {
      %c0_15 = arith.constant 0 : index
      %c0_16 = arith.constant 0 : index
      %20 = vector.load %arg11[%c0_15, %c0_16] : memref<8x128xf32, #tpu.memory_space<vmem>>, vector<8x128xf32>
      %cst_17 = arith.constant dense<0xFF800000> : vector<8xf32>
      %21 = vector.multi_reduction <maximumf>, %20, %cst_17 [1] : vector<8x128xf32> to vector<8xf32>
      %22 = vector.shape_cast %21 : vector<8xf32> to vector<8x1xf32>
      %23 = vector.broadcast %22 : vector<8x1xf32> to vector<8x128xf32>
      %24 = arith.subf %20, %23 : vector<8x128xf32>
      %25 = math.exp %24 : vector<8x128xf32>
      %cst_18 = arith.constant dense<0.000000e+00> : vector<8xf32>
      %26 = vector.multi_reduction <add>, %25, %cst_18 [1] : vector<8x128xf32> to vector<8xf32>
      %27 = vector.shape_cast %26 : vector<8xf32> to vector<8x1xf32>
      %28 = math.log %27 : vector<8x1xf32>
      %29 = arith.addf %28, %22 : vector<8x1xf32>
      %30 = vector.broadcast %29 : vector<8x1xf32> to vector<8x128xf32>
      %31 = arith.subf %20, %30 : vector<8x128xf32>
      %c0_19 = arith.constant 0 : index
      %c0_20 = arith.constant 0 : index
      %32 = vector.load %arg9[%c0_19, %c0_20] : memref<8x128xf32, #tpu.memory_space<vmem>>, vector<8x128xf32>
      tpu.vector_store %arg9[%c0_19, %c0_20], %31 {strides = array<i32>} : memref<8x128xf32, #tpu.memory_space<vmem>>, vector<8x128xf32>,
    } else {
    }
    return
  }
  func.func @transform_0(%arg0: i32, %arg1: i32) -> (i32, i32) {
    %c0_i32 = arith.constant 0 : i32
    %c0_i32_0 = arith.constant 0 : i32
    return %arg0, %c0_i32 : i32, i32
  }
  func.func @transform_1(%arg0: i32, %arg1: i32) -> (i32, i32) {
    %c0_i32 = arith.constant 0 : i32
    %c0_i32_0 = arith.constant 0 : i32
    %c0_i32_1 = arith.constant 0 : i32
    return %c0_i32, %c0_i32_0 : i32, i32
  }
  func.func @transform_2(%arg0: i32, %arg1: i32) -> (i32, i32) {
    %c0_i32 = arith.constant 0 : i32
    %c0_i32_0 = arith.constant 0 : i32
    %c0_i32_1 = arith.constant 0 : i32
    return %c0_i32, %c0_i32_0 : i32, i32
  }
  func.func @transform_3(%arg0: i32, %arg1: i32) -> (i32, i32) {
    %c0_i32 = arith.constant 0 : i32
    %c0_i32_0 = arith.constant 0 : i32
    return %c0_i32, %arg1 : i32, i32
  }
  func.func @transform_4(%arg0: i32, %arg1: i32) -> (i32, i32) {
    %c0_i32 = arith.constant 0 : i32
    %c0_i32_0 = arith.constant 0 : i32
    return %c0_i32, %arg1 : i32, i32
  }
  func.func @transform_5(%arg0: i32, %arg1: i32) -> (i32, i32) {
    %c0_i32 = arith.constant 0 : i32
    %c0_i32_0 = arith.constant 0 : i32
    return %arg1, %c0_i32 : i32, i32
  }
  func.func @transform_6(%arg0: i32, %arg1: i32) -> (i32, i32) {
    %c0_i32 = arith.constant 0 : i32
    %c0_i32_0 = arith.constant 0 : i32
    %c0_i32_1 = arith.constant 0 : i32
    return %c0_i32, %c0_i32_0 : i32, i32
  }
  func.func @transform_7(%arg0: i32, %arg1: i32) -> (i32, i32) {
    %c0_i32 = arith.constant 0 : i32
    %c0_i32_0 = arith.constant 0 : i32
    return %arg0, %c0_i32 : i32, i32
  }
}

</mosaic_0001>

<bundles_post_ra>
// kernel: tpu_custom_call.1
= control target key start
LH: loop header
LB: loop body
LE: loop exit
PB: predicated region body
PF: predicated region fallthrough
CT: control target
= control target key end

     0   :  { %s8508_s0 = inlined_call_operand.hbm [shape: f32[8,784], index: 0, kind: input, shape index: {}]   ;;  %s8509_s1 = inlined_call_operand.hbm [shape: bf16[784,1024], index: 1, kind: input, shape index: {}]   ;;  %s8510_s2 = inlined_call_operand.hbm [shape: f32[1,1024], index: 2, kind: input, shape index: {}]   ;;  %s8511_s3 = inlined_call_operand.hbm [shape: bf16[1024,2048], index: 3, kind: input, shape index: {}]   ;;  %s8512_s4 = inlined_call_operand.hbm [shape: f32[1,2048], index: 4, kind: input, shape index: {}]   ;;  %s8513_s5 = inlined_call_operand.hbm [shape: bf16[2048,128], index: 5, kind: input, shape index: {}]   ;;  %s8514_s6 = inlined_call_operand.hbm [shape: f32[1,128], index: 6, kind: input, shape index: {}]   ;;  %s8515_s7 = inlined_call_operand.hbm [shape: f32[8,128], index: 7, kind: output, shape index: {}]  }
   0x1   :  { %8533 = sst [smem:[#allocation28_spill]] %s8509_s1 }
   0x2   :  { %8534 = sst [smem:[#allocation29_spill]] %s8511_s3 }
   0x3   :  { %8535 = sst [smem:[#allocation30_spill]] %s8514_s6 }
   0x4   :  { %8536 = sst [smem:[#allocation31_spill]] %s8515_s7 }
   0x5   :  { %12 = vsyncpa [#allocation5], 0 }
   0x6   :  { %13 = vsyncpa [#allocation8], 0 }
   0x7   :  { %14 = vsyncpa [#allocation11], 0 }
   0x8   :  { %16 = vsyncpa [#allocation11 + $0x1], 0 }
   0x9   :  { %17 = vsyncpa [#allocation14], 0 }
   0xa   :  { %19 = vsyncpa [#allocation14 + $0x1], 0 }
   0xb   :  { %20 = vsyncpa [#allocation6], 0  ;;  %s7815_s24 = smov 0   ;;  %s7817_s25 = smov 0  }
   0xc   :  { %s7819_s26 = smov 0   ;;  %s7821_s27 = smov 0  }
   0xd   :  { %s7823_s28 = smov 0   ;;  %s7825_s29 = smov 0  }
   0xe LB: > { %8537 = sst [smem:[#allocation23_spill]] %s7745_s26  ;;  %s7844_s30 = sadd.s32 4294967295, %s7757_s29   ;;  %s7757_s29 = sphi %s7825_s29, %s26_s29   ;;  %s7753_s28 = sphi %s7823_s28, %s8575_s28   ;;  %s7749_s27 = sphi %s7821_s27, %s8574_s27   ;;  %s7745_s26 = sphi %s7819_s26, %s8570_s26   ;;  %s7741_s25 = sphi %s7817_s25, %s8573_s25   ;;  %s7737_s24 = sphi %s7815_s24, %s8572_s24  }
   0xf   : > { %8538 = sst [smem:[#allocation24_spill]] %s7749_s27  ;;  %p126_p0 = scmp.ne.s32.totalorder %s7741_s25, %s7737_s24 }
  0x10   : > { %p8516_p1 = scmp.eq.s32.totalorder %s7844_s30, 0  ;;  %p6033_p2 = scmp.ge.s32.totalorder %s7757_s29, 1 }
  0x11   : > { %p236_p3 = scmp.lt.s32.totalorder %s7757_s29, 5  ;;  %s7759_s10 = smov [#allocation7]  }
  0x12   : > { %p7852_p4 = por %p8516_p1, %p126_p0  ;;  %s262_s11 = sshll.u32 %s7759_s10, 4  ;;  %s263_s11 = int_to_ptr.vmem [resolvable:$true] %s262_s11 }
  0x13   : > { %p7856_p5 = pnand %p6033_p2, %p236_p3  ;;  %s7760_s13 = smov [#allocation15]  }
  0x14   : > { %s8539_s8 = scalar_select %p7852_p4, 1, 0 }
  0x15   : > { %s8541_s9 = scalar_select %p7856_p5, 1, 0 }
  0x16   : > { %8540 = sst [smem:[#allocation25_spill]] %s8539_s8  ;;  %p6920_p6 = pneg %p7856_p5 }
  0x17   : > { %s287_s14 = sshll.u32 %s7760_s13, 4  ;;  %s8543_s1 = sld [smem:[#allocation28_spill]]  ;;  %s7868_s14 = int_to_ptr.vmem [resolvable:$true] %s287_s14 }
  0x18   : > { %p7864_p7 = pnand %p6920_p6, %p8516_p1 }
  0x1a   : > { %s8542_s12 = scalar_select %p7864_p7, 1, 0 }
  0x1b   : > { %p7878_p9 = pneg %p7864_p7 }
  0x1d   : > { %s7459_s17 = scalar_lea.hbm %s8543_s1, 50176 }
  0x1e   : > { %p7460_p8 = scmp.ne.s32.totalorder %s8543_s1, %s7459_s17  ;;  %p7466_p12 = scmp.lt.u32.totalorder %s7459_s17, %s8543_s1 }
  0x1f   : > { %s8544_s20 = scalar_select %p7878_p9, 1, 0 }
  0x20   : > { %p7462_p10 = pnand %p7878_p9, %p7460_p8 }
  0x22   : > { %p7463_p11 = pneg %p7462_p10 }
  0x24   : > { %p7468_p13 = pnand %p7466_p12, %p7463_p11 }
  0x26   : > { %7471 = shalt.err (!%p7468_p13)
}
  0x27   : > { %s7472_s23 = scalar_lea.vmem %s263_s11, 50176  ;;  %p7480_p6 = scmp.lt.s32.totalorder %s263_s11, %s263_s11 }
  0x28   : > { %p7473_p0 = scmp.ne.s32.totalorder %s263_s11, %s7472_s23  ;;  %p7481_p1 = scmp.lt.s32.totalorder %s7472_s23, %s7472_s23 }
  0x2a   : > { %p7475_p2 = pnand %p7473_p0, %p7878_p9  ;;  %p7482_p4 = por %p7481_p1, %p7480_p6 }
  0x2c   : > { %p7476_p3 = pneg %p7475_p2 }
  0x2e   : > { %p7483_p5 = pnand %p7482_p4, %p7476_p3 }
  0x30   : > { %7486 = shalt.err (!%p7483_p5)
}
  0x31   : > { %s7761_s24 = smov 512   ;;  %s7762_s10 = smov 32  }
  0x32   : > { %6926 = dma.hbm_to_vmem [thread:$0]  (!%p7864_p7), %s8543_s1, 50176, %s263_s11, [#allocation8], %s7761_s24, %s7761_s24, %s7762_s10  }
  0x33   : > { %s8545_s6 = sld [smem:[#allocation30_spill]] }
  0x39   : > { %s7487_s18 = scalar_lea.hbm %s8545_s6, 16 }
  0x3a   : > { %p7488_p8 = scmp.ne.s32.totalorder %s8545_s6, %s7487_s18  ;;  %p7494_p5 = scmp.lt.u32.totalorder %s7487_s18, %s8545_s6 }
  0x3c   : > { %p7490_p1 = pnand %p7488_p8, %p7878_p9 }
  0x3e   : > { %p7491_p4 = pneg %p7490_p1 }
  0x40   : > { %p7496_p10 = pnand %p7494_p5, %p7491_p4 }
  0x42   : > { %7499 = shalt.err (!%p7496_p10)
}
  0x43   : > { %s7500_s11 = scalar_lea.vmem %s7868_s14, 16  ;;  %s7507_s24 = scalar_lea.vmem %s7868_s14, 32 }
  0x44   : > { %p7501_p11 = scmp.ne.s32.totalorder %s7868_s14, %s7500_s11  ;;  %p7508_p0 = scmp.lt.s32.totalorder %s7868_s14, %s7868_s14 }
  0x45   : > { %p7509_p2 = scmp.lt.s32.totalorder %s7507_s24, %s7500_s11 }
  0x46   : > { %p7503_p12 = pnand %p7501_p11, %p7878_p9 }
  0x47   : > { %p7510_p3 = por %p7509_p2, %p7508_p0 }
  0x48   : > { %p7504_p13 = pneg %p7503_p12 }
  0x4a   : > { %p7511_p6 = pnand %p7510_p3, %p7504_p13 }
  0x4c   : > { %7514 = shalt.err (!%p7511_p6)
}
  0x4d   : > { %6932 = dma.hbm_to_vmem [thread:$0]  (!%p7864_p7), %s8545_s6, 16, %s7868_s14, [#allocation14]  }
  0x4e   : > { %s35_s15 = sadd.s32 1, %s7753_s28  ;;  %s113_s16 = sadd.s32 1, %s7745_s26 }
  0x4f   : > { %p36_p8 = scmp.ge.s32.totalorder %s35_s15, 4  ;;  %p120_p1 = scmp.ne.s32.totalorder %s7745_s26, %s7741_s25 }
  0x50   : > { %p121_p4 = scmp.eq.s32.totalorder %s7757_s29, 0  ;;  %p6947_p5 = scmp.lt.s32.totalorder %s7757_s29, 4 }
  0x51   : > { %s8577_s15 = smov (%p36_p8, %s35_s15), 0  ;;  %s8519_s17 = sand.u32 1, %s7757_s29  }
  0x52   : > { %8546 = sst [smem:[#allocation26_spill]] %s8577_s15  ;;  %p122_p10 = por %p121_p4, %p120_p1 }
  0x53   : > { %s110_s18 = ssub.s32 %s7753_s28, %s8577_s15  ;;  %s7930_s19 = sand.u32 1, %s7745_s26  }
  0x54   : > { %p111_p11 = scmp.eq.s32.totalorder %s110_s18, 0  ;;  %s6039_s21 = sshll.u32 %s7930_s19, 11 }
  0x55   : > { %s6759_s14 = sshll.u32 %s7753_s28, 8  ;;  %s8548_s3 = sld [smem:[#allocation29_spill]] }
  0x56   : > { %s7935_s22 = scalar_select %p111_p11, %s7745_s26, %s113_s16  }
  0x57   : > { %s302_s10 = scalar_lea.vmem [#allocation10], %s6039_s21  ;;  %p7944_p12 = pnand %p6947_p5, %p122_p10 }
  0x58   : > { %8547 = sst [smem:[#allocation27_spill]] %s7935_s22  ;;  %s309_s13 = sshll.u32 %s302_s10, 4  ;;  %s7948_s13 = int_to_ptr.vmem [resolvable:$true] %s309_s13 }
  0x59   : > { %s8549_s18 = scalar_select %p7944_p12, 1, 0 }
  0x5a   : > { %s7952_s16 = scalar_lea.sflag [#allocation11], %s8519_s17  ;;  %p7958_p0 = pneg %p7944_p12 }
  0x5b   : > { %s7940_s24 = scalar_lea.hbm %s8548_s3, %s6759_s14  ;;  %s7520_s10 = scalar_lea.hbm %s8548_s3, 131072 }
  0x5c   : > { %s7515_s23 = scalar_lea.hbm %s7940_s24, 32768  ;;  %p7521_p6 = scmp.lt.u32.totalorder %s7940_s24, %s8548_s3 }
  0x5d   : > { %p7516_p13 = scmp.ne.s32.totalorder %s7940_s24, %s7515_s23  ;;  %p7522_p8 = scmp.lt.u32.totalorder %s7520_s10, %s7515_s23 }
  0x5e   : > { %s8550_s14 = scalar_select %p7958_p0, 1, 0 }
  0x5f   : > { %p7518_p2 = pnand %p7958_p0, %p7516_p13  ;;  %p7523_p1 = por %p7522_p8, %p7521_p6 }
  0x60   : > { %p7524_p4 = scmp.lt.u32.totalorder %s7515_s23, %s7940_s24 }
  0x61   : > { %p7519_p3 = pneg %p7518_p2 }
  0x62   : > { %p7525_p5 = por %p7524_p4, %p7523_p1 }
  0x64   : > { %p7526_p10 = pnand %p7525_p5, %p7519_p3 }
  0x66   : > { %7529 = shalt.err (!%p7526_p10)
}
  0x67   : > { %s7530_s17 = scalar_lea.vmem %s7948_s13, 32768  ;;  %s7763_s21 = smov [#allocation10]  }
  0x68   : > { %p7531_p11 = scmp.ne.s32.totalorder %s7948_s13, %s7530_s17  ;;  %s7535_s11 = sshll.u32 %s7763_s21, 4  ;;  %s7536_s11 = int_to_ptr.vmem [resolvable:$false] %s7535_s11 }
  0x69   : > { %s7537_s1 = scalar_lea.vmem %s7536_s11, 65536  ;;  %p7538_p7 = scmp.lt.s32.totalorder %s7948_s13, %s7536_s11 }
  0x6a   : > { %p7533_p13 = pnand %p7531_p11, %p7958_p0  ;;  %p7539_p9 = scmp.lt.s32.totalorder %s7537_s1, %s7530_s17 }
  0x6c   : > { %p7534_p2 = pneg %p7533_p13  ;;  %p7540_p6 = por %p7539_p9, %p7538_p7 }
  0x6e   : > { %p7541_p8 = pnand %p7540_p6, %p7534_p2 }
  0x70   : > { %7544 = shalt.err (!%p7541_p8)
}
  0x71   : > { %s7764_s6 = smov 1024   ;;  %s7765_s23 = smov 256  }
  0x72   : > { %s7766_s10 = smov 16   ;;  %s7767_s3 = smov [#allocation4]  }
  0x73   : > { %6936 = dma.hbm_to_vmem [thread:$0]  (!%p7944_p12), %s7940_s24, 32768, %s7948_s13, %s7952_s16, %s7764_s6, %s7765_s23, %s7766_s10  }
  0x74   : > { %s252_s15 = sshll.u32 %s7767_s3, 4  ;;  %s7768_s21 = smov [#allocation9]   ;;  %s253_s15 = int_to_ptr.vmem [resolvable:$true] %s252_s15 }
  0x75   : > { %s276_s22 = sshll.u32 %s7768_s21, 4  ;;  %s7545_s1 = scalar_lea.hbm %s8508_s0, 896  ;;  %s277_s22 = int_to_ptr.vmem [resolvable:$true] %s276_s22 }
  0x76   : > { %p7546_p7 = scmp.ne.s32.totalorder %s8508_s0, %s7545_s1  ;;  %p8551_p9 = scmp.ne.s32.totalorder %s8544_s20, 0 }
  0x77   : > { %p7552_p4 = scmp.lt.u32.totalorder %s7545_s1, %s8508_s0 }
  0x78   : > { %p7548_p3 = pnand %p7546_p7, %p8551_p9 }
  0x7a   : > { %p7549_p1 = pneg %p7548_p3 }
  0x7c   : > { %p7554_p5 = pnand %p7552_p4, %p7549_p1 }
  0x7e   : > { %7557 = shalt.err (!%p7554_p5)
}
  0x7f   : > { %s7558_s3 = scalar_lea.vmem %s253_s15, 896  ;;  %p7566_p2 = scmp.lt.s32.totalorder %s253_s15, %s253_s15 }
  0x80   : > { %p7559_p10 = scmp.ne.s32.totalorder %s253_s15, %s7558_s3  ;;  %p7567_p6 = scmp.lt.s32.totalorder %s7558_s3, %s7558_s3 }
  0x82   : > { %p7561_p11 = pnand %p7559_p10, %p8551_p9  ;;  %p7568_p8 = por %p7567_p6, %p7566_p2 }
  0x84   : > { %p7562_p13 = pneg %p7561_p11 }
  0x86   : > { %p7569_p12 = pnand %p7568_p8, %p7562_p13 }
  0x88   : > { %7572 = shalt.err (!%p7569_p12)
}
  0x89   : > { %p8552_p7 = scmp.ne.s32.totalorder %s8542_s12, 0  ;;  %s6042_s27 = sshll.u32 %s7930_s19, 2 }
  0x8a   : > { %s7573_s13 = scalar_lea.hbm %s8510_s2, 128 }
  0x8b   : > { %6923 = dma.hbm_to_vmem [thread:$0]  (!%p8552_p7), %s8508_s0, 896, %s253_s15, [#allocation5]  }
  0x8c   : > { %p7574_p3 = scmp.ne.s32.totalorder %s8510_s2, %s7573_s13  ;;  %p7580_p4 = scmp.lt.u32.totalorder %s7573_s13, %s8510_s2 }
  0x8e   : > { %p7576_p12 = pnand %p7574_p3, %p8551_p9 }
  0x90   : > { %p7577_p1 = pneg %p7576_p12 }
  0x92   : > { %p7582_p5 = pnand %p7580_p4, %p7577_p1 }
  0x94   : > { %7585 = shalt.err (!%p7582_p5)
}
  0x95   : > { %s7586_s15 = scalar_lea.vmem %s277_s22, 128  ;;  %p7594_p2 = scmp.lt.s32.totalorder %s277_s22, %s277_s22 }
  0x96   : > { %p7587_p10 = scmp.ne.s32.totalorder %s277_s22, %s7586_s15  ;;  %p7595_p6 = scmp.lt.s32.totalorder %s7586_s15, %s7586_s15 }
  0x98   : > { %p7589_p11 = pnand %p7587_p10, %p8551_p9  ;;  %p7596_p8 = por %p7595_p6, %p7594_p2 }
  0x9a   : > { %p7590_p13 = pneg %p7589_p11 }
  0x9c   : > { %p7597_p0 = pnand %p7596_p8, %p7590_p13 }
  0x9e   : > { %7600 = shalt.err (!%p7597_p0)
}
  0x9f   : > { %6929 = dma.hbm_to_vmem [thread:$0]  (!%p8552_p7), %s8510_s2, 128, %s277_s22, [#allocation8]  }
  0xa0   : > { %s6760_s1 = sshll.u32 %s7753_s28, 6  ;;  %s323_s26 = scalar_lea.vmem [#allocation12], %s6042_s27 }
  0xa1   : > { %s8023_s20 = scalar_lea.hbm %s8512_s4, %s6760_s1  ;;  %s331_s8 = sshll.u32 %s323_s26, 4  ;;  %s332_s8 = int_to_ptr.vmem [resolvable:$true] %s331_s8 }
  0xa2   : > { %s7601_s12 = scalar_lea.hbm %s8023_s20, 64  ;;  %p8553_p9 = scmp.ne.s32.totalorder %s8550_s14, 0 }
  0xa3   : > { %p7602_p0 = scmp.ne.s32.totalorder %s8023_s20, %s7601_s12  ;;  %s7606_s13 = scalar_lea.hbm %s8512_s4, 256 }
  0xa4   : > { %p7607_p7 = scmp.lt.u32.totalorder %s8023_s20, %s8512_s4  ;;  %p7608_p1 = scmp.lt.u32.totalorder %s7606_s13, %s7601_s12 }
  0xa5   : > { %p7604_p3 = pnand %p7602_p0, %p8553_p9  ;;  %p7610_p5 = scmp.lt.u32.totalorder %s7601_s12, %s8023_s20 }
  0xa6   : > { %p7609_p4 = por %p7608_p1, %p7607_p7 }
  0xa7   : > { %p7605_p12 = pneg %p7604_p3 }
  0xa8   : > { %p7611_p10 = por %p7610_p5, %p7609_p4 }
  0xaa   : > { %p7612_p11 = pnand %p7611_p10, %p7605_p12 }
  0xac   : > { %7615 = shalt.err (!%p7612_p11)
}
  0xad   : > { %s7616_s27 = scalar_lea.vmem %s332_s8, 64  ;;  %s7769_s10 = smov [#allocation12]  }
  0xae   : > { %p7617_p13 = scmp.ne.s32.totalorder %s332_s8, %s7616_s27  ;;  %s7621_s21 = sshll.u32 %s7769_s10, 4  ;;  %s7622_s21 = int_to_ptr.vmem [resolvable:$false] %s7621_s21 }
  0xaf   : > { %s7623_s15 = scalar_lea.vmem %s7622_s21, 128  ;;  %p7624_p8 = scmp.lt.s32.totalorder %s332_s8, %s7622_s21 }
  0xb0   : > { %p7619_p2 = pnand %p7617_p13, %p8553_p9  ;;  %p7625_p0 = scmp.lt.s32.totalorder %s7623_s15, %s7616_s27 }
  0xb2   : > { %p7620_p6 = pneg %p7619_p2  ;;  %p7626_p3 = por %p7625_p0, %p7624_p8 }
  0xb4   : > { %p7627_p1 = pnand %p7626_p3, %p7620_p6 }
  0xb6   : > { %7630 = shalt.err (!%p7627_p1)
}
  0xb7   : > { %p8554_p7 = scmp.ne.s32.totalorder %s8549_s18, 0  ;;  %s6045_s11 = sshll.u32 %s7930_s19, 8 }
  0xb8   : > { %s6761_s17 = sshll.u32 %s7753_s28, 12  ;;  %s342_s26 = scalar_lea.vmem [#allocation13], %s6045_s11 }
  0xb9   : > { %6939 = dma.hbm_to_vmem [thread:$0]  (!%p8554_p7), %s8023_s20, 64, %s332_s8, %s7952_s16  }
  0xba   : > { %s8048_s7 = scalar_lea.hbm %s8513_s5, %s6761_s17  ;;  %s349_s12 = sshll.u32 %s342_s26, 4  ;;  %s8050_s12 = int_to_ptr.vmem [resolvable:$true] %s349_s12 }
  0xbb   : > { %s8555_s24 = sand.u32 1, %s7757_s29   ;;  %s7631_s13 = scalar_lea.hbm %s8048_s7, 4096 }
  0xbc   : > { %s8054_s22 = scalar_lea.sflag [#allocation14], %s8555_s24  ;;  %p7632_p12 = scmp.ne.s32.totalorder %s8048_s7, %s7631_s13 }
  0xbd   : > { %s7636_s20 = scalar_lea.hbm %s8513_s5, 16384  ;;  %p7637_p10 = scmp.lt.u32.totalorder %s8048_s7, %s8513_s5 }
  0xbe   : > { %p7634_p4 = pnand %p7632_p12, %p8553_p9  ;;  %p7638_p11 = scmp.lt.u32.totalorder %s7636_s20, %s7631_s13 }
  0xbf   : > { %p7640_p2 = scmp.lt.u32.totalorder %s7631_s13, %s8048_s7 }
  0xc0   : > { %p7635_p5 = pneg %p7634_p4  ;;  %p7639_p13 = por %p7638_p11, %p7637_p10 }
  0xc2   : > { %p7641_p6 = por %p7640_p2, %p7639_p13 }
  0xc4   : > { %p7642_p8 = pnand %p7641_p6, %p7635_p5 }
  0xc6   : > { %7645 = shalt.err (!%p7642_p8)
}
  0xc7   : > { %s7646_s23 = scalar_lea.vmem %s8050_s12, 4096  ;;  %s7770_s27 = smov [#allocation13]  }
  0xc8   : > { %p7647_p0 = scmp.ne.s32.totalorder %s8050_s12, %s7646_s23  ;;  %s7651_s10 = sshll.u32 %s7770_s27, 4  ;;  %s7652_s10 = int_to_ptr.vmem [resolvable:$false] %s7651_s10 }
  0xc9   : > { %s7653_s21 = scalar_lea.vmem %s7652_s10, 8192  ;;  %p7654_p12 = scmp.lt.s32.totalorder %s8050_s12, %s7652_s10 }
  0xca   : > { %p7649_p3 = pnand %p7647_p0, %p8553_p9  ;;  %p7655_p4 = scmp.lt.s32.totalorder %s7653_s21, %s7646_s23 }
  0xcc   : > { %p7650_p1 = pneg %p7649_p3  ;;  %p7656_p10 = por %p7655_p4, %p7654_p12 }
  0xce   : > { %p7657_p11 = pnand %p7656_p10, %p7650_p1 }
  0xd0   : > { %7660 = shalt.err (!%p7657_p11)
}
  0xd1   : > { %s7771_s15 = smov 64   ;;  %s7772_s11 = smov 4  }
  0xd2   : > { %6942 = dma.hbm_to_vmem [thread:$0]  (!%p8554_p7), %s8048_s7, 4096, %s8050_s12, %s8054_s22, %s7771_s15, %s7771_s15, %s7772_s11  }
  0xd3   : > { %p8556_p9 = scmp.ne.s32.totalorder %s8541_s9, 0 }
  0xd4   : > { %p8557_p5 = scmp.eq.s32.totalorder (!%p8556_p9), %s7844_s30, 0 }
  0xd5   : > { %361 = sbr.rel (%p8556_p9) target bundleno = 1948 (0x79c), region = 48 }
  0xdc   : > { %7712 = dma.done.wait (%p8557_p5), [#allocation5], 896   ;;  %p8558_p13 = pmov %p8557_p5 }
  0xdd   : > { %p8559_p2 = pmov %p8557_p5 }
  0xde   : > { %7714 = vsyncadd (%p8558_p13), [#allocation5], 4294966400 }
  0xdf   : > { %7716 = dma.done.wait (%p8559_p2), [#allocation8], 50304   ;;  %p8560_p6 = pmov %p8559_p2 }
  0xe0   : > { %s8561_s14 = sld [smem:[#allocation25_spill]]  ;;  %s375_s18 = sand.u32 1, %s7844_s30  }
  0xe1   : > { %7718 = vsyncadd (%p8560_p6), [#allocation8], 4294916992  ;;  %s377_s17 = sand.u32 1, %s7741_s25   ;;  %s376_s9 = scalar_lea.sflag [#allocation11], %s375_s18 }
  0xe2   : > { %s6052_s1 = sshll.u32 %s377_s17, 11 }
  0xe3   : > { %s8090_s3 = scalar_lea.vmem [#allocation10], %s6052_s1 }
  0xe6   : > { %p8562_p7 = scmp.ne.s32.totalorder %s8561_s14, 0 }
  0xe8   : > { %7720 = dma.done.wait (%p8562_p7), %s376_s9, 32832  }
  0xe9   : > { %7722 = vsyncadd (%p8562_p7), %s376_s9, 4294934464  ;;  %s6053_s7 = sshll.u32 %s377_s17, 2  ;;  %s6054_s26 = sshll.u32 %s377_s17, 8 }
  0xea   : > { %s8096_s12 = scalar_lea.vmem [#allocation12], %s6053_s7  ;;  %s394_s24 = scalar_lea.sflag [#allocation14], %s375_s18 }
  0xeb   : > { %s8098_s22 = scalar_lea.vmem [#allocation13], %s6054_s26 }
  0xec   : > { %7724 = dma.done.wait (%p8562_p7), %s394_s24, 4096  }
  0xed   : > { %7726 = vsyncadd (%p8562_p7), %s394_s24, 4294963200  ;;  %p8563_p8 = pmov %p8559_p2 }
  0xee   : > { %p8564_p0 = pmov %p8559_p2 }
  0xef   : > { %7728 = dma.done.wait (%p8563_p8), [#allocation14], 16  }
  0xf0   : > { %7730 = vsyncadd (%p8564_p0), [#allocation14], 4294967280  ;;  %s8565_s13 = sld [smem:[#allocation24_spill]] }
  0xf6   : > { %p6056_p3 = scmp.ne.s32.totalorder %s8565_s13, 0 }
  0xf7   : > { %v6057_v0 = vld [vmem:[#allocation15] ss:$0 sm:$0xff] (!%p6056_p3)  ;;  %v467_v1 = vld [vmem:[#allocation7] sm:$0xff] (!%p6056_p3)  ;;  %v1252_v4 = vld [vmem:[#allocation7 + $0x8] sm:$0xff] (!%p6056_p3)  ;;  %vm1067_vm0 = vcmask (!%p6056_p3), 130048  }
  0xf8   : > { %444 = sbr.rel (%p6056_p3) target bundleno = 896 (0x380), region = 80  ;;  %v468_v2 = vld [vmem:[#allocation7 + $0x20] sm:$0xff] (!%p6056_p3)  ;;  %452 = vst [vmem:[#allocation3] sm:$0xff] (!%p6056_p3), %v6057_v0  ;;  %v1253_v5 = vld [vmem:[#allocation7 + $0x28] sm:$0xff] (!%p6056_p3)  ;;  %v454_v54 = vld [vmem:[#allocation4 + $0x8] sm:$0xff] (!%p6056_p3) }
  0xf9   : > { %v6059_v3 = vcombine.high (!%p6056_p3), %v467_v1, %v468_v2  ;;  %v6058_v6 = vcombine.low (!%p6056_p3), %v467_v1, %v468_v2  ;;  %v469_v7 = vld [vmem:[#allocation7 + $0x40] sm:$0xff] (!%p6056_p3)  ;;  %v6159_v8 = vcombine.high (!%p6056_p3), %v1252_v4, %v1253_v5  ;;  %v6158_v9 = vcombine.low (!%p6056_p3), %v1252_v4, %v1253_v5  ;;  %v1254_v11 = vld [vmem:[#allocation7 + $0x48] sm:$0xff] (!%p6056_p3) }
  0xfa   : > { %v470_v10 = vld [vmem:[#allocation7 + $0x60] sm:$0xff] (!%p6056_p3)  ;;  %v1255_v12 = vld [vmem:[#allocation7 + $0x68] sm:$0xff] (!%p6056_p3)  ;;  %v8109_v58 = vpack.c.bf16 (!%p6056_p3), %v454_v54, %v454_v54 }
  0xfb   : > { %1071 = vmatprep.subr.bf16.mxu0 (!%p6056_p3), %v6059_v3  ;;  %v6061_v13 = vcombine.high (!%p6056_p3), %v469_v7, %v470_v10  ;;  %v6161_v14 = vcombine.high (!%p6056_p3), %v1254_v11, %v1255_v12  ;;  %v471_v15 = vld [vmem:[#allocation7 + $0x80] sm:$0xff] (!%p6056_p3)  ;;  %v1256_v17 = vld [vmem:[#allocation7 + $0x88] sm:$0xff] (!%p6056_p3)  ;;  %1852 = vmatprep.subr.bf16.mxu1 (!%p6056_p3), %v6159_v8  ;;  %v6060_v18 = vcombine.low (!%p6056_p3), %v469_v7, %v470_v10 }
  0xfc   : > { %v472_v16 = vld [vmem:[#allocation7 + $0xa0] sm:$0xff] (!%p6056_p3)  ;;  %1072 = vmatpush1.bf16.msra.mxu0 (!%p6056_p3), %v6058_v6  ;;  %v1257_v19 = vld [vmem:[#allocation7 + $0xa8] sm:$0xff] (!%p6056_p3)  ;;  %1853 = vmatpush1.bf16.msra.mxu1 (!%p6056_p3), %v6158_v9  ;;  %v6160_v20 = vcombine.low (!%p6056_p3), %v1254_v11, %v1255_v12 }
  0xfd   : > { %1073 = vmatprep.subr.bf16.mxu0 (!%p6056_p3), %v6061_v13  ;;  %v6063_v21 = vcombine.high (!%p6056_p3), %v471_v15, %v472_v16  ;;  %1854 = vmatprep.subr.bf16.mxu1 (!%p6056_p3), %v6161_v14  ;;  %v6163_v22 = vcombine.high (!%p6056_p3), %v1256_v17, %v1257_v19  ;;  %v473_v23 = vld [vmem:[#allocation7 + $0xc0] sm:$0xff] (!%p6056_p3)  ;;  %v1258_v25 = vld [vmem:[#allocation7 + $0xc8] sm:$0xff] (!%p6056_p3)  ;;  %v6062_v27 = vcombine.low (!%p6056_p3), %v471_v15, %v472_v16 }
  0xfe   : > { %v474_v24 = vld [vmem:[#allocation7 + $0xe0] sm:$0xff] (!%p6056_p3)  ;;  %v1259_v26 = vld [vmem:[#allocation7 + $0xe8] sm:$0xff] (!%p6056_p3)  ;;  %v6162_v28 = vcombine.low (!%p6056_p3), %v1256_v17, %v1257_v19  ;;  %1103 = vmatprep.mubr.bf16.mxu0 (!%p6056_p3), %v8109_v58  ;;  %1884 = vmatprep.mubr.bf16.mxu1 (!%p6056_p3), %v8109_v58 }
  0xff   : > { %v6065_v29 = vcombine.high %v473_v23, %v474_v24  ;;  %v6165_v30 = vcombine.high %v1258_v25, %v1259_v26  ;;  %v475_v31 = vld [vmem:[#allocation7 + $0x100] sm:$0xff]  ;;  %v1260_v33 = vld [vmem:[#allocation7 + $0x108] sm:$0xff]  ;;  %v6064_v35 = vcombine.low %v473_v23, %v474_v24  ;;  %v6164_v36 = vcombine.low %v1258_v25, %v1259_v26 }
 0x100   : > { %1074 = vmatpush1.bf16.msra.mxu0 %v6060_v18  ;;  %1855 = vmatpush1.bf16.msra.mxu1 %v6160_v20  ;;  %v476_v32 = vld [vmem:[#allocation7 + $0x120] sm:$0xff]  ;;  %v1261_v34 = vld [vmem:[#allocation7 + $0x128] sm:$0xff] }
 0x101   : > { %1075 = vmatprep.subr.bf16.mxu0 %v6063_v21  ;;  %1856 = vmatprep.subr.bf16.mxu1 %v6163_v22  ;;  %v6067_v37 = vcombine.high %v475_v31, %v476_v32  ;;  %v6167_v38 = vcombine.high %v1260_v33, %v1261_v34  ;;  %v477_v39 = vld [vmem:[#allocation7 + $0x140] sm:$0xff]  ;;  %v1262_v41 = vld [vmem:[#allocation7 + $0x148] sm:$0xff]  ;;  %v6066_v43 = vcombine.low %v475_v31, %v476_v32 }
 0x102   : > { %v478_v40 = vld [vmem:[#allocation7 + $0x160] sm:$0xff]  ;;  %v1263_v42 = vld [vmem:[#allocation7 + $0x168] sm:$0xff]  ;;  %v6166_v44 = vcombine.low %v1260_v33, %v1261_v34 }
 0x103   : > { %v6069_v45 = vcombine.high %v477_v39, %v478_v40  ;;  %v6169_v46 = vcombine.high %v1262_v41, %v1263_v42  ;;  %v479_v47 = vld [vmem:[#allocation7 + $0x180] sm:$0xff]  ;;  %v1264_v49 = vld [vmem:[#allocation7 + $0x188] sm:$0xff]  ;;  %v6068_v51 = vcombine.low %v477_v39, %v478_v40  ;;  %v6168_v52 = vcombine.low %v1262_v41, %v1263_v42 }
 0x104   : > { %1076 = vmatpush1.bf16.msra.mxu0 %v6062_v27  ;;  %1857 = vmatpush1.bf16.msra.mxu1 %v6162_v28  ;;  %v480_v48 = vld [vmem:[#allocation7 + $0x1a0] sm:$0xff]  ;;  %v1265_v50 = vld [vmem:[#allocation7 + $0x1a8] sm:$0xff] }
 0x105   : > { %1077 = vmatprep.subr.bf16.mxu0 %v6065_v29  ;;  %1858 = vmatprep.subr.bf16.mxu1 %v6165_v30  ;;  %v6071_v53 = vcombine.high %v479_v47, %v480_v48  ;;  %v6171_v55 = vcombine.high %v1264_v49, %v1265_v50  ;;  %v481_v56 = vld [vmem:[#allocation7 + $0x1c0] sm:$0xff]  ;;  %v1266_v59 = vld [vmem:[#allocation7 + $0x1c8] sm:$0xff]  ;;  %v6070_v61 = vcombine.low %v479_v47, %v480_v48 }
 0x106   : > { %v482_v57 = vld [vmem:[#allocation7 + $0x1e0] sm:$0xff]  ;;  %v1267_v60 = vld [vmem:[#allocation7 + $0x1e8] sm:$0xff]  ;;  %v6170_v62 = vcombine.low %v1264_v49, %v1265_v50 }
 0x107   : > { %v6073_v63 = vcombine.high %v481_v56, %v482_v57  ;;  %v6173_v0 = vcombine.high %v1266_v59, %v1267_v60  ;;  %v483_v1 = vld [vmem:[#allocation7 + $0x200] sm:$0xff]  ;;  %v1268_v3 = vld [vmem:[#allocation7 + $0x208] sm:$0xff]  ;;  %v6072_v5 = vcombine.low %v481_v56, %v482_v57  ;;  %v6172_v6 = vcombine.low %v1266_v59, %v1267_v60 }
 0x108   : > { %1078 = vmatpush1.bf16.msra.mxu0 %v6064_v35  ;;  %1859 = vmatpush1.bf16.msra.mxu1 %v6164_v36  ;;  %v484_v2 = vld [vmem:[#allocation7 + $0x220] sm:$0xff]  ;;  %v1269_v4 = vld [vmem:[#allocation7 + $0x228] sm:$0xff] }
 0x109   : > { %1079 = vmatprep.subr.bf16.mxu0 %v6067_v37  ;;  %1860 = vmatprep.subr.bf16.mxu1 %v6167_v38  ;;  %v6075_v7 = vcombine.high %v483_v1, %v484_v2  ;;  %v6175_v8 = vcombine.high %v1268_v3, %v1269_v4  ;;  %v485_v9 = vld [vmem:[#allocation7 + $0x240] sm:$0xff]  ;;  %v1270_v11 = vld [vmem:[#allocation7 + $0x248] sm:$0xff]  ;;  %v6074_v13 = vcombine.low %v483_v1, %v484_v2 }
 0x10a   : > { %v486_v10 = vld [vmem:[#allocation7 + $0x260] sm:$0xff]  ;;  %v1271_v12 = vld [vmem:[#allocation7 + $0x268] sm:$0xff]  ;;  %v6174_v14 = vcombine.low %v1268_v3, %v1269_v4 }
 0x10b   : > { %v6077_v15 = vcombine.high %v485_v9, %v486_v10  ;;  %v6177_v16 = vcombine.high %v1270_v11, %v1271_v12  ;;  %v487_v17 = vld [vmem:[#allocation7 + $0x280] sm:$0xff]  ;;  %v1272_v19 = vld [vmem:[#allocation7 + $0x288] sm:$0xff]  ;;  %v6076_v21 = vcombine.low %v485_v9, %v486_v10  ;;  %v6176_v22 = vcombine.low %v1270_v11, %v1271_v12 }
 0x10c   : > { %1080 = vmatpush1.bf16.msra.mxu0 %v6066_v43  ;;  %1861 = vmatpush1.bf16.msra.mxu1 %v6166_v44  ;;  %v488_v18 = vld [vmem:[#allocation7 + $0x2a0] sm:$0xff]  ;;  %v1273_v20 = vld [vmem:[#allocation7 + $0x2a8] sm:$0xff] }
 0x10d   : > { %1081 = vmatprep.subr.bf16.mxu0 %v6069_v45  ;;  %1862 = vmatprep.subr.bf16.mxu1 %v6169_v46  ;;  %v6079_v23 = vcombine.high %v487_v17, %v488_v18  ;;  %v6179_v24 = vcombine.high %v1272_v19, %v1273_v20  ;;  %v489_v25 = vld [vmem:[#allocation7 + $0x2c0] sm:$0xff]  ;;  %v1274_v27 = vld [vmem:[#allocation7 + $0x2c8] sm:$0xff]  ;;  %v6078_v29 = vcombine.low %v487_v17, %v488_v18 }
 0x10e   : > { %v490_v26 = vld [vmem:[#allocation7 + $0x2e0] sm:$0xff]  ;;  %v1275_v28 = vld [vmem:[#allocation7 + $0x2e8] sm:$0xff]  ;;  %v6178_v30 = vcombine.low %v1272_v19, %v1273_v20 }
 0x10f   : > { %v6081_v31 = vcombine.high %v489_v25, %v490_v26  ;;  %v6181_v32 = vcombine.high %v1274_v27, %v1275_v28  ;;  %v491_v33 = vld [vmem:[#allocation7 + $0x300] sm:$0xff]  ;;  %v1276_v35 = vld [vmem:[#allocation7 + $0x308] sm:$0xff]  ;;  %v6080_v37 = vcombine.low %v489_v25, %v490_v26  ;;  %v6180_v38 = vcombine.low %v1274_v27, %v1275_v28 }
 0x110   : > { %1082 = vmatpush1.bf16.msra.mxu0 %v6068_v51  ;;  %1863 = vmatpush1.bf16.msra.mxu1 %v6168_v52  ;;  %v492_v34 = vld [vmem:[#allocation7 + $0x320] sm:$0xff]  ;;  %v1277_v36 = vld [vmem:[#allocation7 + $0x328] sm:$0xff] }
 0x111   : > { %1083 = vmatprep.subr.bf16.mxu0 %v6071_v53  ;;  %1864 = vmatprep.subr.bf16.mxu1 %v6171_v55  ;;  %v6083_v39 = vcombine.high %v491_v33, %v492_v34  ;;  %v6183_v40 = vcombine.high %v1276_v35, %v1277_v36  ;;  %v493_v41 = vld [vmem:[#allocation7 + $0x340] sm:$0xff]  ;;  %v1278_v43 = vld [vmem:[#allocation7 + $0x348] sm:$0xff]  ;;  %v6082_v45 = vcombine.low %v491_v33, %v492_v34 }
 0x112   : > { %v494_v42 = vld [vmem:[#allocation7 + $0x360] sm:$0xff]  ;;  %v1279_v44 = vld [vmem:[#allocation7 + $0x368] sm:$0xff]  ;;  %v6182_v46 = vcombine.low %v1276_v35, %v1277_v36 }
 0x113   : > { %v6085_v47 = vcombine.high %v493_v41, %v494_v42  ;;  %v6185_v48 = vcombine.high %v1278_v43, %v1279_v44  ;;  %v495_v49 = vld [vmem:[#allocation7 + $0x380] sm:$0xff]  ;;  %v1280_v51 = vld [vmem:[#allocation7 + $0x388] sm:$0xff]  ;;  %v6084_v53 = vcombine.low %v493_v41, %v494_v42  ;;  %v6184_v54 = vcombine.low %v1278_v43, %v1279_v44 }
 0x114   : > { %1084 = vmatpush1.bf16.msra.mxu0 %v6070_v61  ;;  %1865 = vmatpush1.bf16.msra.mxu1 %v6170_v62  ;;  %v496_v50 = vld [vmem:[#allocation7 + $0x3a0] sm:$0xff]  ;;  %v1281_v52 = vld [vmem:[#allocation7 + $0x3a8] sm:$0xff] }
 0x115   : > { %1085 = vmatprep.subr.bf16.mxu0 %v6073_v63  ;;  %1866 = vmatprep.subr.bf16.mxu1 %v6173_v0  ;;  %v6087_v55 = vcombine.high %v495_v49, %v496_v50  ;;  %v6187_v56 = vcombine.high %v1280_v51, %v1281_v52  ;;  %v497_v57 = vld [vmem:[#allocation7 + $0x3c0] sm:$0xff]  ;;  %v1282_v60 = vld [vmem:[#allocation7 + $0x3c8] sm:$0xff]  ;;  %v6086_v62 = vcombine.low %v495_v49, %v496_v50 }
 0x116   : > { %v498_v59 = vld [vmem:[#allocation7 + $0x3e0] sm:$0xff]  ;;  %v1283_v61 = vld [vmem:[#allocation7 + $0x3e8] sm:$0xff]  ;;  %v6186_v63 = vcombine.low %v1280_v51, %v1281_v52 }
 0x117   : > { %v6089_v0 = vcombine.high %v497_v57, %v498_v59  ;;  %v6189_v1 = vcombine.high %v1282_v60, %v1283_v61  ;;  %v499_v2 = vld [vmem:[#allocation7 + $0x400] sm:$0xff]  ;;  %v1284_v4 = vld [vmem:[#allocation7 + $0x408] sm:$0xff] }
 0x118   : > { %1086 = vmatpush1.bf16.msra.mxu0 %v6072_v5  ;;  %1867 = vmatpush1.bf16.msra.mxu1 %v6172_v6  ;;  %v500_v3 = vld [vmem:[#allocation7 + $0x420] sm:$0xff]  ;;  %v1285_v5 = vld [vmem:[#allocation7 + $0x428] sm:$0xff]  ;;  %v6088_v6 = vcombine.low %v497_v57, %v498_v59 }
 0x119   : > { %1087 = vmatprep.subr.bf16.mxu0 %v6075_v7  ;;  %1868 = vmatprep.subr.bf16.mxu1 %v6175_v8  ;;  %v453_v7 = vld [vmem:[#allocation4] sm:$0xff]  ;;  %v6188_v8 = vcombine.low %v1282_v60, %v1283_v61  ;;  %v6091_v9 = vcombine.high %v499_v2, %v500_v3  ;;  %v6191_v10 = vcombine.high %v1284_v4, %v1285_v5  ;;  %v501_v11 = vld [vmem:[#allocation7 + $0x440] sm:$0xff] }
 0x11a   : > { %v502_v12 = vld [vmem:[#allocation7 + $0x460] sm:$0xff]  ;;  %v6090_v17 = vcombine.low %v499_v2, %v500_v3  ;;  %v6190_v18 = vcombine.low %v1284_v4, %v1285_v5  ;;  %v1289_v25 = vld [vmem:[#allocation7 + $0x4a8] sm:$0xff] }
 0x11b   : > { %v6093_v19 = vcombine.high %v501_v11, %v502_v12  ;;  %v6092_v26 = vcombine.low %v501_v11, %v502_v12  ;;  %v1291_v33 = vld [vmem:[#allocation7 + $0x4e8] sm:$0xff] }
 0x11c   : > { %1088 = vmatpush1.bf16.msra.mxu0 %v6074_v13  ;;  %1869 = vmatpush1.bf16.msra.mxu1 %v6174_v14  ;;  %v8113_v13 = vpack.c.bf16 %v453_v7, %v453_v7  ;;  %v1286_v14 = vld [vmem:[#allocation7 + $0x448] sm:$0xff]  ;;  %v515_v7 = vld [vmem:[#allocation7 + $0x600] sm:$0xff] }
 0x11d   : > { %1089 = vmatprep.subr.bf16.mxu0 %v6077_v15  ;;  %1870 = vmatprep.subr.bf16.mxu1 %v6177_v16  ;;  %v1287_v15 = vld [vmem:[#allocation7 + $0x468] sm:$0xff]  ;;  %v456_v16 = vld [vmem:[#allocation4 + $0x18] sm:$0xff] }
 0x11e   : > { %v6193_v20 = vcombine.high %v1286_v14, %v1287_v15  ;;  %v6192_v27 = vcombine.low %v1286_v14, %v1287_v15  ;;  %v1293_v41 = vld [vmem:[#allocation7 + $0x528] sm:$0xff] }
 0x11f   : > { %v1295_v49 = vld [vmem:[#allocation7 + $0x568] sm:$0xff] }
 0x120   : > { %1090 = vmatpush1.bf16.msra.mxu0 %v6076_v21  ;;  %1871 = vmatpush1.bf16.msra.mxu1 %v6176_v22  ;;  %v503_v21 = vld [vmem:[#allocation7 + $0x480] sm:$0xff]  ;;  %v1297_v57 = vld [vmem:[#allocation7 + $0x5a8] sm:$0xff] }
 0x121   : > { %1091 = vmatprep.subr.bf16.mxu0 %v6079_v23  ;;  %1872 = vmatprep.subr.bf16.mxu1 %v6179_v24  ;;  %v504_v22 = vld [vmem:[#allocation7 + $0x4a0] sm:$0xff]  ;;  %v8115_v23 = vpack.c.bf16 %v456_v16, %v456_v16  ;;  %v1288_v24 = vld [vmem:[#allocation7 + $0x488] sm:$0xff] }
 0x122   : > { %v6095_v28 = vcombine.high %v503_v21, %v504_v22  ;;  %v6094_v34 = vcombine.low %v503_v21, %v504_v22  ;;  %v6194_v35 = vcombine.low %v1288_v24, %v1289_v25  ;;  %v1299_v2 = vld [vmem:[#allocation7 + $0x5e8] sm:$0xff]  ;;  %v517_v16 = vld [vmem:[#allocation7 + $0x640] sm:$0xff] }
 0x124   : > { %1092 = vmatpush1.bf16.msra.mxu0 %v6078_v29  ;;  %1873 = vmatpush1.bf16.msra.mxu1 %v6178_v30  ;;  %v6195_v29 = vcombine.high %v1288_v24, %v1289_v25  ;;  %v505_v30 = vld [vmem:[#allocation7 + $0x4c0] sm:$0xff] }
 0x125   : > { %1093 = vmatprep.subr.bf16.mxu0 %v6081_v31  ;;  %1874 = vmatprep.subr.bf16.mxu1 %v6181_v32  ;;  %v506_v31 = vld [vmem:[#allocation7 + $0x4e0] sm:$0xff]  ;;  %v1290_v32 = vld [vmem:[#allocation7 + $0x4c8] sm:$0xff] }
 0x126   : > { %v6097_v36 = vcombine.high %v505_v30, %v506_v31  ;;  %v6096_v42 = vcombine.low %v505_v30, %v506_v31  ;;  %v6196_v43 = vcombine.low %v1290_v32, %v1291_v33  ;;  %v519_v25 = vld [vmem:[#allocation7 + $0x680] sm:$0xff] }
 0x128   : > { %1094 = vmatpush1.bf16.msra.mxu0 %v6080_v37  ;;  %1875 = vmatpush1.bf16.msra.mxu1 %v6180_v38  ;;  %v6197_v37 = vcombine.high %v1290_v32, %v1291_v33  ;;  %v507_v38 = vld [vmem:[#allocation7 + $0x500] sm:$0xff] }
 0x129   : > { %1095 = vmatprep.subr.bf16.mxu0 %v6083_v39  ;;  %1876 = vmatprep.subr.bf16.mxu1 %v6183_v40  ;;  %v508_v39 = vld [vmem:[#allocation7 + $0x520] sm:$0xff]  ;;  %v1292_v40 = vld [vmem:[#allocation7 + $0x508] sm:$0xff] }
 0x12a   : > { %v6099_v44 = vcombine.high %v507_v38, %v508_v39  ;;  %v6098_v50 = vcombine.low %v507_v38, %v508_v39  ;;  %v6198_v51 = vcombine.low %v1292_v40, %v1293_v41  ;;  %v521_v33 = vld [vmem:[#allocation7 + $0x6c0] sm:$0xff] }
 0x12c   : > { %1096 = vmatpush1.bf16.msra.mxu0 %v6082_v45  ;;  %1877 = vmatpush1.bf16.msra.mxu1 %v6182_v46  ;;  %v6199_v45 = vcombine.high %v1292_v40, %v1293_v41  ;;  %v509_v46 = vld [vmem:[#allocation7 + $0x540] sm:$0xff] }
 0x12d   : > { %1097 = vmatprep.subr.bf16.mxu0 %v6085_v47  ;;  %1878 = vmatprep.subr.bf16.mxu1 %v6185_v48  ;;  %v510_v47 = vld [vmem:[#allocation7 + $0x560] sm:$0xff]  ;;  %v1294_v48 = vld [vmem:[#allocation7 + $0x548] sm:$0xff] }
 0x12e   : > { %v6101_v52 = vcombine.high %v509_v46, %v510_v47  ;;  %v6100_v59 = vcombine.low %v509_v46, %v510_v47  ;;  %v6200_v60 = vcombine.low %v1294_v48, %v1295_v49  ;;  %v523_v41 = vld [vmem:[#allocation7 + $0x700] sm:$0xff] }
 0x130   : > { %1098 = vmatpush1.bf16.msra.mxu0 %v6084_v53  ;;  %1879 = vmatpush1.bf16.msra.mxu1 %v6184_v54  ;;  %v6201_v53 = vcombine.high %v1294_v48, %v1295_v49  ;;  %v511_v54 = vld [vmem:[#allocation7 + $0x580] sm:$0xff] }
 0x131   : > { %1099 = vmatprep.subr.bf16.mxu0 %v6087_v55  ;;  %1880 = vmatprep.subr.bf16.mxu1 %v6187_v56  ;;  %v512_v55 = vld [vmem:[#allocation7 + $0x5a0] sm:$0xff]  ;;  %v1296_v56 = vld [vmem:[#allocation7 + $0x588] sm:$0xff] }
 0x132   : > { %v6103_v61 = vcombine.high %v511_v54, %v512_v55  ;;  %v6102_v3 = vcombine.low %v511_v54, %v512_v55  ;;  %v6202_v4 = vcombine.low %v1296_v56, %v1297_v57  ;;  %v525_v49 = vld [vmem:[#allocation7 + $0x740] sm:$0xff] }
 0x134   : > { %1100 = vmatpush1.bf16.msra.mxu0 %v6086_v62  ;;  %1881 = vmatpush1.bf16.msra.mxu1 %v6186_v63  ;;  %v6203_v62 = vcombine.high %v1296_v56, %v1297_v57  ;;  %v513_v63 = vld [vmem:[#allocation7 + $0x5c0] sm:$0xff] }
 0x135   : > { %1101 = vmatprep.subr.bf16.mxu0 %v6089_v0  ;;  %1882 = vmatprep.subr.bf16.mxu1 %v6189_v1  ;;  %v514_v0 = vld [vmem:[#allocation7 + $0x5e0] sm:$0xff]  ;;  %v1298_v1 = vld [vmem:[#allocation7 + $0x5c8] sm:$0xff] }
 0x136   : > { %v6105_v5 = vcombine.high %v513_v63, %v514_v0  ;;  %v6104_v11 = vcombine.low %v513_v63, %v514_v0  ;;  %v6204_v12 = vcombine.low %v1298_v1, %v1299_v2  ;;  %v527_v57 = vld [vmem:[#allocation7 + $0x780] sm:$0xff] }
 0x138   : > { %1102 = vmatpush1.bf16.msra.mxu0 %v6088_v6  ;;  %1883 = vmatpush1.bf16.msra.mxu1 %v6188_v8  ;;  %v6205_v6 = vcombine.high %v1298_v1, %v1299_v2  ;;  %v516_v8 = vld [vmem:[#allocation7 + $0x620] sm:$0xff] }
 0x139   : > { %1112 = vmatprep.subr.bf16.mxu0 %v6091_v9  ;;  %1893 = vmatprep.subr.bf16.mxu1 %v6191_v10  ;;  %v1300_v9 = vld [vmem:[#allocation7 + $0x608] sm:$0xff]  ;;  %v6107_v14 = vcombine.high %v515_v7, %v516_v8  ;;  %v529_v2 = vld [vmem:[#allocation7 + $0x7c0] sm:$0xff] }
 0x13a   : > { %v1301_v10 = vld [vmem:[#allocation7 + $0x628] sm:$0xff] }
 0x13b   : > { %1104 = vmatmul.mubr.bf16.vlgmr.msra.gmra.mrb[0].mxu0 %v8113_v13  ;;  %1885 = vmatmul.mubr.bf16.vlgmr.msra.gmra.mrb[0].mxu1 %v8113_v13  ;;  %v6207_v15 = vcombine.high %v1300_v9, %v1301_v10  ;;  %v6206_v21 = vcombine.low %v1300_v9, %v1301_v10  ;;  %v531_v10 = vld [vmem:[#allocation7 + $0x800] sm:$0xff] }
 0x13c   : > { %1113 = vmatpush1.bf16.msra.mxu0 %v6090_v17  ;;  %1894 = vmatpush1.bf16.msra.mxu1 %v6190_v18  ;;  %v518_v17 = vld [vmem:[#allocation7 + $0x660] sm:$0xff]  ;;  %v1302_v18 = vld [vmem:[#allocation7 + $0x648] sm:$0xff] }
 0x13d   : > { %1114 = vmatprep.subr.bf16.mxu0 %v6093_v19  ;;  %1895 = vmatprep.subr.bf16.mxu1 %v6193_v20  ;;  %v1303_v19 = vld [vmem:[#allocation7 + $0x668] sm:$0xff]  ;;  %v6106_v20 = vcombine.low %v515_v7, %v516_v8  ;;  %v6109_v22 = vcombine.high %v517_v16, %v518_v17 }
 0x13e   : > { %1144 = vmatprep.mubr.bf16.mxu0 %v8115_v23  ;;  %1925 = vmatprep.mubr.bf16.mxu1 %v8115_v23  ;;  %v6209_v24 = vcombine.high %v1302_v18, %v1303_v19  ;;  %v6208_v30 = vcombine.low %v1302_v18, %v1303_v19 }
 0x140   : > { %1115 = vmatpush1.bf16.msra.mxu0 %v6092_v26  ;;  %1896 = vmatpush1.bf16.msra.mxu1 %v6192_v27  ;;  %v520_v26 = vld [vmem:[#allocation7 + $0x6a0] sm:$0xff]  ;;  %v1304_v27 = vld [vmem:[#allocation7 + $0x688] sm:$0xff] }
 0x141   : > { %1116 = vmatprep.subr.bf16.mxu0 %v6095_v28  ;;  %1897 = vmatprep.subr.bf16.mxu1 %v6195_v29  ;;  %v1305_v28 = vld [vmem:[#allocation7 + $0x6a8] sm:$0xff]  ;;  %v6108_v29 = vcombine.low %v517_v16, %v518_v17  ;;  %v6111_v31 = vcombine.high %v519_v25, %v520_v26  ;;  %v455_v16 = vld [vmem:[#allocation4 + $0x10] sm:$0xff] }
 0x142   : > { %v6211_v32 = vcombine.high %v1304_v27, %v1305_v28  ;;  %v6210_v38 = vcombine.low %v1304_v27, %v1305_v28 }
 0x144   : > { %1117 = vmatpush1.bf16.msra.mxu0 %v6094_v34  ;;  %1898 = vmatpush1.bf16.msra.mxu1 %v6194_v35  ;;  %v522_v34 = vld [vmem:[#allocation7 + $0x6e0] sm:$0xff]  ;;  %v1306_v35 = vld [vmem:[#allocation7 + $0x6c8] sm:$0xff] }
 0x145   : > { %1118 = vmatprep.subr.bf16.mxu0 %v6097_v36  ;;  %1899 = vmatprep.subr.bf16.mxu1 %v6197_v37  ;;  %v1307_v36 = vld [vmem:[#allocation7 + $0x6e8] sm:$0xff]  ;;  %v6110_v37 = vcombine.low %v519_v25, %v520_v26  ;;  %v6113_v39 = vcombine.high %v521_v33, %v522_v34  ;;  %v458_v26 = vld [vmem:[#allocation4 + $0x28] sm:$0xff] }
 0x146   : > { %v6213_v40 = vcombine.high %v1306_v35, %v1307_v36  ;;  %v6212_v46 = vcombine.low %v1306_v35, %v1307_v36  ;;  %v1319_v25 = vld [vmem:[#allocation7 + $0x868] sm:$0xff] }
 0x147   : > { %v1321_v35 = vld [vmem:[#allocation7 + $0x8a8] sm:$0xff] }
 0x148   : > { %1119 = vmatpush1.bf16.msra.mxu0 %v6096_v42  ;;  %1900 = vmatpush1.bf16.msra.mxu1 %v6196_v43  ;;  %v524_v42 = vld [vmem:[#allocation7 + $0x720] sm:$0xff]  ;;  %v1308_v43 = vld [vmem:[#allocation7 + $0x708] sm:$0xff] }
 0x149   : > { %1120 = vmatprep.subr.bf16.mxu0 %v6099_v44  ;;  %1901 = vmatprep.subr.bf16.mxu1 %v6199_v45  ;;  %v1309_v44 = vld [vmem:[#allocation7 + $0x728] sm:$0xff]  ;;  %v6112_v45 = vcombine.low %v521_v33, %v522_v34  ;;  %v6115_v47 = vcombine.high %v523_v41, %v524_v42  ;;  %v8123_v33 = vpack.c.bf16 %v458_v26, %v458_v26 }
 0x14a   : > { %v6215_v48 = vcombine.high %v1308_v43, %v1309_v44  ;;  %v6214_v54 = vcombine.low %v1308_v43, %v1309_v44  ;;  %v1320_v34 = vld [vmem:[#allocation7 + $0x888] sm:$0xff] }
 0x14b   : > { %v1323_v43 = vld [vmem:[#allocation7 + $0x8e8] sm:$0xff] }
 0x14c   : > { %1121 = vmatpush1.bf16.msra.mxu0 %v6098_v50  ;;  %1902 = vmatpush1.bf16.msra.mxu1 %v6198_v51  ;;  %v526_v50 = vld [vmem:[#allocation7 + $0x760] sm:$0xff]  ;;  %v1310_v51 = vld [vmem:[#allocation7 + $0x748] sm:$0xff] }
 0x14d   : > { %1122 = vmatprep.subr.bf16.mxu0 %v6101_v52  ;;  %1903 = vmatprep.subr.bf16.mxu1 %v6201_v53  ;;  %v1311_v52 = vld [vmem:[#allocation7 + $0x768] sm:$0xff]  ;;  %v6114_v53 = vcombine.low %v523_v41, %v524_v42  ;;  %v6117_v55 = vcombine.high %v525_v49, %v526_v50  ;;  %v538_v41 = vld [vmem:[#allocation7 + $0x8e0] sm:$0xff] }
 0x14e   : > { %v6217_v56 = vcombine.high %v1310_v51, %v1311_v52  ;;  %v6216_v63 = vcombine.low %v1310_v51, %v1311_v52  ;;  %v1322_v42 = vld [vmem:[#allocation7 + $0x8c8] sm:$0xff] }
 0x14f   : > { %v1325_v51 = vld [vmem:[#allocation7 + $0x928] sm:$0xff] }
 0x150   : > { %1123 = vmatpush1.bf16.msra.mxu0 %v6100_v59  ;;  %1904 = vmatpush1.bf16.msra.mxu1 %v6200_v60  ;;  %v528_v59 = vld [vmem:[#allocation7 + $0x7a0] sm:$0xff]  ;;  %v1312_v60 = vld [vmem:[#allocation7 + $0x788] sm:$0xff] }
 0x151   : > { %1124 = vmatprep.subr.bf16.mxu0 %v6103_v61  ;;  %1905 = vmatprep.subr.bf16.mxu1 %v6203_v62  ;;  %v1313_v61 = vld [vmem:[#allocation7 + $0x7a8] sm:$0xff]  ;;  %v6116_v62 = vcombine.low %v525_v49, %v526_v50  ;;  %v6119_v0 = vcombine.high %v527_v57, %v528_v59  ;;  %v540_v49 = vld [vmem:[#allocation7 + $0x920] sm:$0xff] }
 0x152   : > { %v6219_v1 = vcombine.high %v1312_v60, %v1313_v61  ;;  %v6218_v7 = vcombine.low %v1312_v60, %v1313_v61  ;;  %v1324_v50 = vld [vmem:[#allocation7 + $0x908] sm:$0xff] }
 0x153   : > { %v1327_v60 = vld [vmem:[#allocation7 + $0x968] sm:$0xff] }
 0x154   : > { %1125 = vmatpush1.bf16.msra.mxu0 %v6102_v3  ;;  %1906 = vmatpush1.bf16.msra.mxu1 %v6202_v4  ;;  %v530_v3 = vld [vmem:[#allocation7 + $0x7e0] sm:$0xff]  ;;  %v1314_v4 = vld [vmem:[#allocation7 + $0x7c8] sm:$0xff] }
 0x155   : > { %1126 = vmatprep.subr.bf16.mxu0 %v6105_v5  ;;  %1907 = vmatprep.subr.bf16.mxu1 %v6205_v6  ;;  %v1315_v5 = vld [vmem:[#allocation7 + $0x7e8] sm:$0xff]  ;;  %v6118_v6 = vcombine.low %v527_v57, %v528_v59  ;;  %v6121_v8 = vcombine.high %v529_v2, %v530_v3  ;;  %v542_v57 = vld [vmem:[#allocation7 + $0x960] sm:$0xff] }
 0x156   : > { %v6221_v9 = vcombine.high %v1314_v4, %v1315_v5  ;;  %v6220_v17 = vcombine.low %v1314_v4, %v1315_v5  ;;  %v1326_v59 = vld [vmem:[#allocation7 + $0x948] sm:$0xff] }
 0x157   : > { %v1329_v4 = vld [vmem:[#allocation7 + $0x9a8] sm:$0xff] }
 0x158   : > { %1127 = vmatpush1.bf16.msra.mxu0 %v6104_v11  ;;  %1908 = vmatpush1.bf16.msra.mxu1 %v6204_v12  ;;  %v532_v11 = vld [vmem:[#allocation7 + $0x820] sm:$0xff]  ;;  %v1316_v12 = vld [vmem:[#allocation7 + $0x808] sm:$0xff] }
 0x159   : > { %1128 = vmatprep.subr.bf16.mxu0 %v6107_v14  ;;  %1909 = vmatprep.subr.bf16.mxu1 %v6207_v15  ;;  %v1317_v14 = vld [vmem:[#allocation7 + $0x828] sm:$0xff]  ;;  %v6120_v15 = vcombine.low %v529_v2, %v530_v3  ;;  %v6123_v18 = vcombine.high %v531_v10, %v532_v11  ;;  %v6122_v27 = vcombine.low %v531_v10, %v532_v11  ;;  %v544_v2 = vld [vmem:[#allocation7 + $0x9a0] sm:$0xff] }
 0x15a   : > { %v6223_v19 = vcombine.high %v1316_v12, %v1317_v14  ;;  %v6222_v28 = vcombine.low %v1316_v12, %v1317_v14  ;;  %v1328_v3 = vld [vmem:[#allocation7 + $0x988] sm:$0xff]  ;;  %v546_v10 = vld [vmem:[#allocation7 + $0x9e0] sm:$0xff] }
 0x15b   : > { %v1330_v11 = vld [vmem:[#allocation7 + $0x9c8] sm:$0xff] }
 0x15c   : > { %1129 = vmatpush1.bf16.msra.mxu0 %v6106_v20  ;;  %1910 = vmatpush1.bf16.msra.mxu1 %v6206_v21  ;;  %v533_v20 = vld [vmem:[#allocation7 + $0x840] sm:$0xff]  ;;  %v1331_v12 = vld [vmem:[#allocation7 + $0x9e8] sm:$0xff] }
 0x15d   : > { %1130 = vmatprep.subr.bf16.mxu0 %v6109_v22  ;;  %1911 = vmatprep.subr.bf16.mxu1 %v6209_v24  ;;  %v534_v21 = vld [vmem:[#allocation7 + $0x860] sm:$0xff]  ;;  %v8121_v22 = vpack.c.bf16 %v455_v16, %v455_v16  ;;  %v1318_v24 = vld [vmem:[#allocation7 + $0x848] sm:$0xff] }
 0x15e   : > { %v6124_v36 = vcombine.low %v533_v20, %v534_v21 }
 0x160   : > { %1131 = vmatpush1.bf16.msra.mxu0 %v6108_v29  ;;  %1912 = vmatpush1.bf16.msra.mxu1 %v6208_v30  ;;  %v6125_v29 = vcombine.high %v533_v20, %v534_v21  ;;  %v6225_v30 = vcombine.high %v1318_v24, %v1319_v25  ;;  %v1332_v20 = vld [vmem:[#allocation7 + $0xa08] sm:$0xff] }
 0x161   : > { %1132 = vmatprep.subr.bf16.mxu0 %v6111_v31  ;;  %1913 = vmatprep.subr.bf16.mxu1 %v6211_v32  ;;  %v535_v31 = vld [vmem:[#allocation7 + $0x880] sm:$0xff]  ;;  %v1333_v21 = vld [vmem:[#allocation7 + $0xa28] sm:$0xff] }
 0x162   : > { %v536_v32 = vld [vmem:[#allocation7 + $0x8a0] sm:$0xff] }
 0x163   : > { %v6126_v44 = vcombine.low %v535_v31, %v536_v32 }
 0x164   : > { %1133 = vmatpush1.bf16.msra.mxu0 %v6110_v37  ;;  %1914 = vmatpush1.bf16.msra.mxu1 %v6210_v38  ;;  %v6224_v37 = vcombine.low %v1318_v24, %v1319_v25  ;;  %v6127_v38 = vcombine.high %v535_v31, %v536_v32  ;;  %v6236_v25 = vcombine.low %v1330_v11, %v1331_v12  ;;  %v1335_v31 = vld [vmem:[#allocation7 + $0xa68] sm:$0xff] }
 0x165   : > { %1134 = vmatprep.subr.bf16.mxu0 %v6113_v39  ;;  %1915 = vmatprep.subr.bf16.mxu1 %v6213_v40  ;;  %v6227_v39 = vcombine.high %v1320_v34, %v1321_v35  ;;  %v537_v40 = vld [vmem:[#allocation7 + $0x8c0] sm:$0xff] }
 0x166   : > { %v6128_v52 = vcombine.low %v537_v40, %v538_v41 }
 0x168   : > { %1135 = vmatpush1.bf16.msra.mxu0 %v6112_v45  ;;  %1916 = vmatpush1.bf16.msra.mxu1 %v6212_v46  ;;  %v6226_v45 = vcombine.low %v1320_v34, %v1321_v35  ;;  %v6129_v46 = vcombine.high %v537_v40, %v538_v41  ;;  %v6238_v34 = vcombine.low %v1332_v20, %v1333_v21  ;;  %v1337_v40 = vld [vmem:[#allocation7 + $0xaa8] sm:$0xff] }
 0x169   : > { %1136 = vmatprep.subr.bf16.mxu0 %v6115_v47  ;;  %1917 = vmatprep.subr.bf16.mxu1 %v6215_v48  ;;  %v6229_v47 = vcombine.high %v1322_v42, %v1323_v43  ;;  %v539_v48 = vld [vmem:[#allocation7 + $0x900] sm:$0xff] }
 0x16a   : > { %v6130_v61 = vcombine.low %v539_v48, %v540_v49 }
 0x16c   : > { %1137 = vmatpush1.bf16.msra.mxu0 %v6114_v53  ;;  %1918 = vmatpush1.bf16.msra.mxu1 %v6214_v54  ;;  %v6228_v53 = vcombine.low %v1322_v42, %v1323_v43  ;;  %v6131_v54 = vcombine.high %v539_v48, %v540_v49  ;;  %v1339_v48 = vld [vmem:[#allocation7 + $0xae8] sm:$0xff] }
 0x16d   : > { %1138 = vmatprep.subr.bf16.mxu0 %v6117_v55  ;;  %1919 = vmatprep.subr.bf16.mxu1 %v6217_v56  ;;  %v6231_v55 = vcombine.high %v1324_v50, %v1325_v51  ;;  %v541_v56 = vld [vmem:[#allocation7 + $0x940] sm:$0xff] }
 0x16e   : > { %v6132_v5 = vcombine.low %v541_v56, %v542_v57 }
 0x170   : > { %1139 = vmatpush1.bf16.msra.mxu0 %v6116_v62  ;;  %1920 = vmatpush1.bf16.msra.mxu1 %v6216_v63  ;;  %v6230_v62 = vcombine.low %v1324_v50, %v1325_v51  ;;  %v6133_v63 = vcombine.high %v541_v56, %v542_v57  ;;  %v1341_v56 = vld [vmem:[#allocation7 + $0xb28] sm:$0xff] }
 0x171   : > { %1140 = vmatprep.subr.bf16.mxu0 %v6119_v0  ;;  %1921 = vmatprep.subr.bf16.mxu1 %v6219_v1  ;;  %v6233_v0 = vcombine.high %v1326_v59, %v1327_v60  ;;  %v543_v1 = vld [vmem:[#allocation7 + $0x980] sm:$0xff] }
 0x172   : > { %v6134_v14 = vcombine.low %v543_v1, %v544_v2 }
 0x174   : > { %1141 = vmatpush1.bf16.msra.mxu0 %v6118_v6  ;;  %1922 = vmatpush1.bf16.msra.mxu1 %v6218_v7  ;;  %v6232_v6 = vcombine.low %v1326_v59, %v1327_v60  ;;  %v6135_v7 = vcombine.high %v543_v1, %v544_v2  ;;  %v1343_v1 = vld [vmem:[#allocation7 + $0xb68] sm:$0xff] }
 0x175   : > { %1142 = vmatprep.subr.bf16.mxu0 %v6121_v8  ;;  %1923 = vmatprep.subr.bf16.mxu1 %v6221_v9  ;;  %v6235_v8 = vcombine.high %v1328_v3, %v1329_v4  ;;  %v545_v9 = vld [vmem:[#allocation7 + $0x9c0] sm:$0xff] }
 0x176   : > { %v6137_v16 = vcombine.high %v545_v9, %v546_v10  ;;  %v6136_v24 = vcombine.low %v545_v9, %v546_v10  ;;  %v1345_v9 = vld [vmem:[#allocation7 + $0xba8] sm:$0xff] }
 0x178   : > { %1143 = vmatpush1.bf16.msra.mxu0 %v6120_v15  ;;  %1924 = vmatpush1.bf16.msra.mxu1 %v6220_v17  ;;  %v6234_v15 = vcombine.low %v1328_v3, %v1329_v4  ;;  %v6237_v17 = vcombine.high %v1330_v11, %v1331_v12 }
 0x179   : > { %1153 = vmatprep.subr.bf16.mxu0 %v6123_v18  ;;  %1934 = vmatprep.subr.bf16.mxu1 %v6223_v19  ;;  %v547_v18 = vld [vmem:[#allocation7 + $0xa00] sm:$0xff] }
 0x17a   : > { %v548_v19 = vld [vmem:[#allocation7 + $0xa20] sm:$0xff] }
 0x17b   : > { %1145 = vmatmul.mubr.bf16.vlgmr.msra.gmra.mrb[0].mxu0 %v8121_v22  ;;  %1926 = vmatmul.mubr.bf16.vlgmr.msra.gmra.mrb[0].mxu1 %v8121_v22  ;;  %v6139_v26 = vcombine.high %v547_v18, %v548_v19  ;;  %v6138_v32 = vcombine.low %v547_v18, %v548_v19  ;;  %v1347_v18 = vld [vmem:[#allocation7 + $0xbe8] sm:$0xff] }
 0x17c   : > { %1154 = vmatpush1.bf16.msra.mxu0 %v6122_v27  ;;  %1935 = vmatpush1.bf16.msra.mxu1 %v6222_v28  ;;  %v6239_v27 = vcombine.high %v1332_v20, %v1333_v21  ;;  %v549_v28 = vld [vmem:[#allocation7 + $0xa40] sm:$0xff] }
 0x17d   : > { %1155 = vmatprep.subr.bf16.mxu0 %v6125_v29  ;;  %1936 = vmatprep.subr.bf16.mxu1 %v6225_v30  ;;  %v550_v29 = vld [vmem:[#allocation7 + $0xa60] sm:$0xff]  ;;  %v1334_v30 = vld [vmem:[#allocation7 + $0xa48] sm:$0xff] }
 0x17e   : > { %1185 = vmatprep.mubr.bf16.mxu0 %v8123_v33  ;;  %1966 = vmatprep.mubr.bf16.mxu1 %v8123_v33  ;;  %v6141_v35 = vcombine.high %v549_v28, %v550_v29  ;;  %v6140_v41 = vcombine.low %v549_v28, %v550_v29  ;;  %v6240_v42 = vcombine.low %v1334_v30, %v1335_v31  ;;  %v1349_v28 = vld [vmem:[#allocation7 + $0xc28] sm:$0xff] }
 0x180   : > { %1156 = vmatpush1.bf16.msra.mxu0 %v6124_v36  ;;  %1937 = vmatpush1.bf16.msra.mxu1 %v6224_v37  ;;  %v6241_v36 = vcombine.high %v1334_v30, %v1335_v31  ;;  %v551_v37 = vld [vmem:[#allocation7 + $0xa80] sm:$0xff]  ;;  %v457_v30 = vld [vmem:[#allocation4 + $0x20] sm:$0xff] }
 0x181   : > { %1157 = vmatprep.subr.bf16.mxu0 %v6127_v38  ;;  %1938 = vmatprep.subr.bf16.mxu1 %v6227_v39  ;;  %v552_v38 = vld [vmem:[#allocation7 + $0xaa0] sm:$0xff]  ;;  %v1336_v39 = vld [vmem:[#allocation7 + $0xa88] sm:$0xff] }
 0x182   : > { %v6143_v43 = vcombine.high %v551_v37, %v552_v38  ;;  %v6142_v49 = vcombine.low %v551_v37, %v552_v38  ;;  %v6242_v50 = vcombine.low %v1336_v39, %v1337_v40  ;;  %v2034_v37 = vld [vmem:[#allocation7 + $0x30] sm:$0xff] }
 0x184   : > { %1158 = vmatpush1.bf16.msra.mxu0 %v6126_v44  ;;  %1939 = vmatpush1.bf16.msra.mxu1 %v6226_v45  ;;  %v6243_v44 = vcombine.high %v1336_v39, %v1337_v40  ;;  %v553_v45 = vld [vmem:[#allocation7 + $0xac0] sm:$0xff]  ;;  %v2814_v39 = vld [vmem:[#allocation7 + $0x18] sm:$0xff] }
 0x185   : > { %1159 = vmatprep.subr.bf16.mxu0 %v6129_v46  ;;  %1940 = vmatprep.subr.bf16.mxu1 %v6229_v47  ;;  %v554_v46 = vld [vmem:[#allocation7 + $0xae0] sm:$0xff]  ;;  %v1338_v47 = vld [vmem:[#allocation7 + $0xac8] sm:$0xff]  ;;  %v2815_v40 = vld [vmem:[#allocation7 + $0x38] sm:$0xff] }
 0x186   : > { %v6145_v51 = vcombine.high %v553_v45, %v554_v46  ;;  %v6144_v57 = vcombine.low %v553_v45, %v554_v46  ;;  %v6244_v59 = vcombine.low %v1338_v47, %v1339_v48  ;;  %v459_v45 = vld [vmem:[#allocation4 + $0x30] sm:$0xff]  ;;  %v2035_v46 = vld [vmem:[#allocation7 + $0x50] sm:$0xff] }
 0x188   : > { %1160 = vmatpush1.bf16.msra.mxu0 %v6128_v52  ;;  %1941 = vmatpush1.bf16.msra.mxu1 %v6228_v53  ;;  %v6245_v52 = vcombine.high %v1338_v47, %v1339_v48  ;;  %v555_v53 = vld [vmem:[#allocation7 + $0xb00] sm:$0xff]  ;;  %v2036_v47 = vld [vmem:[#allocation7 + $0x70] sm:$0xff]  ;;  %v8135_v48 = vpack.c.bf16 %v459_v45, %v459_v45 }
 0x189   : > { %1161 = vmatprep.subr.bf16.mxu0 %v6131_v54  ;;  %1942 = vmatprep.subr.bf16.mxu1 %v6231_v55  ;;  %v556_v54 = vld [vmem:[#allocation7 + $0xb20] sm:$0xff]  ;;  %v1340_v55 = vld [vmem:[#allocation7 + $0xb08] sm:$0xff]  ;;  %v2049_v45 = vld [vmem:[#allocation7 + $0x210] sm:$0xff] }
 0x18a   : > { %v6147_v60 = vcombine.high %v555_v53, %v556_v54  ;;  %v6146_v2 = vcombine.low %v555_v53, %v556_v54  ;;  %v6246_v3 = vcombine.low %v1340_v55, %v1341_v56  ;;  %v6261_v53 = vcombine.high %v2035_v46, %v2036_v47 }
 0x18c   : > { %1162 = vmatpush1.bf16.msra.mxu0 %v6130_v61  ;;  %1943 = vmatpush1.bf16.msra.mxu1 %v6230_v62  ;;  %v6247_v61 = vcombine.high %v1340_v55, %v1341_v56  ;;  %v557_v62 = vld [vmem:[#allocation7 + $0xb40] sm:$0xff]  ;;  %v2037_v55 = vld [vmem:[#allocation7 + $0x90] sm:$0xff] }
 0x18d   : > { %1163 = vmatprep.subr.bf16.mxu0 %v6133_v63  ;;  %1944 = vmatprep.subr.bf16.mxu1 %v6233_v0  ;;  %v558_v63 = vld [vmem:[#allocation7 + $0xb60] sm:$0xff]  ;;  %v1342_v0 = vld [vmem:[#allocation7 + $0xb48] sm:$0xff]  ;;  %v2038_v56 = vld [vmem:[#allocation7 + $0xb0] sm:$0xff] }
 0x18e   : > { %v6149_v4 = vcombine.high %v557_v62, %v558_v63  ;;  %v6148_v10 = vcombine.low %v557_v62, %v558_v63  ;;  %v6248_v11 = vcombine.low %v1342_v0, %v1343_v1  ;;  %v6263_v62 = vcombine.high %v2037_v55, %v2038_v56 }
 0x190   : > { %1164 = vmatpush1.bf16.msra.mxu0 %v6132_v5  ;;  %1945 = vmatpush1.bf16.msra.mxu1 %v6232_v6  ;;  %v6249_v5 = vcombine.high %v1342_v0, %v1343_v1  ;;  %v559_v6 = vld [vmem:[#allocation7 + $0xb80] sm:$0xff]  ;;  %v2039_v0 = vld [vmem:[#allocation7 + $0xd0] sm:$0xff] }
 0x191   : > { %1165 = vmatprep.subr.bf16.mxu0 %v6135_v7  ;;  %1946 = vmatprep.subr.bf16.mxu1 %v6235_v8  ;;  %v560_v7 = vld [vmem:[#allocation7 + $0xba0] sm:$0xff]  ;;  %v1344_v8 = vld [vmem:[#allocation7 + $0xb88] sm:$0xff]  ;;  %v2040_v1 = vld [vmem:[#allocation7 + $0xf0] sm:$0xff] }
 0x192   : > { %v6151_v12 = vcombine.high %v559_v6, %v560_v7  ;;  %v6150_v19 = vcombine.low %v559_v6, %v560_v7  ;;  %v6250_v20 = vcombine.low %v1344_v8, %v1345_v9  ;;  %v6265_v6 = vcombine.high %v2039_v0, %v2040_v1 }
 0x194   : > { %1166 = vmatpush1.bf16.msra.mxu0 %v6134_v14  ;;  %1947 = vmatpush1.bf16.msra.mxu1 %v6234_v15  ;;  %v6251_v14 = vcombine.high %v1344_v8, %v1345_v9  ;;  %v561_v15 = vld [vmem:[#allocation7 + $0xbc0] sm:$0xff]  ;;  %v2041_v8 = vld [vmem:[#allocation7 + $0x110] sm:$0xff] }
 0x195   : > { %1167 = vmatprep.subr.bf16.mxu0 %v6137_v16  ;;  %1948 = vmatprep.subr.bf16.mxu1 %v6237_v17  ;;  %v562_v16 = vld [vmem:[#allocation7 + $0xbe0] sm:$0xff]  ;;  %v1346_v17 = vld [vmem:[#allocation7 + $0xbc8] sm:$0xff]  ;;  %v2042_v9 = vld [vmem:[#allocation7 + $0x130] sm:$0xff] }
 0x196   : > { %v6153_v21 = vcombine.high %v561_v15, %v562_v16  ;;  %v6152_v29 = vcombine.low %v561_v15, %v562_v16  ;;  %v6252_v31 = vcombine.low %v1346_v17, %v1347_v18  ;;  %v6267_v15 = vcombine.high %v2041_v8, %v2042_v9  ;;  %v2043_v16 = vld [vmem:[#allocation7 + $0x150] sm:$0xff] }
 0x198   : > { %1168 = vmatpush1.bf16.msra.mxu0 %v6136_v24  ;;  %1949 = vmatpush1.bf16.msra.mxu1 %v6236_v25  ;;  %v6253_v24 = vcombine.high %v1346_v17, %v1347_v18  ;;  %v563_v25 = vld [vmem:[#allocation7 + $0xc00] sm:$0xff]  ;;  %v2044_v17 = vld [vmem:[#allocation7 + $0x170] sm:$0xff]  ;;  %v2824_v18 = vld [vmem:[#allocation7 + $0x158] sm:$0xff] }
 0x199   : > { %1169 = vmatprep.subr.bf16.mxu0 %v6139_v26  ;;  %1950 = vmatprep.subr.bf16.mxu1 %v6239_v27  ;;  %v564_v26 = vld [vmem:[#allocation7 + $0xc20] sm:$0xff]  ;;  %v1348_v27 = vld [vmem:[#allocation7 + $0xc08] sm:$0xff] }
 0x19a   : > { %v6154_v38 = vcombine.low %v563_v25, %v564_v26 }
 0x19c   : > { %1170 = vmatpush1.bf16.msra.mxu0 %v6138_v32  ;;  %1951 = vmatpush1.bf16.msra.mxu1 %v6238_v34  ;;  %v6155_v32 = vcombine.high %v563_v25, %v564_v26  ;;  %v6255_v34 = vcombine.high %v1348_v27, %v1349_v28  ;;  %v2045_v26 = vld [vmem:[#allocation7 + $0x190] sm:$0xff] }
 0x19d   : > { %1171 = vmatprep.subr.bf16.mxu0 %v6141_v35  ;;  %1952 = vmatprep.subr.bf16.mxu1 %v6241_v36  ;;  %v8129_v35 = vpack.c.bf16 %v457_v30, %v457_v30  ;;  %v2033_v36 = vld [vmem:[#allocation7 + $0x10] sm:$0xff]  ;;  %v6268_v30 = vcombine.low %v2043_v16, %v2044_v17 }
 0x1a0   : > { %1172 = vmatpush1.bf16.msra.mxu0 %v6140_v41  ;;  %1953 = vmatpush1.bf16.msra.mxu1 %v6240_v42  ;;  %v6254_v41 = vcombine.low %v1348_v27, %v1349_v28  ;;  %v6259_v42 = vcombine.high %v2033_v36, %v2034_v37  ;;  %v2046_v27 = vld [vmem:[#allocation7 + $0x1b0] sm:$0xff]  ;;  %v2826_v28 = vld [vmem:[#allocation7 + $0x198] sm:$0xff] }
 0x1a1   : > { %1173 = vmatprep.subr.bf16.mxu0 %v6143_v43  ;;  %1954 = vmatprep.subr.bf16.mxu1 %v6243_v44  ;;  %v6359_v43 = vcombine.high %v2814_v39, %v2815_v40  ;;  %v7773_v44 = vmov 0  }
 0x1a4   : > { %1174 = vmatpush1.bf16.msra.mxu0 %v6142_v49  ;;  %1955 = vmatpush1.bf16.msra.mxu1 %v6242_v50  ;;  %v2816_v49 = vld [vmem:[#allocation7 + $0x58] sm:$0xff] }
 0x1a5   : > { %1175 = vmatprep.subr.bf16.mxu0 %v6145_v51  ;;  %1956 = vmatprep.subr.bf16.mxu1 %v6245_v52  ;;  %v2817_v50 = vld [vmem:[#allocation7 + $0x78] sm:$0xff]  ;;  %v6258_v51 = vcombine.low %v2033_v36, %v2034_v37  ;;  %v6358_v52 = vcombine.low %v2814_v39, %v2815_v40  ;;  %v2047_v36 = vld [vmem:[#allocation7 + $0x1d0] sm:$0xff]  ;;  %v6270_v40 = vcombine.low %v2045_v26, %v2046_v27 }
 0x1a6   : > { %v6361_v54 = vcombine.high %v2816_v49, %v2817_v50  ;;  %v2048_v37 = vld [vmem:[#allocation7 + $0x1f0] sm:$0xff]  ;;  %v2829_v39 = vld [vmem:[#allocation7 + $0x1f8] sm:$0xff] }
 0x1a8   : > { %1176 = vmatpush1.bf16.msra.mxu0 %v6144_v57  ;;  %1957 = vmatpush1.bf16.msra.mxu1 %v6244_v59  ;;  %v2818_v57 = vld [vmem:[#allocation7 + $0x98] sm:$0xff] }
 0x1a9   : > { %1177 = vmatprep.subr.bf16.mxu0 %v6147_v60  ;;  %1958 = vmatprep.subr.bf16.mxu1 %v6247_v61  ;;  %v2819_v59 = vld [vmem:[#allocation7 + $0xb8] sm:$0xff]  ;;  %v6260_v60 = vcombine.low %v2035_v46, %v2036_v47  ;;  %v6360_v61 = vcombine.low %v2816_v49, %v2817_v50  ;;  %v2050_v46 = vld [vmem:[#allocation7 + $0x230] sm:$0xff]  ;;  %v6272_v50 = vcombine.low %v2047_v36, %v2048_v37 }
 0x1aa   : > { %v6363_v63 = vcombine.high %v2818_v57, %v2819_v59  ;;  %v2830_v47 = vld [vmem:[#allocation7 + $0x218] sm:$0xff] }
 0x1ab   : > { %v2831_v49 = vld [vmem:[#allocation7 + $0x238] sm:$0xff] }
 0x1ac   : > { %1178 = vmatpush1.bf16.msra.mxu0 %v6146_v2  ;;  %1959 = vmatpush1.bf16.msra.mxu1 %v6246_v3  ;;  %v2820_v2 = vld [vmem:[#allocation7 + $0xd8] sm:$0xff] }
 0x1ad   : > { %1179 = vmatprep.subr.bf16.mxu0 %v6149_v4  ;;  %1960 = vmatprep.subr.bf16.mxu1 %v6249_v5  ;;  %v2821_v3 = vld [vmem:[#allocation7 + $0xf8] sm:$0xff]  ;;  %v6262_v4 = vcombine.low %v2037_v55, %v2038_v56  ;;  %v6362_v5 = vcombine.low %v2818_v57, %v2819_v59  ;;  %v2052_v55 = vld [vmem:[#allocation7 + $0x270] sm:$0xff]  ;;  %v6274_v59 = vcombine.low %v2049_v45, %v2050_v46 }
 0x1ae   : > { %v6365_v7 = vcombine.high %v2820_v2, %v2821_v3  ;;  %v2832_v56 = vld [vmem:[#allocation7 + $0x258] sm:$0xff] }
 0x1af   : > { %v2833_v57 = vld [vmem:[#allocation7 + $0x278] sm:$0xff] }
 0x1b0   : > { %1180 = vmatpush1.bf16.msra.mxu0 %v6148_v10  ;;  %1961 = vmatpush1.bf16.msra.mxu1 %v6248_v11  ;;  %v2822_v10 = vld [vmem:[#allocation7 + $0x118] sm:$0xff] }
 0x1b1   : > { %1181 = vmatprep.subr.bf16.mxu0 %v6151_v12  ;;  %1962 = vmatprep.subr.bf16.mxu1 %v6251_v14  ;;  %v2823_v11 = vld [vmem:[#allocation7 + $0x138] sm:$0xff]  ;;  %v6264_v12 = vcombine.low %v2039_v0, %v2040_v1  ;;  %v6364_v14 = vcombine.low %v2820_v2, %v2821_v3  ;;  %v2054_v0 = vld [vmem:[#allocation7 + $0x2b0] sm:$0xff] }
 0x1b2   : > { %v2834_v1 = vld [vmem:[#allocation7 + $0x298] sm:$0xff] }
 0x1b3   : > { %v2835_v2 = vld [vmem:[#allocation7 + $0x2b8] sm:$0xff] }
 0x1b4   : > { %1182 = vmatpush1.bf16.msra.mxu0 %v6150_v19  ;;  %1963 = vmatpush1.bf16.msra.mxu1 %v6250_v20  ;;  %v2825_v19 = vld [vmem:[#allocation7 + $0x178] sm:$0xff]  ;;  %v6266_v20 = vcombine.low %v2041_v8, %v2042_v9  ;;  %v2056_v8 = vld [vmem:[#allocation7 + $0x2f0] sm:$0xff] }
 0x1b5   : > { %1183 = vmatprep.subr.bf16.mxu0 %v6153_v21  ;;  %1964 = vmatprep.subr.bf16.mxu1 %v6253_v24  ;;  %v6366_v21 = vcombine.low %v2822_v10, %v2823_v11  ;;  %v6269_v24 = vcombine.high %v2043_v16, %v2044_v17  ;;  %v6369_v25 = vcombine.high %v2824_v18, %v2825_v19  ;;  %v2836_v9 = vld [vmem:[#allocation7 + $0x2d8] sm:$0xff]  ;;  %v2058_v16 = vld [vmem:[#allocation7 + $0x330] sm:$0xff] }
 0x1b6   : > { %v2838_v17 = vld [vmem:[#allocation7 + $0x318] sm:$0xff] }
 0x1b8   : > { %1184 = vmatpush1.bf16.msra.mxu0 %v6152_v29  ;;  %1965 = vmatpush1.bf16.msra.mxu1 %v6252_v31  ;;  %v2827_v29 = vld [vmem:[#allocation7 + $0x1b8] sm:$0xff]  ;;  %v6368_v31 = vcombine.low %v2824_v18, %v2825_v19 }
 0x1b9   : > { %1194 = vmatprep.subr.bf16.mxu0 %v6155_v32  ;;  %1975 = vmatprep.subr.bf16.mxu1 %v6255_v34  ;;  %v6271_v32 = vcombine.high %v2045_v26, %v2046_v27  ;;  %v6371_v34 = vcombine.high %v2826_v28, %v2827_v29  ;;  %v2839_v18 = vld [vmem:[#allocation7 + $0x338] sm:$0xff]  ;;  %v2060_v26 = vld [vmem:[#allocation7 + $0x370] sm:$0xff] }
 0x1ba   : > { %v2840_v27 = vld [vmem:[#allocation7 + $0x358] sm:$0xff] }
 0x1bb   : > { %1186 = vmatmul.mubr.bf16.vlgmr.msra.gmra.mrb[0].mxu0 %v8129_v35  ;;  %1967 = vmatmul.mubr.bf16.vlgmr.msra.gmra.mrb[0].mxu1 %v8129_v35 }
 0x1bc   : > { %1195 = vmatpush1.bf16.msra.mxu0 %v6154_v38  ;;  %1976 = vmatpush1.bf16.msra.mxu1 %v6254_v41  ;;  %v2828_v38 = vld [vmem:[#allocation7 + $0x1d8] sm:$0xff]  ;;  %v6370_v41 = vcombine.low %v2826_v28, %v2827_v29 }
 0x1bd   : > { %1226 = vmatprep.mubr.bf16.mxu0 %v7773_v44  ;;  %2007 = vmatprep.mubr.bf16.mxu1 %v7773_v44  ;;  %v2841_v28 = vld [vmem:[#allocation7 + $0x378] sm:$0xff] }
 0x1be   : > { %2633 = vmatprep.subr.bf16.mxu0 %v6259_v42  ;;  %3414 = vmatprep.subr.bf16.mxu1 %v6359_v43  ;;  %v6273_v42 = vcombine.high %v2047_v36, %v2048_v37  ;;  %v6373_v43 = vcombine.high %v2828_v38, %v2829_v39  ;;  %v2062_v36 = vld [vmem:[#allocation7 + $0x3b0] sm:$0xff]  ;;  %v2842_v37 = vld [vmem:[#allocation7 + $0x398] sm:$0xff] }
 0x1c7   : > { %6156 = vmatmul.mubr.msk.bf16.vlgmr.msra.gmra.mrb[0].mxu0 %vm1067_vm0, %v8135_v48  ;;  %6256 = vmatmul.mubr.msk.bf16.vlgmr.msra.gmra.mrb[0].mxu1 %vm1067_vm0, %v8135_v48 }
 0x1c8   : > { %2634 = vmatpush1.bf16.msra.mxu0 %v6258_v51  ;;  %3415 = vmatpush1.bf16.msra.mxu1 %v6358_v52  ;;  %v6372_v51 = vcombine.low %v2828_v38, %v2829_v39  ;;  %v6275_v52 = vcombine.high %v2049_v45, %v2050_v46  ;;  %v2843_v38 = vld [vmem:[#allocation7 + $0x3b8] sm:$0xff]  ;;  %v2064_v45 = vld [vmem:[#allocation7 + $0x3f0] sm:$0xff] }
 0x1c9   : > { %2635 = vmatprep.subr.bf16.mxu0 %v6261_v53  ;;  %3416 = vmatprep.subr.bf16.mxu1 %v6361_v54  ;;  %v6375_v53 = vcombine.high %v2830_v47, %v2831_v49  ;;  %v2051_v54 = vld [vmem:[#allocation7 + $0x250] sm:$0xff]  ;;  %v2844_v46 = vld [vmem:[#allocation7 + $0x3d8] sm:$0xff] }
 0x1ca   : > { %2665 = vmatprep.mubr.bf16.mxu0 %v8109_v58  ;;  %3446 = vmatprep.mubr.bf16.mxu1 %v8109_v58  ;;  %v6367_v58 = vcombine.high %v2822_v10, %v2823_v11  ;;  %v6276_v3 = vcombine.low %v2051_v54, %v2052_v55  ;;  %v2837_v10 = vld [vmem:[#allocation7 + $0x2f8] sm:$0xff] }
 0x1cc   : > { %2636 = vmatpush1.bf16.msra.mxu0 %v6260_v60  ;;  %3417 = vmatpush1.bf16.msra.mxu1 %v6360_v61  ;;  %v6374_v60 = vcombine.low %v2830_v47, %v2831_v49  ;;  %v6277_v61 = vcombine.high %v2051_v54, %v2052_v55  ;;  %v2845_v47 = vld [vmem:[#allocation7 + $0x3f8] sm:$0xff]  ;;  %v2066_v54 = vld [vmem:[#allocation7 + $0x430] sm:$0xff] }
 0x1cd   : > { %2637 = vmatprep.subr.bf16.mxu0 %v6263_v62  ;;  %3418 = vmatprep.subr.bf16.mxu1 %v6363_v63  ;;  %v6377_v62 = vcombine.high %v2832_v56, %v2833_v57  ;;  %v2053_v63 = vld [vmem:[#allocation7 + $0x290] sm:$0xff]  ;;  %v2846_v55 = vld [vmem:[#allocation7 + $0x418] sm:$0xff] }
 0x1ce   : > { %v6278_v11 = vcombine.low %v2053_v63, %v2054_v0 }
 0x1d0   : > { %2638 = vmatpush1.bf16.msra.mxu0 %v6262_v4  ;;  %3419 = vmatpush1.bf16.msra.mxu1 %v6362_v5  ;;  %v6376_v4 = vcombine.low %v2832_v56, %v2833_v57  ;;  %v6279_v5 = vcombine.high %v2053_v63, %v2054_v0  ;;  %v2847_v56 = vld [vmem:[#allocation7 + $0x438] sm:$0xff]  ;;  %v2068_v63 = vld [vmem:[#allocation7 + $0x470] sm:$0xff] }
 0x1d1   : > { %2639 = vmatprep.subr.bf16.mxu0 %v6265_v6  ;;  %3420 = vmatprep.subr.bf16.mxu1 %v6365_v7  ;;  %v6379_v6 = vcombine.high %v2834_v1, %v2835_v2  ;;  %v2055_v7 = vld [vmem:[#allocation7 + $0x2d0] sm:$0xff]  ;;  %v2848_v0 = vld [vmem:[#allocation7 + $0x458] sm:$0xff] }
 0x1d2   : > { %v6280_v19 = vcombine.low %v2055_v7, %v2056_v8 }
 0x1d4   : > { %2640 = vmatpush1.bf16.msra.mxu0 %v6264_v12  ;;  %3421 = vmatpush1.bf16.msra.mxu1 %v6364_v14  ;;  %v6378_v12 = vcombine.low %v2834_v1, %v2835_v2  ;;  %v6281_v14 = vcombine.high %v2055_v7, %v2056_v8  ;;  %v2849_v1 = vld [vmem:[#allocation7 + $0x478] sm:$0xff]  ;;  %v2070_v7 = vld [vmem:[#allocation7 + $0x4b0] sm:$0xff] }
 0x1d5   : > { %2641 = vmatprep.subr.bf16.mxu0 %v6267_v15  ;;  %3422 = vmatprep.subr.bf16.mxu1 %v6367_v58  ;;  %v6381_v15 = vcombine.high %v2836_v9, %v2837_v10  ;;  %v2057_v58 = vld [vmem:[#allocation7 + $0x310] sm:$0xff]  ;;  %v2850_v8 = vld [vmem:[#allocation7 + $0x498] sm:$0xff] }
 0x1d6   : > { %v6282_v29 = vcombine.low %v2057_v58, %v2058_v16 }
 0x1d8   : > { %2642 = vmatpush1.bf16.msra.mxu0 %v6266_v20  ;;  %3423 = vmatpush1.bf16.msra.mxu1 %v6366_v21  ;;  %v6380_v20 = vcombine.low %v2836_v9, %v2837_v10  ;;  %v6283_v21 = vcombine.high %v2057_v58, %v2058_v16  ;;  %v2851_v9 = vld [vmem:[#allocation7 + $0x4b8] sm:$0xff]  ;;  %v2072_v58 = vld [vmem:[#allocation7 + $0x4f0] sm:$0xff] }
 0x1d9   : > { %2643 = vmatprep.subr.bf16.mxu0 %v6269_v24  ;;  %3424 = vmatprep.subr.bf16.mxu1 %v6369_v25  ;;  %v6383_v24 = vcombine.high %v2838_v17, %v2839_v18  ;;  %v2059_v25 = vld [vmem:[#allocation7 + $0x350] sm:$0xff]  ;;  %v2852_v16 = vld [vmem:[#allocation7 + $0x4d8] sm:$0xff] }
 0x1da   : > { %v6284_v39 = vcombine.low %v2059_v25, %v2060_v26 }
 0x1dc   : > { %2644 = vmatpush1.bf16.msra.mxu0 %v6268_v30  ;;  %3425 = vmatpush1.bf16.msra.mxu1 %v6368_v31  ;;  %v6382_v30 = vcombine.low %v2838_v17, %v2839_v18  ;;  %v6285_v31 = vcombine.high %v2059_v25, %v2060_v26  ;;  %v2853_v17 = vld [vmem:[#allocation7 + $0x4f8] sm:$0xff] }
 0x1dd   : > { %2645 = vmatprep.subr.bf16.mxu0 %v6271_v32  ;;  %3426 = vmatprep.subr.bf16.mxu1 %v6371_v34  ;;  %v6385_v32 = vcombine.high %v2840_v27, %v2841_v28  ;;  %v2061_v34 = vld [vmem:[#allocation7 + $0x390] sm:$0xff]  ;;  %v2854_v25 = vld [vmem:[#allocation7 + $0x518] sm:$0xff] }
 0x1de   : > { %v6286_v49 = vcombine.low %v2061_v34, %v2062_v36  ;;  %v2855_v26 = vld [vmem:[#allocation7 + $0x538] sm:$0xff] }
 0x1e0   : > { %2646 = vmatpush1.bf16.msra.mxu0 %v6270_v40  ;;  %3427 = vmatpush1.bf16.msra.mxu1 %v6370_v41  ;;  %v6384_v40 = vcombine.low %v2840_v27, %v2841_v28  ;;  %v6287_v41 = vcombine.high %v2061_v34, %v2062_v36  ;;  %v6396_v28 = vcombine.low %v2852_v16, %v2853_v17  ;;  %v2857_v34 = vld [vmem:[#allocation7 + $0x578] sm:$0xff] }
 0x1e1   : > { %2647 = vmatprep.subr.bf16.mxu0 %v6273_v42  ;;  %3428 = vmatprep.subr.bf16.mxu1 %v6373_v43  ;;  %v6387_v42 = vcombine.high %v2842_v37, %v2843_v38  ;;  %v2063_v43 = vld [vmem:[#allocation7 + $0x3d0] sm:$0xff] }
 0x1e2   : > { %v6288_v57 = vcombine.low %v2063_v43, %v2064_v45 }
 0x1e4   : > { %2648 = vmatpush1.bf16.msra.mxu0 %v6272_v50  ;;  %3429 = vmatpush1.bf16.msra.mxu1 %v6372_v51  ;;  %v6386_v50 = vcombine.low %v2842_v37, %v2843_v38  ;;  %v6289_v51 = vcombine.high %v2063_v43, %v2064_v45  ;;  %v6398_v37 = vcombine.low %v2854_v25, %v2855_v26  ;;  %v2859_v43 = vld [vmem:[#allocation7 + $0x5b8] sm:$0xff] }
 0x1e5   : > { %2649 = vmatprep.subr.bf16.mxu0 %v6275_v52  ;;  %3430 = vmatprep.subr.bf16.mxu1 %v6375_v53  ;;  %v6389_v52 = vcombine.high %v2844_v46, %v2845_v47  ;;  %v2065_v53 = vld [vmem:[#allocation7 + $0x410] sm:$0xff] }
 0x1e6   : > { %v6290_v2 = vcombine.low %v2065_v53, %v2066_v54 }
 0x1e8   : > { %2650 = vmatpush1.bf16.msra.mxu0 %v6274_v59  ;;  %3431 = vmatpush1.bf16.msra.mxu1 %v6374_v60  ;;  %v6388_v59 = vcombine.low %v2844_v46, %v2845_v47  ;;  %v6291_v60 = vcombine.high %v2065_v53, %v2066_v54  ;;  %v2861_v53 = vld [vmem:[#allocation7 + $0x5f8] sm:$0xff] }
 0x1e9   : > { %2651 = vmatprep.subr.bf16.mxu0 %v6277_v61  ;;  %3432 = vmatprep.subr.bf16.mxu1 %v6377_v62  ;;  %v6391_v61 = vcombine.high %v2846_v55, %v2847_v56  ;;  %v2067_v62 = vld [vmem:[#allocation7 + $0x450] sm:$0xff] }
 0x1ea   : > { %v6292_v10 = vcombine.low %v2067_v62, %v2068_v63 }
 0x1ec   : > { %2652 = vmatpush1.bf16.msra.mxu0 %v6276_v3  ;;  %3433 = vmatpush1.bf16.msra.mxu1 %v6376_v4  ;;  %v6390_v3 = vcombine.low %v2846_v55, %v2847_v56  ;;  %v6293_v4 = vcombine.high %v2067_v62, %v2068_v63  ;;  %v2863_v62 = vld [vmem:[#allocation7 + $0x638] sm:$0xff] }
 0x1ed   : > { %2653 = vmatprep.subr.bf16.mxu0 %v6279_v5  ;;  %3434 = vmatprep.subr.bf16.mxu1 %v6379_v6  ;;  %v6393_v5 = vcombine.high %v2848_v0, %v2849_v1  ;;  %v2069_v6 = vld [vmem:[#allocation7 + $0x490] sm:$0xff] }
 0x1ee   : > { %v6294_v18 = vcombine.low %v2069_v6, %v2070_v7 }
 0x1f0   : > { %2654 = vmatpush1.bf16.msra.mxu0 %v6278_v11  ;;  %3435 = vmatpush1.bf16.msra.mxu1 %v6378_v12  ;;  %v6392_v11 = vcombine.low %v2848_v0, %v2849_v1  ;;  %v6295_v12 = vcombine.high %v2069_v6, %v2070_v7  ;;  %v2865_v6 = vld [vmem:[#allocation7 + $0x678] sm:$0xff] }
 0x1f1   : > { %2655 = vmatprep.subr.bf16.mxu0 %v6281_v14  ;;  %3436 = vmatprep.subr.bf16.mxu1 %v6381_v15  ;;  %v6395_v14 = vcombine.high %v2850_v8, %v2851_v9  ;;  %v2071_v15 = vld [vmem:[#allocation7 + $0x4d0] sm:$0xff] }
 0x1f2   : > { %v6296_v27 = vcombine.low %v2071_v15, %v2072_v58 }
 0x1f4   : > { %2656 = vmatpush1.bf16.msra.mxu0 %v6280_v19  ;;  %3437 = vmatpush1.bf16.msra.mxu1 %v6380_v20  ;;  %v6297_v19 = vcombine.high %v2071_v15, %v2072_v58  ;;  %v6397_v20 = vcombine.high %v2852_v16, %v2853_v17  ;;  %v2867_v15 = vld [vmem:[#allocation7 + $0x6b8] sm:$0xff] }
 0x1f5   : > { %2657 = vmatprep.subr.bf16.mxu0 %v6283_v21  ;;  %3438 = vmatprep.subr.bf16.mxu1 %v6383_v24  ;;  %v2073_v21 = vld [vmem:[#allocation7 + $0x510] sm:$0xff] }
 0x1f6   : > { %v2074_v24 = vld [vmem:[#allocation7 + $0x530] sm:$0xff] }
 0x1f7   : > { %v6298_v36 = vcombine.low %v2073_v21, %v2074_v24 }
 0x1f8   : > { %2658 = vmatpush1.bf16.msra.mxu0 %v6282_v29  ;;  %3439 = vmatpush1.bf16.msra.mxu1 %v6382_v30  ;;  %v6299_v29 = vcombine.high %v2073_v21, %v2074_v24  ;;  %v2075_v30 = vld [vmem:[#allocation7 + $0x550] sm:$0xff]  ;;  %v2869_v21 = vld [vmem:[#allocation7 + $0x6f8] sm:$0xff] }
 0x1f9   : > { %2659 = vmatprep.subr.bf16.mxu0 %v6285_v31  ;;  %3440 = vmatprep.subr.bf16.mxu1 %v6385_v32  ;;  %v2076_v31 = vld [vmem:[#allocation7 + $0x570] sm:$0xff]  ;;  %v2856_v32 = vld [vmem:[#allocation7 + $0x558] sm:$0xff] }
 0x1fa   : > { %v6301_v38 = vcombine.high %v2075_v30, %v2076_v31  ;;  %v6300_v45 = vcombine.low %v2075_v30, %v2076_v31  ;;  %v6400_v46 = vcombine.low %v2856_v32, %v2857_v34  ;;  %v2871_v30 = vld [vmem:[#allocation7 + $0x738] sm:$0xff] }
 0x1fc   : > { %2660 = vmatpush1.bf16.msra.mxu0 %v6284_v39  ;;  %3441 = vmatpush1.bf16.msra.mxu1 %v6384_v40  ;;  %v6401_v39 = vcombine.high %v2856_v32, %v2857_v34  ;;  %v2077_v40 = vld [vmem:[#allocation7 + $0x590] sm:$0xff] }
 0x1fd   : > { %2661 = vmatprep.subr.bf16.mxu0 %v6287_v41  ;;  %3442 = vmatprep.subr.bf16.mxu1 %v6387_v42  ;;  %v2078_v41 = vld [vmem:[#allocation7 + $0x5b0] sm:$0xff]  ;;  %v2858_v42 = vld [vmem:[#allocation7 + $0x598] sm:$0xff] }
 0x1fe   : > { %v6303_v47 = vcombine.high %v2077_v40, %v2078_v41  ;;  %v6302_v54 = vcombine.low %v2077_v40, %v2078_v41  ;;  %v6402_v55 = vcombine.low %v2858_v42, %v2859_v43  ;;  %v2873_v40 = vld [vmem:[#allocation7 + $0x778] sm:$0xff] }
 0x200   : > { %2662 = vmatpush1.bf16.msra.mxu0 %v6286_v49  ;;  %3443 = vmatpush1.bf16.msra.mxu1 %v6386_v50  ;;  %v6403_v49 = vcombine.high %v2858_v42, %v2859_v43  ;;  %v2079_v50 = vld [vmem:[#allocation7 + $0x5d0] sm:$0xff] }
 0x201   : > { %2663 = vmatprep.subr.bf16.mxu0 %v6289_v51  ;;  %3444 = vmatprep.subr.bf16.mxu1 %v6389_v52  ;;  %v2080_v51 = vld [vmem:[#allocation7 + $0x5f0] sm:$0xff]  ;;  %v2860_v52 = vld [vmem:[#allocation7 + $0x5d8] sm:$0xff] }
 0x202   : > { %v6305_v56 = vcombine.high %v2079_v50, %v2080_v51  ;;  %v6304_v63 = vcombine.low %v2079_v50, %v2080_v51  ;;  %v6404_v0 = vcombine.low %v2860_v52, %v2861_v53  ;;  %v2875_v50 = vld [vmem:[#allocation7 + $0x7b8] sm:$0xff] }
 0x204   : > { %2664 = vmatpush1.bf16.msra.mxu0 %v6288_v57  ;;  %3445 = vmatpush1.bf16.msra.mxu1 %v6388_v59  ;;  %v6405_v57 = vcombine.high %v2860_v52, %v2861_v53  ;;  %v2081_v59 = vld [vmem:[#allocation7 + $0x610] sm:$0xff] }
 0x205   : > { %2674 = vmatprep.subr.bf16.mxu0 %v6291_v60  ;;  %3455 = vmatprep.subr.bf16.mxu1 %v6391_v61  ;;  %v2082_v60 = vld [vmem:[#allocation7 + $0x630] sm:$0xff]  ;;  %v2862_v61 = vld [vmem:[#allocation7 + $0x618] sm:$0xff] }
 0x206   : > { %v6307_v1 = vcombine.high %v2081_v59, %v2082_v60  ;;  %v6306_v7 = vcombine.low %v2081_v59, %v2082_v60  ;;  %v2877_v59 = vld [vmem:[#allocation7 + $0x7f8] sm:$0xff] }
 0x207   : > { %2666 = vmatmul.mubr.bf16.vlgmr.msra.gmra.mrb[4].mxu0 %v8113_v13  ;;  %3447 = vmatmul.mubr.bf16.vlgmr.msra.gmra.mrb[4].mxu1 %v8113_v13  ;;  %v6394_v13 = vcombine.low %v2850_v8, %v2851_v9  ;;  %v6406_v8 = vcombine.low %v2862_v61, %v2863_v62 }
 0x208   : > { %2675 = vmatpush1.bf16.msra.mxu0 %v6290_v2  ;;  %3456 = vmatpush1.bf16.msra.mxu1 %v6390_v3  ;;  %v6407_v2 = vcombine.high %v2862_v61, %v2863_v62  ;;  %v2083_v3 = vld [vmem:[#allocation7 + $0x650] sm:$0xff] }
 0x209   : > { %2676 = vmatprep.subr.bf16.mxu0 %v6293_v4  ;;  %3457 = vmatprep.subr.bf16.mxu1 %v6393_v5  ;;  %v2084_v4 = vld [vmem:[#allocation7 + $0x670] sm:$0xff]  ;;  %v2864_v5 = vld [vmem:[#allocation7 + $0x658] sm:$0xff] }
 0x20a   : > { %2706 = vmatprep.mubr.bf16.mxu0 %v8115_v23  ;;  %3487 = vmatprep.mubr.bf16.mxu1 %v8115_v23  ;;  %v6399_v23 = vcombine.high %v2854_v25, %v2855_v26  ;;  %v6309_v9 = vcombine.high %v2083_v3, %v2084_v4  ;;  %v6308_v58 = vcombine.low %v2083_v3, %v2084_v4  ;;  %v2879_v3 = vld [vmem:[#allocation7 + $0x838] sm:$0xff] }
 0x20b   : > { %v6408_v16 = vcombine.low %v2864_v5, %v2865_v6 }
 0x20c   : > { %2677 = vmatpush1.bf16.msra.mxu0 %v6292_v10  ;;  %3458 = vmatpush1.bf16.msra.mxu1 %v6392_v11  ;;  %v6409_v10 = vcombine.high %v2864_v5, %v2865_v6  ;;  %v2085_v11 = vld [vmem:[#allocation7 + $0x690] sm:$0xff] }
 0x20d   : > { %2678 = vmatprep.subr.bf16.mxu0 %v6295_v12  ;;  %3459 = vmatprep.subr.bf16.mxu1 %v6395_v14  ;;  %v2086_v12 = vld [vmem:[#allocation7 + $0x6b0] sm:$0xff]  ;;  %v2866_v14 = vld [vmem:[#allocation7 + $0x698] sm:$0xff] }
 0x20e   : > { %v6311_v17 = vcombine.high %v2085_v11, %v2086_v12  ;;  %v6310_v24 = vcombine.low %v2085_v11, %v2086_v12  ;;  %v6410_v25 = vcombine.low %v2866_v14, %v2867_v15  ;;  %v2881_v11 = vld [vmem:[#allocation7 + $0x878] sm:$0xff] }
 0x210   : > { %2679 = vmatpush1.bf16.msra.mxu0 %v6294_v18  ;;  %3460 = vmatpush1.bf16.msra.mxu1 %v6394_v13  ;;  %v6411_v18 = vcombine.high %v2866_v14, %v2867_v15  ;;  %v2087_v13 = vld [vmem:[#allocation7 + $0x6d0] sm:$0xff] }
 0x211   : > { %2680 = vmatprep.subr.bf16.mxu0 %v6297_v19  ;;  %3461 = vmatprep.subr.bf16.mxu1 %v6397_v20  ;;  %v2088_v19 = vld [vmem:[#allocation7 + $0x6f0] sm:$0xff]  ;;  %v2868_v20 = vld [vmem:[#allocation7 + $0x6d8] sm:$0xff] }
 0x212   : > { %v6313_v26 = vcombine.high %v2087_v13, %v2088_v19  ;;  %v6312_v31 = vcombine.low %v2087_v13, %v2088_v19  ;;  %v6412_v32 = vcombine.low %v2868_v20, %v2869_v21  ;;  %v2883_v13 = vld [vmem:[#allocation7 + $0x8b8] sm:$0xff] }
 0x214   : > { %2681 = vmatpush1.bf16.msra.mxu0 %v6296_v27  ;;  %3462 = vmatpush1.bf16.msra.mxu1 %v6396_v28  ;;  %v6413_v27 = vcombine.high %v2868_v20, %v2869_v21  ;;  %v2089_v28 = vld [vmem:[#allocation7 + $0x710] sm:$0xff] }
 0x215   : > { %2682 = vmatprep.subr.bf16.mxu0 %v6299_v29  ;;  %3463 = vmatprep.subr.bf16.mxu1 %v6399_v23  ;;  %v2090_v29 = vld [vmem:[#allocation7 + $0x730] sm:$0xff]  ;;  %v2870_v23 = vld [vmem:[#allocation7 + $0x718] sm:$0xff] }
 0x216   : > { %v6315_v34 = vcombine.high %v2089_v28, %v2090_v29  ;;  %v6314_v41 = vcombine.low %v2089_v28, %v2090_v29  ;;  %v6414_v42 = vcombine.low %v2870_v23, %v2871_v30  ;;  %v2885_v28 = vld [vmem:[#allocation7 + $0x8f8] sm:$0xff] }
 0x218   : > { %2683 = vmatpush1.bf16.msra.mxu0 %v6298_v36  ;;  %3464 = vmatpush1.bf16.msra.mxu1 %v6398_v37  ;;  %v6415_v36 = vcombine.high %v2870_v23, %v2871_v30  ;;  %v2091_v37 = vld [vmem:[#allocation7 + $0x750] sm:$0xff] }
 0x219   : > { %2684 = vmatprep.subr.bf16.mxu0 %v6301_v38  ;;  %3465 = vmatprep.subr.bf16.mxu1 %v6401_v39  ;;  %v2092_v38 = vld [vmem:[#allocation7 + $0x770] sm:$0xff]  ;;  %v2872_v39 = vld [vmem:[#allocation7 + $0x758] sm:$0xff] }
 0x21a   : > { %v6317_v43 = vcombine.high %v2091_v37, %v2092_v38  ;;  %v6316_v51 = vcombine.low %v2091_v37, %v2092_v38  ;;  %v6416_v52 = vcombine.low %v2872_v39, %v2873_v40 }
 0x21c   : > { %2685 = vmatpush1.bf16.msra.mxu0 %v6300_v45  ;;  %3466 = vmatpush1.bf16.msra.mxu1 %v6400_v46  ;;  %v6417_v45 = vcombine.high %v2872_v39, %v2873_v40  ;;  %v2093_v46 = vld [vmem:[#allocation7 + $0x790] sm:$0xff] }
 0x21d   : > { %2686 = vmatprep.subr.bf16.mxu0 %v6303_v47  ;;  %3467 = vmatprep.subr.bf16.mxu1 %v6403_v49  ;;  %v2094_v47 = vld [vmem:[#allocation7 + $0x7b0] sm:$0xff]  ;;  %v2874_v49 = vld [vmem:[#allocation7 + $0x798] sm:$0xff] }
 0x21e   : > { %v6319_v53 = vcombine.high %v2093_v46, %v2094_v47  ;;  %v6318_v60 = vcombine.low %v2093_v46, %v2094_v47  ;;  %v6418_v61 = vcombine.low %v2874_v49, %v2875_v50  ;;  %v2107_v40 = vld [vmem:[#allocation7 + $0x950] sm:$0xff] }
 0x220   : > { %2687 = vmatpush1.bf16.msra.mxu0 %v6302_v54  ;;  %3468 = vmatpush1.bf16.msra.mxu1 %v6402_v55  ;;  %v6419_v54 = vcombine.high %v2874_v49, %v2875_v50  ;;  %v2095_v55 = vld [vmem:[#allocation7 + $0x7d0] sm:$0xff] }
 0x221   : > { %2688 = vmatprep.subr.bf16.mxu0 %v6305_v56  ;;  %3469 = vmatprep.subr.bf16.mxu1 %v6405_v57  ;;  %v2096_v56 = vld [vmem:[#allocation7 + $0x7f0] sm:$0xff]  ;;  %v2876_v57 = vld [vmem:[#allocation7 + $0x7d8] sm:$0xff] }
 0x222   : > { %v6321_v62 = vcombine.high %v2095_v55, %v2096_v56  ;;  %v6320_v4 = vcombine.low %v2095_v55, %v2096_v56  ;;  %v6420_v5 = vcombine.low %v2876_v57, %v2877_v59  ;;  %v2109_v50 = vld [vmem:[#allocation7 + $0x990] sm:$0xff] }
 0x224   : > { %2689 = vmatpush1.bf16.msra.mxu0 %v6304_v63  ;;  %3470 = vmatpush1.bf16.msra.mxu1 %v6404_v0  ;;  %v6421_v63 = vcombine.high %v2876_v57, %v2877_v59  ;;  %v2097_v0 = vld [vmem:[#allocation7 + $0x810] sm:$0xff] }
 0x225   : > { %2690 = vmatprep.subr.bf16.mxu0 %v6307_v1  ;;  %3471 = vmatprep.subr.bf16.mxu1 %v6407_v2  ;;  %v2098_v1 = vld [vmem:[#allocation7 + $0x830] sm:$0xff]  ;;  %v2878_v2 = vld [vmem:[#allocation7 + $0x818] sm:$0xff] }
 0x226   : > { %v6323_v6 = vcombine.high %v2097_v0, %v2098_v1  ;;  %v6322_v12 = vcombine.low %v2097_v0, %v2098_v1  ;;  %v6422_v14 = vcombine.low %v2878_v2, %v2879_v3  ;;  %v2111_v59 = vld [vmem:[#allocation7 + $0x9d0] sm:$0xff] }
 0x228   : > { %2691 = vmatpush1.bf16.msra.mxu0 %v6306_v7  ;;  %3472 = vmatpush1.bf16.msra.mxu1 %v6406_v8  ;;  %v6423_v7 = vcombine.high %v2878_v2, %v2879_v3  ;;  %v2099_v8 = vld [vmem:[#allocation7 + $0x850] sm:$0xff] }
 0x229   : > { %2692 = vmatprep.subr.bf16.mxu0 %v6309_v9  ;;  %3473 = vmatprep.subr.bf16.mxu1 %v6409_v10  ;;  %v2100_v9 = vld [vmem:[#allocation7 + $0x870] sm:$0xff]  ;;  %v2880_v10 = vld [vmem:[#allocation7 + $0x858] sm:$0xff] }
 0x22a   : > { %v6325_v15 = vcombine.high %v2099_v8, %v2100_v9  ;;  %v6324_v19 = vcombine.low %v2099_v8, %v2100_v9  ;;  %v6424_v20 = vcombine.low %v2880_v10, %v2881_v11  ;;  %v2113_v3 = vld [vmem:[#allocation7 + $0xa10] sm:$0xff] }
 0x22c   : > { %2693 = vmatpush1.bf16.msra.mxu0 %v6308_v58  ;;  %3474 = vmatpush1.bf16.msra.mxu1 %v6408_v16  ;;  %v6425_v58 = vcombine.high %v2880_v10, %v2881_v11  ;;  %v2101_v16 = vld [vmem:[#allocation7 + $0x890] sm:$0xff] }
 0x22d   : > { %2694 = vmatprep.subr.bf16.mxu0 %v6311_v17  ;;  %3475 = vmatprep.subr.bf16.mxu1 %v6411_v18  ;;  %v2102_v17 = vld [vmem:[#allocation7 + $0x8b0] sm:$0xff]  ;;  %v2882_v18 = vld [vmem:[#allocation7 + $0x898] sm:$0xff] }
 0x22e   : > { %v6327_v21 = vcombine.high %v2101_v16, %v2102_v17  ;;  %v6326_v29 = vcombine.low %v2101_v16, %v2102_v17  ;;  %v2115_v11 = vld [vmem:[#allocation7 + $0xa50] sm:$0xff] }
 0x230   : > { %2695 = vmatpush1.bf16.msra.mxu0 %v6310_v24  ;;  %3476 = vmatpush1.bf16.msra.mxu1 %v6410_v25  ;;  %v6427_v24 = vcombine.high %v2882_v18, %v2883_v13  ;;  %v2103_v25 = vld [vmem:[#allocation7 + $0x8d0] sm:$0xff] }
 0x231   : > { %2696 = vmatprep.subr.bf16.mxu0 %v6313_v26  ;;  %3477 = vmatprep.subr.bf16.mxu1 %v6413_v27  ;;  %v2104_v26 = vld [vmem:[#allocation7 + $0x8f0] sm:$0xff]  ;;  %v2884_v27 = vld [vmem:[#allocation7 + $0x8d8] sm:$0xff] }
 0x232   : > { %v6329_v23 = vcombine.high %v2103_v25, %v2104_v26  ;;  %v6429_v30 = vcombine.high %v2884_v27, %v2885_v28  ;;  %v6328_v37 = vcombine.low %v2103_v25, %v2104_v26  ;;  %v6428_v38 = vcombine.low %v2884_v27, %v2885_v28  ;;  %v2119_v28 = vld [vmem:[#allocation7 + $0xad0] sm:$0xff] }
 0x234   : > { %2697 = vmatpush1.bf16.msra.mxu0 %v6312_v31  ;;  %3478 = vmatpush1.bf16.msra.mxu1 %v6412_v32  ;;  %v2105_v31 = vld [vmem:[#allocation7 + $0x910] sm:$0xff] }
 0x235   : > { %2698 = vmatprep.subr.bf16.mxu0 %v6315_v34  ;;  %3479 = vmatprep.subr.bf16.mxu1 %v6415_v36  ;;  %v2106_v32 = vld [vmem:[#allocation7 + $0x930] sm:$0xff]  ;;  %v2886_v34 = vld [vmem:[#allocation7 + $0x918] sm:$0xff] }
 0x236   : > { %v2887_v36 = vld [vmem:[#allocation7 + $0x938] sm:$0xff]  ;;  %v6331_v39 = vcombine.high %v2105_v31, %v2106_v32 }
 0x237   : > { %v6430_v46 = vcombine.low %v2886_v34, %v2887_v36 }
 0x238   : > { %2699 = vmatpush1.bf16.msra.mxu0 %v6314_v41  ;;  %3480 = vmatpush1.bf16.msra.mxu1 %v6414_v42  ;;  %v2108_v41 = vld [vmem:[#allocation7 + $0x970] sm:$0xff]  ;;  %v2888_v42 = vld [vmem:[#allocation7 + $0x958] sm:$0xff] }
 0x239   : > { %2700 = vmatprep.subr.bf16.mxu0 %v6317_v43  ;;  %3481 = vmatprep.subr.bf16.mxu1 %v6417_v45  ;;  %v2889_v43 = vld [vmem:[#allocation7 + $0x978] sm:$0xff]  ;;  %v6330_v45 = vcombine.low %v2105_v31, %v2106_v32  ;;  %v6333_v47 = vcombine.high %v2107_v40, %v2108_v41 }
 0x23a   : > { %v6433_v49 = vcombine.high %v2888_v42, %v2889_v43  ;;  %v6432_v55 = vcombine.low %v2888_v42, %v2889_v43  ;;  %v2123_v43 = vld [vmem:[#allocation7 + $0xb50] sm:$0xff] }
 0x23c   : > { %2701 = vmatpush1.bf16.msra.mxu0 %v6316_v51  ;;  %3482 = vmatpush1.bf16.msra.mxu1 %v6416_v52  ;;  %v2110_v51 = vld [vmem:[#allocation7 + $0x9b0] sm:$0xff]  ;;  %v2890_v52 = vld [vmem:[#allocation7 + $0x998] sm:$0xff] }
 0x23d   : > { %2702 = vmatprep.subr.bf16.mxu0 %v6319_v53  ;;  %3483 = vmatprep.subr.bf16.mxu1 %v6419_v54  ;;  %v2891_v53 = vld [vmem:[#allocation7 + $0x9b8] sm:$0xff]  ;;  %v6332_v54 = vcombine.low %v2107_v40, %v2108_v41  ;;  %v6335_v56 = vcombine.high %v2109_v50, %v2110_v51 }
 0x23e   : > { %v6435_v57 = vcombine.high %v2890_v52, %v2891_v53  ;;  %v6434_v0 = vcombine.low %v2890_v52, %v2891_v53  ;;  %v2125_v53 = vld [vmem:[#allocation7 + $0xb90] sm:$0xff] }
 0x240   : > { %2703 = vmatpush1.bf16.msra.mxu0 %v6318_v60  ;;  %3484 = vmatpush1.bf16.msra.mxu1 %v6418_v61  ;;  %v2112_v60 = vld [vmem:[#allocation7 + $0x9f0] sm:$0xff]  ;;  %v2892_v61 = vld [vmem:[#allocation7 + $0x9d8] sm:$0xff] }
 0x241   : > { %2704 = vmatprep.subr.bf16.mxu0 %v6321_v62  ;;  %3485 = vmatprep.subr.bf16.mxu1 %v6421_v63  ;;  %v2893_v62 = vld [vmem:[#allocation7 + $0x9f8] sm:$0xff]  ;;  %v6334_v63 = vcombine.low %v2109_v50, %v2110_v51  ;;  %v6337_v1 = vcombine.high %v2111_v59, %v2112_v60 }
 0x242   : > { %v6437_v2 = vcombine.high %v2892_v61, %v2893_v62  ;;  %v6436_v8 = vcombine.low %v2892_v61, %v2893_v62  ;;  %v2127_v62 = vld [vmem:[#allocation7 + $0xbd0] sm:$0xff] }
 0x244   : > { %2705 = vmatpush1.bf16.msra.mxu0 %v6320_v4  ;;  %3486 = vmatpush1.bf16.msra.mxu1 %v6420_v5  ;;  %v2114_v4 = vld [vmem:[#allocation7 + $0xa30] sm:$0xff]  ;;  %v2894_v5 = vld [vmem:[#allocation7 + $0xa18] sm:$0xff] }
 0x245   : > { %2715 = vmatprep.subr.bf16.mxu0 %v6323_v6  ;;  %3496 = vmatprep.subr.bf16.mxu1 %v6423_v7  ;;  %v2895_v6 = vld [vmem:[#allocation7 + $0xa38] sm:$0xff]  ;;  %v6336_v7 = vcombine.low %v2111_v59, %v2112_v60  ;;  %v6339_v9 = vcombine.high %v2113_v3, %v2114_v4 }
 0x246   : > { %v6439_v10 = vcombine.high %v2894_v5, %v2895_v6  ;;  %v6438_v16 = vcombine.low %v2894_v5, %v2895_v6  ;;  %v2129_v6 = vld [vmem:[#allocation7 + $0xc10] sm:$0xff] }
 0x247   : > { %2707 = vmatmul.mubr.bf16.vlgmr.msra.gmra.mrb[4].mxu0 %v8121_v22  ;;  %3488 = vmatmul.mubr.bf16.vlgmr.msra.gmra.mrb[4].mxu1 %v8121_v22  ;;  %v6426_v22 = vcombine.low %v2882_v18, %v2883_v13  ;;  %v2117_v13 = vld [vmem:[#allocation7 + $0xa90] sm:$0xff] }
 0x248   : > { %2716 = vmatpush1.bf16.msra.mxu0 %v6322_v12  ;;  %3497 = vmatpush1.bf16.msra.mxu1 %v6422_v14  ;;  %v2116_v12 = vld [vmem:[#allocation7 + $0xa70] sm:$0xff]  ;;  %v2896_v14 = vld [vmem:[#allocation7 + $0xa58] sm:$0xff] }
 0x249   : > { %2717 = vmatprep.subr.bf16.mxu0 %v6325_v15  ;;  %3498 = vmatprep.subr.bf16.mxu1 %v6425_v58  ;;  %v2897_v15 = vld [vmem:[#allocation7 + $0xa78] sm:$0xff]  ;;  %v6338_v58 = vcombine.low %v2113_v3, %v2114_v4  ;;  %v6341_v17 = vcombine.high %v2115_v11, %v2116_v12 }
 0x24a   : > { %2747 = vmatprep.mubr.bf16.mxu0 %v8123_v33  ;;  %3528 = vmatprep.mubr.bf16.mxu1 %v8123_v33  ;;  %v6431_v33 = vcombine.high %v2886_v34, %v2887_v36  ;;  %v6441_v18 = vcombine.high %v2896_v14, %v2897_v15  ;;  %v6440_v25 = vcombine.low %v2896_v14, %v2897_v15  ;;  %v2121_v36 = vld [vmem:[#allocation7 + $0xb10] sm:$0xff] }
 0x24c   : > { %2718 = vmatpush1.bf16.msra.mxu0 %v6324_v19  ;;  %3499 = vmatpush1.bf16.msra.mxu1 %v6424_v20  ;;  %v2118_v19 = vld [vmem:[#allocation7 + $0xab0] sm:$0xff]  ;;  %v2898_v20 = vld [vmem:[#allocation7 + $0xa98] sm:$0xff] }
 0x24d   : > { %2719 = vmatprep.subr.bf16.mxu0 %v6327_v21  ;;  %3500 = vmatprep.subr.bf16.mxu1 %v6427_v24  ;;  %v2899_v21 = vld [vmem:[#allocation7 + $0xab8] sm:$0xff]  ;;  %v6340_v24 = vcombine.low %v2115_v11, %v2116_v12  ;;  %v6343_v26 = vcombine.high %v2117_v13, %v2118_v19 }
 0x24e   : > { %v6443_v27 = vcombine.high %v2898_v20, %v2899_v21  ;;  %v6442_v31 = vcombine.low %v2898_v20, %v2899_v21  ;;  %v1350_v20 = vld [vmem:[#allocation9 + $0x2] sm:$0x3] }
 0x250   : > { %2720 = vmatpush1.bf16.msra.mxu0 %v6326_v29  ;;  %3501 = vmatpush1.bf16.msra.mxu1 %v6426_v22  ;;  %v2120_v29 = vld [vmem:[#allocation7 + $0xaf0] sm:$0xff]  ;;  %v2900_v22 = vld [vmem:[#allocation7 + $0xad8] sm:$0xff] }
 0x251   : > { %2721 = vmatprep.subr.bf16.mxu0 %v6329_v23  ;;  %3502 = vmatprep.subr.bf16.mxu1 %v6429_v30  ;;  %v2901_v23 = vld [vmem:[#allocation7 + $0xaf8] sm:$0xff]  ;;  %v6342_v30 = vcombine.low %v2117_v13, %v2118_v19  ;;  %v6345_v32 = vcombine.high %v2119_v28, %v2120_v29  ;;  %v565_v13 = vld [vmem:[#allocation9] sm:$0x3] }
 0x252   : > { %v6445_v34 = vcombine.high %v2900_v22, %v2901_v23  ;;  %v6444_v40 = vcombine.low %v2900_v22, %v2901_v23 }
 0x254   : > { %2722 = vmatpush1.bf16.msra.mxu0 %v6328_v37  ;;  %3503 = vmatpush1.bf16.msra.mxu1 %v6428_v38  ;;  %v2122_v37 = vld [vmem:[#allocation7 + $0xb30] sm:$0xff]  ;;  %v2902_v38 = vld [vmem:[#allocation7 + $0xb18] sm:$0xff] }
 0x255   : > { %2723 = vmatprep.subr.bf16.mxu0 %v6331_v39  ;;  %3504 = vmatprep.subr.bf16.mxu1 %v6431_v33  ;;  %v2903_v39 = vld [vmem:[#allocation7 + $0xb38] sm:$0xff]  ;;  %v6344_v33 = vcombine.low %v2119_v28, %v2120_v29  ;;  %v6347_v41 = vcombine.high %v2121_v36, %v2122_v37 }
 0x256   : > { %v6447_v42 = vcombine.high %v2902_v38, %v2903_v39  ;;  %v6446_v50 = vcombine.low %v2902_v38, %v2903_v39 }
 0x258   : > { %2724 = vmatpush1.bf16.msra.mxu0 %v6330_v45  ;;  %3505 = vmatpush1.bf16.msra.mxu1 %v6430_v46  ;;  %v2124_v45 = vld [vmem:[#allocation7 + $0xb70] sm:$0xff]  ;;  %v2904_v46 = vld [vmem:[#allocation7 + $0xb58] sm:$0xff] }
 0x259   : > { %2725 = vmatprep.subr.bf16.mxu0 %v6333_v47  ;;  %3506 = vmatprep.subr.bf16.mxu1 %v6433_v49  ;;  %v2905_v47 = vld [vmem:[#allocation7 + $0xb78] sm:$0xff]  ;;  %v6346_v49 = vcombine.low %v2121_v36, %v2122_v37  ;;  %v6349_v51 = vcombine.high %v2123_v43, %v2124_v45 }
 0x25a   : > { %v6449_v52 = vcombine.high %v2904_v46, %v2905_v47  ;;  %v6448_v59 = vcombine.low %v2904_v46, %v2905_v47 }
 0x25c   : > { %2726 = vmatpush1.bf16.msra.mxu0 %v6332_v54  ;;  %3507 = vmatpush1.bf16.msra.mxu1 %v6432_v55  ;;  %v2126_v54 = vld [vmem:[#allocation7 + $0xbb0] sm:$0xff]  ;;  %v2906_v55 = vld [vmem:[#allocation7 + $0xb98] sm:$0xff] }
 0x25d   : > { %2727 = vmatprep.subr.bf16.mxu0 %v6335_v56  ;;  %3508 = vmatprep.subr.bf16.mxu1 %v6435_v57  ;;  %v2907_v56 = vld [vmem:[#allocation7 + $0xbb8] sm:$0xff]  ;;  %v6348_v57 = vcombine.low %v2123_v43, %v2124_v45  ;;  %v6351_v60 = vcombine.high %v2125_v53, %v2126_v54 }
 0x25e   : > { %v6451_v61 = vcombine.high %v2906_v55, %v2907_v56  ;;  %v6450_v3 = vcombine.low %v2906_v55, %v2907_v56  ;;  %v2131_v55 = vld [vmem:[#allocation9 + $0x4] sm:$0x3]  ;;  %v2912_v56 = vld [vmem:[#allocation9 + $0x6] sm:$0x3] }
 0x260   : > { %2728 = vmatpush1.bf16.msra.mxu0 %v6334_v63  ;;  %3509 = vmatpush1.bf16.msra.mxu1 %v6434_v0  ;;  %v2128_v63 = vld [vmem:[#allocation7 + $0xbf0] sm:$0xff]  ;;  %v2908_v0 = vld [vmem:[#allocation7 + $0xbd8] sm:$0xff] }
 0x261   : > { %2729 = vmatprep.subr.bf16.mxu0 %v6337_v1  ;;  %3510 = vmatprep.subr.bf16.mxu1 %v6437_v2  ;;  %v2909_v1 = vld [vmem:[#allocation7 + $0xbf8] sm:$0xff]  ;;  %v6350_v2 = vcombine.low %v2125_v53, %v2126_v54  ;;  %v6353_v4 = vcombine.high %v2127_v62, %v2128_v63 }
 0x262   : > { %v6453_v5 = vcombine.high %v2908_v0, %v2909_v1  ;;  %v6452_v11 = vcombine.low %v2908_v0, %v2909_v1 }
 0x264   : > { %2730 = vmatpush1.bf16.msra.mxu0 %v6336_v7  ;;  %3511 = vmatpush1.bf16.msra.mxu1 %v6436_v8  ;;  %v2130_v7 = vld [vmem:[#allocation7 + $0xc30] sm:$0xff]  ;;  %v2910_v8 = vld [vmem:[#allocation7 + $0xc18] sm:$0xff] }
 0x265   : > { %2731 = vmatprep.subr.bf16.mxu0 %v6339_v9  ;;  %3512 = vmatprep.subr.bf16.mxu1 %v6439_v10  ;;  %v2911_v9 = vld [vmem:[#allocation7 + $0xc38] sm:$0xff]  ;;  %v6352_v10 = vcombine.low %v2127_v62, %v2128_v63  ;;  %v6355_v12 = vcombine.high %v2129_v6, %v2130_v7  ;;  %v6354_v15 = vcombine.low %v2129_v6, %v2130_v7 }
 0x266   : > { %v6455_v14 = vcombine.high %v2910_v8, %v2911_v9 }
 0x268   : > { %2732 = vmatpush1.bf16.msra.mxu0 %v6338_v58  ;;  %3513 = vmatpush1.bf16.msra.mxu1 %v6438_v16  ;;  %v6454_v58 = vcombine.low %v2910_v8, %v2911_v9  ;;  %v567_v16 = vlaneseq }
 0x269   : > { %2733 = vmatprep.subr.bf16.mxu0 %v6341_v17  ;;  %3514 = vmatprep.subr.bf16.mxu1 %v6441_v18 }
 0x26a   : > { %v568_v17 = vshrl.u32 %v567_v16, 7 }
 0x26c   : > { %2734 = vmatpush1.bf16.msra.mxu0 %v6340_v24  ;;  %3515 = vmatpush1.bf16.msra.mxu1 %v6440_v25  ;;  %v569_v18 = vsub.s32 0, %v568_v17  ;;  %v573_v19 = vsub.s32 1, %v568_v17 }
 0x26d   : > { %2735 = vmatprep.subr.bf16.mxu0 %v6343_v26  ;;  %3516 = vmatprep.subr.bf16.mxu1 %v6443_v27 }
 0x26e   : > { %v570_v21 = vrot.slane %v565_v13, %v569_v18  ;;  %v574_v24 = vrot.slane %v565_v13, %v573_v19  ;;  %v1359_v25 = vrot.slane %v1350_v20, %v573_v19 }
 0x270   : > { %2736 = vmatpush1.bf16.msra.mxu0 %v6342_v30  ;;  %3517 = vmatpush1.bf16.msra.mxu1 %v6442_v31 }
 0x271   : > { %2737 = vmatprep.subr.bf16.mxu0 %v6345_v32  ;;  %3518 = vmatprep.subr.bf16.mxu1 %v6445_v34 }
 0x274   : > { %2738 = vmatpush1.bf16.msra.mxu0 %v6344_v33  ;;  %3519 = vmatpush1.bf16.msra.mxu1 %v6444_v40 }
 0x275   : > { %2739 = vmatprep.subr.bf16.mxu0 %v6347_v41  ;;  %3520 = vmatprep.subr.bf16.mxu1 %v6447_v42 }
 0x278   : > { %2740 = vmatpush1.bf16.msra.mxu0 %v6346_v49  ;;  %3521 = vmatpush1.bf16.msra.mxu1 %v6446_v50 }
 0x279   : > { %2741 = vmatprep.subr.bf16.mxu0 %v6349_v51  ;;  %3522 = vmatprep.subr.bf16.mxu1 %v6449_v52 }
 0x27c   : > { %2742 = vmatpush1.bf16.msra.mxu0 %v6348_v57  ;;  %3523 = vmatpush1.bf16.msra.mxu1 %v6448_v59  ;;  %v2136_v57 = vrot.slane %v2131_v55, %v569_v18  ;;  %v2917_v59 = vrot.slane %v2912_v56, %v569_v18 }
 0x27d   : > { %2743 = vmatprep.subr.bf16.mxu0 %v6351_v60  ;;  %3524 = vmatprep.subr.bf16.mxu1 %v6451_v61  ;;  %v2140_v60 = vrot.slane %v2131_v55, %v573_v19  ;;  %v2921_v61 = vrot.slane %v2912_v56, %v573_v19 }
 0x280   : > { %2744 = vmatpush1.bf16.msra.mxu0 %v6350_v2  ;;  %3525 = vmatpush1.bf16.msra.mxu1 %v6450_v3 }
 0x281   : > { %2745 = vmatprep.subr.bf16.mxu0 %v6353_v4  ;;  %3526 = vmatprep.subr.bf16.mxu1 %v6453_v5 }
 0x284   : > { %2746 = vmatpush1.bf16.msra.mxu0 %v6352_v10  ;;  %3527 = vmatpush1.bf16.msra.mxu1 %v6452_v11 }
 0x285   : > { %2756 = vmatprep.subr.bf16.mxu0 %v6355_v12  ;;  %3537 = vmatprep.subr.bf16.mxu1 %v6455_v14 }
 0x287   : > { %2748 = vmatmul.mubr.bf16.vlgmr.msra.gmra.mrb[4].mxu0 %v8129_v35  ;;  %3529 = vmatmul.mubr.bf16.vlgmr.msra.gmra.mrb[4].mxu1 %v8129_v35  ;;  %v1355_v35 = vrot.slane %v1350_v20, %v569_v18 }
 0x288   : > { %2757 = vmatpush1.bf16.msra.mxu0 %v6354_v15  ;;  %3538 = vmatpush1.bf16.msra.mxu1 %v6454_v58 }
 0x289   : > { %2788 = vmatprep.mubr.bf16.mxu0 %v7773_v44  ;;  %3569 = vmatprep.mubr.bf16.mxu1 %v7773_v44 }
 0x293   : > { %6356 = vmatmul.mubr.msk.bf16.vlgmr.msra.gmra.mrb[4].mxu0 %vm1067_vm0, %v8135_v48  ;;  %6456 = vmatmul.mubr.msk.bf16.vlgmr.msra.gmra.mrb[4].mxu1 %vm1067_vm0, %v8135_v48 }
 0x29a   : > { %v1228_v26 = vpop.f32.mrb[0].mxu0  ;;  %v2009_v28 = vpop.f32.mrb[0].mxu1 }
 0x29b   : > { %v6810_v27 = vadd.f32 %v1228_v26, %v570_v21  ;;  %v1230_v44 = vpop.f32.mrb[1].mxu0  ;;  %v6812_v29 = vadd.f32 %v2009_v28, %v1355_v35  ;;  %v2011_v23 = vpop.f32.mrb[1].mxu1 }
 0x29c   : > { %v6811_v22 = vadd.f32 %v1230_v44, %v574_v24  ;;  %v1232_v30 = vpop.f32.mrb[2].mxu0  ;;  %v6813_v32 = vadd.f32 %v2011_v23, %v1359_v25  ;;  %v2013_v34 = vpop.f32.mrb[2].mxu1 }
 0x29d   : > { %v1235_v31 = vmul.f32 0.5, %v6810_v27  ;;  %v1233_v36 = vpop.f32.mrb[3].mxu0  ;;  %v2016_v48 = vmul.f32 0.5, %v6812_v29  ;;  %v2014_v38 = vpop.f32.mrb[3].mxu1 }
 0x29e   : > { %v1236_v37 = vmul.f32 0.5, %v6811_v22  ;;  %v2017_v39 = vmul.f32 0.5, %v6813_v32 }
 0x29f   : > { %7015 = vtanh.f32 %v1235_v31 }
 0x2a0   : > { %7017 = vtanh.f32 %v2016_v48 }
 0x2a1   : > { %7019 = vtanh.f32 %v1236_v37 }
 0x2a2   : > { %7021 = vtanh.f32 %v2017_v39 }
 0x2a9   : > { %v7016_v33 = vpop.eup %7015 }
 0x2aa   : > { %v7018_v40 = vpop.eup %7017  ;;  %v1239_v41 = vadd.f32 1.0, %v7016_v33 }
 0x2ab   : > { %v7020_v42 = vpop.eup %7019  ;;  %v2020_v43 = vadd.f32 1.0, %v7018_v40 }
 0x2ac   : > { %v7022_v45 = vpop.eup %7021  ;;  %v1241_v46 = vmul.f32 0.5, %v1239_v41  ;;  %v1240_v47 = vadd.f32 1.0, %v7020_v42 }
 0x2ad   : > { %v2022_v49 = vmul.f32 0.5, %v2020_v43  ;;  %v2021_v50 = vadd.f32 1.0, %v7022_v45 }
 0x2ae   : > { %v1242_v51 = vmul.f32 0.5, %v1240_v47 }
 0x2af   : > { %v2023_v52 = vmul.f32 0.5, %v2021_v50 }
 0x2b0   : > { %v6762_v53 = vpack.c.bf16 %v1242_v51, %v1241_v46 }
 0x2b1   : > { %v6763_v54 = vpack.c.bf16 %v2023_v52, %v2022_v49 }
 0x2b2   : > { %1251 = vst [vmem:[#allocation2] sm:$0xff] %v6762_v53 }
 0x2b3   : > { %2032 = vst [vmem:[#allocation2 + $0x8] sm:$0xff] %v6763_v54 }
 0x366   : > { %v2790_v62 = vpop.f32.mrb[4].mxu0  ;;  %v3571_v0 = vpop.f32.mrb[4].mxu1 }
 0x367   : > { %v6814_v63 = vadd.f32 %v2790_v62, %v2136_v57  ;;  %v2792_v1 = vpop.f32.mrb[5].mxu0  ;;  %v6816_v2 = vadd.f32 %v3571_v0, %v2917_v59  ;;  %v3573_v4 = vpop.f32.mrb[5].mxu1 }
 0x368   : > { %v6815_v3 = vadd.f32 %v2792_v1, %v2140_v60  ;;  %v2794_v5 = vpop.f32.mrb[6].mxu0  ;;  %v6817_v7 = vadd.f32 %v3573_v4, %v2921_v61  ;;  %v3575_v8 = vpop.f32.mrb[6].mxu1 }
 0x369   : > { %v2797_v6 = vmul.f32 0.5, %v6814_v63  ;;  %v2795_v9 = vpop.f32.mrb[7].mxu0  ;;  %v3578_v10 = vmul.f32 0.5, %v6816_v2  ;;  %v3576_v12 = vpop.f32.mrb[7].mxu1 }
 0x36a   : > { %v2798_v11 = vmul.f32 0.5, %v6815_v3  ;;  %v3579_v14 = vmul.f32 0.5, %v6817_v7 }
 0x36b   : > { %7023 = vtanh.f32 %v2797_v6 }
 0x36c   : > { %7025 = vtanh.f32 %v3578_v10 }
 0x36d   : > { %7027 = vtanh.f32 %v2798_v11 }
 0x36e   : > { %7029 = vtanh.f32 %v3579_v14 }
 0x375   : > { %v7024_v15 = vpop.eup %7023 }
 0x376   : > { %v7026_v58 = vpop.eup %7025  ;;  %v2801_v16 = vadd.f32 1.0, %v7024_v15 }
 0x377   : > { %v7028_v17 = vpop.eup %7027  ;;  %v3582_v18 = vadd.f32 1.0, %v7026_v58 }
 0x378   : > { %v7030_v13 = vpop.eup %7029  ;;  %v2803_v19 = vmul.f32 0.5, %v2801_v16  ;;  %v2802_v20 = vadd.f32 1.0, %v7028_v17 }
 0x379   : > { %v3584_v21 = vmul.f32 0.5, %v3582_v18  ;;  %v3583_v35 = vadd.f32 1.0, %v7030_v13 }
 0x37a   : > { %v2804_v24 = vmul.f32 0.5, %v2802_v20 }
 0x37b   : > { %v3585_v25 = vmul.f32 0.5, %v3583_v35 }
 0x37c   : > { %v6764_v26 = vpack.c.bf16 %v2804_v24, %v2803_v19 }
 0x37d   : > { %v6765_v27 = vpack.c.bf16 %v3585_v25, %v3584_v21 }
 0x37e   : > { %2813 = vst [vmem:[#allocation2 + $0x10] sm:$0xff] %v6764_v26 }
 0x37f   : > { %3594 = vst [vmem:[#allocation2 + $0x18] sm:$0xff] %v6765_v27 }
 0x380 PF: > { %v7031_v28 = vld [vmem:[%s8090_s3 + $0x4] ss:$16 sps:$4 sm:$0xff]   ;;  %v7033_v44 = vld [vmem:[%s8090_s3 + $0xc] ss:$16 sps:$4 sm:$0xff]   ;;  %v7035_v29 = vld [vmem:[%s8090_s3] ss:$16 sps:$4 sm:$0xff]  }
 0x381   : > { %5185 = vmatprep.subr.bf16.mxu0 %v7031_v28  ;;  %v7036_v22 = vld [vmem:[%s8090_s3 + $0x8] ss:$16 sps:$4 sm:$0xff]   ;;  %5349 = vmatprep.subr.bf16.mxu1 %v7033_v44  ;;  %v7037_v23 = vld [vmem:[%s8090_s3 + $0x24] ss:$16 sps:$4 sm:$0xff]   ;;  %v7039_v30 = vld [vmem:[%s8090_s3 + $0x2c] ss:$16 sps:$4 sm:$0xff]  }
 0x382   : > { %5186 = vmatpush1.bf16.msra.mxu0 %v7035_v29  ;;  %5350 = vmatpush1.bf16.msra.mxu1 %v7036_v22  ;;  %v7041_v31 = vld [vmem:[%s8090_s3 + $0x20] ss:$16 sps:$4 sm:$0xff]   ;;  %v7042_v32 = vld [vmem:[%s8090_s3 + $0x28] ss:$16 sps:$4 sm:$0xff]   ;;  %v7043_v34 = vld [vmem:[%s8090_s3 + $0x44] ss:$16 sps:$4 sm:$0xff]  }
 0x383   : > { %5187 = vmatprep.subr.bf16.mxu0 %v7037_v23  ;;  %5351 = vmatprep.subr.bf16.mxu1 %v7039_v30  ;;  %v7045_v36 = vld [vmem:[%s8090_s3 + $0x4c] ss:$16 sps:$4 sm:$0xff]   ;;  %v7047_v48 = vld [vmem:[%s8090_s3 + $0x40] ss:$16 sps:$4 sm:$0xff]   ;;  %v7048_v37 = vld [vmem:[%s8090_s3 + $0x48] ss:$16 sps:$4 sm:$0xff]  }
 0x384   : > { %v7049_v38 = vld [vmem:[%s8090_s3 + $0x64] ss:$16 sps:$4 sm:$0xff]   ;;  %v7051_v39 = vld [vmem:[%s8090_s3 + $0x6c] ss:$16 sps:$4 sm:$0xff]   ;;  %v7053_v33 = vld [vmem:[%s8090_s3 + $0x60] ss:$16 sps:$4 sm:$0xff]  }
 0x385   : > { %v7054_v40 = vld [vmem:[%s8090_s3 + $0x68] ss:$16 sps:$4 sm:$0xff]   ;;  %v7055_v41 = vld [vmem:[%s8090_s3 + $0x84] ss:$16 sps:$4 sm:$0xff]   ;;  %v7057_v42 = vld [vmem:[%s8090_s3 + $0x8c] ss:$16 sps:$4 sm:$0xff]  }
 0x386   : > { %5188 = vmatpush1.bf16.msra.mxu0 %v7041_v31  ;;  %5352 = vmatpush1.bf16.msra.mxu1 %v7042_v32  ;;  %v7059_v43 = vld [vmem:[%s8090_s3 + $0x80] ss:$16 sps:$4 sm:$0xff]   ;;  %v7060_v45 = vld [vmem:[%s8090_s3 + $0x88] ss:$16 sps:$4 sm:$0xff]   ;;  %v7061_v46 = vld [vmem:[%s8090_s3 + $0xa4] ss:$16 sps:$4 sm:$0xff]  }
 0x387   : > { %5189 = vmatprep.subr.bf16.mxu0 %v7043_v34  ;;  %5353 = vmatprep.subr.bf16.mxu1 %v7045_v36  ;;  %v7063_v47 = vld [vmem:[%s8090_s3 + $0xac] ss:$16 sps:$4 sm:$0xff]   ;;  %v7065_v49 = vld [vmem:[%s8090_s3 + $0xa0] ss:$16 sps:$4 sm:$0xff]   ;;  %v7066_v50 = vld [vmem:[%s8090_s3 + $0xa8] ss:$16 sps:$4 sm:$0xff]  }
 0x388   : > { %v7067_v51 = vld [vmem:[%s8090_s3 + $0xc4] ss:$16 sps:$4 sm:$0xff]   ;;  %v7069_v52 = vld [vmem:[%s8090_s3 + $0xcc] ss:$16 sps:$4 sm:$0xff]   ;;  %v7071_v53 = vld [vmem:[%s8090_s3 + $0xc0] ss:$16 sps:$4 sm:$0xff]  }
 0x389   : > { %v7072_v54 = vld [vmem:[%s8090_s3 + $0xc8] ss:$16 sps:$4 sm:$0xff]   ;;  %v7073_v55 = vld [vmem:[%s8090_s3 + $0xe4] ss:$16 sps:$4 sm:$0xff]   ;;  %v7075_v56 = vld [vmem:[%s8090_s3 + $0xec] ss:$16 sps:$4 sm:$0xff]  }
 0x38a   : > { %5190 = vmatpush1.bf16.msra.mxu0 %v7047_v48  ;;  %5354 = vmatpush1.bf16.msra.mxu1 %v7048_v37  ;;  %v7077_v57 = vld [vmem:[%s8090_s3 + $0xe0] ss:$16 sps:$4 sm:$0xff]   ;;  %v7078_v59 = vld [vmem:[%s8090_s3 + $0xe8] ss:$16 sps:$4 sm:$0xff]   ;;  %v7079_v60 = vld [vmem:[%s8090_s3 + $0x104] ss:$16 sps:$4 sm:$0xff]  }
 0x38b   : > { %5191 = vmatprep.subr.bf16.mxu0 %v7049_v38  ;;  %5355 = vmatprep.subr.bf16.mxu1 %v7051_v39  ;;  %v7081_v61 = vld [vmem:[%s8090_s3 + $0x10c] ss:$16 sps:$4 sm:$0xff]   ;;  %v7083_v62 = vld [vmem:[%s8090_s3 + $0x100] ss:$16 sps:$4 sm:$0xff]   ;;  %v7084_v63 = vld [vmem:[%s8090_s3 + $0x108] ss:$16 sps:$4 sm:$0xff]  }
 0x38c   : > { %v7085_v0 = vld [vmem:[%s8090_s3 + $0x124] ss:$16 sps:$4 sm:$0xff]   ;;  %v7087_v1 = vld [vmem:[%s8090_s3 + $0x12c] ss:$16 sps:$4 sm:$0xff]   ;;  %v7089_v2 = vld [vmem:[%s8090_s3 + $0x120] ss:$16 sps:$4 sm:$0xff]  }
 0x38d   : > { %v7090_v3 = vld [vmem:[%s8090_s3 + $0x128] ss:$16 sps:$4 sm:$0xff]   ;;  %v7091_v4 = vld [vmem:[%s8090_s3 + $0x144] ss:$16 sps:$4 sm:$0xff]   ;;  %v7093_v5 = vld [vmem:[%s8090_s3 + $0x14c] ss:$16 sps:$4 sm:$0xff]  }
 0x38e   : > { %5192 = vmatpush1.bf16.msra.mxu0 %v7053_v33  ;;  %5356 = vmatpush1.bf16.msra.mxu1 %v7054_v40  ;;  %v7095_v6 = vld [vmem:[%s8090_s3 + $0x140] ss:$16 sps:$4 sm:$0xff]   ;;  %v7096_v7 = vld [vmem:[%s8090_s3 + $0x148] ss:$16 sps:$4 sm:$0xff]   ;;  %v7097_v8 = vld [vmem:[%s8090_s3 + $0x164] ss:$16 sps:$4 sm:$0xff]  }
 0x38f   : > { %5193 = vmatprep.subr.bf16.mxu0 %v7055_v41  ;;  %5357 = vmatprep.subr.bf16.mxu1 %v7057_v42  ;;  %v7099_v9 = vld [vmem:[%s8090_s3 + $0x16c] ss:$16 sps:$4 sm:$0xff]   ;;  %v7101_v11 = vld [vmem:[%s8090_s3 + $0x160] ss:$16 sps:$4 sm:$0xff]   ;;  %v7102_v14 = vld [vmem:[%s8090_s3 + $0x168] ss:$16 sps:$4 sm:$0xff]  }
 0x390   : > { %v3595_v10 = vld [vmem:[#allocation2] sm:$0xff]  ;;  %v7103_v15 = vld [vmem:[%s8090_s3 + $0x184] ss:$16 sps:$4 sm:$0xff]   ;;  %v7107_v16 = vld [vmem:[%s8090_s3 + $0x180] ss:$16 sps:$4 sm:$0xff]   ;;  %s8566_s19 = sld [smem:[#allocation24_spill]] }
 0x391   : > { %v6459_v12 = vcombine.high %v3595_v10, %v3595_v10  ;;  %v7105_v58 = vld [vmem:[%s8090_s3 + $0x18c] ss:$16 sps:$4 sm:$0xff]   ;;  %v7108_v17 = vld [vmem:[%s8090_s3 + $0x188] ss:$16 sps:$4 sm:$0xff]   ;;  %v7109_v18 = vld [vmem:[%s8090_s3 + $0x1a4] ss:$16 sps:$4 sm:$0xff]   ;;  %v6458_v23 = vcombine.low %v3595_v10, %v3595_v10 }
 0x392   : > { %5194 = vmatpush1.bf16.msra.mxu0 %v7059_v43  ;;  %5358 = vmatpush1.bf16.msra.mxu1 %v7060_v45  ;;  %v7111_v13 = vld [vmem:[%s8090_s3 + $0x1ac] ss:$16 sps:$4 sm:$0xff]   ;;  %v7113_v19 = vld [vmem:[%s8090_s3 + $0x1a0] ss:$16 sps:$4 sm:$0xff]   ;;  %v7114_v20 = vld [vmem:[%s8090_s3 + $0x1a8] ss:$16 sps:$4 sm:$0xff]  }
 0x393   : > { %5195 = vmatprep.subr.bf16.mxu0 %v7061_v46  ;;  %5359 = vmatprep.subr.bf16.mxu1 %v7063_v47  ;;  %v7115_v21 = vld [vmem:[%s8090_s3 + $0x1c4] ss:$16 sps:$4 sm:$0xff]   ;;  %v7117_v35 = vld [vmem:[%s8090_s3 + $0x1cc] ss:$16 sps:$4 sm:$0xff]   ;;  %v7119_v24 = vld [vmem:[%s8090_s3 + $0x1c0] ss:$16 sps:$4 sm:$0xff]  }
 0x394   : > { %5217 = vmatprep.mubr.bf16.mxu0 %v6459_v12  ;;  %5381 = vmatprep.mubr.bf16.mxu1 %v6459_v12  ;;  %v7120_v25 = vld [vmem:[%s8090_s3 + $0x1c8] ss:$16 sps:$4 sm:$0xff]   ;;  %v7121_v26 = vld [vmem:[%s8090_s3 + $0x1e4] ss:$16 sps:$4 sm:$0xff]   ;;  %v7123_v27 = vld [vmem:[%s8090_s3 + $0x1ec] ss:$16 sps:$4 sm:$0xff]  }
 0x395   : > { %v7125_v28 = vld [vmem:[%s8090_s3 + $0x1e0] ss:$16 sps:$4 sm:$0xff]   ;;  %v7126_v44 = vld [vmem:[%s8090_s3 + $0x1e8] ss:$16 sps:$4 sm:$0xff]   ;;  %v7131_v29 = vld [vmem:[%s8090_s3 + $0x204] ss:$16 sps:$4 sm:$0xff]  }
 0x396   : > { %5196 = vmatpush1.bf16.msra.mxu0 %v7065_v49  ;;  %5360 = vmatpush1.bf16.msra.mxu1 %v7066_v50  ;;  %v7134_v22 = vld [vmem:[%s8090_s3 + $0x20c] ss:$16 sps:$4 sm:$0xff]   ;;  %v7129_v30 = vld [vmem:[%s8090_s3 + $0x200] ss:$16 sps:$4 sm:$0xff]   ;;  %v7132_v31 = vld [vmem:[%s8090_s3 + $0x208] ss:$16 sps:$4 sm:$0xff]  }
 0x397   : > { %5197 = vmatprep.subr.bf16.mxu0 %v7067_v51  ;;  %5361 = vmatprep.subr.bf16.mxu1 %v7069_v52  ;;  %v7137_v32 = vld [vmem:[%s8090_s3 + $0x224] ss:$16 sps:$4 sm:$0xff]   ;;  %v7140_v34 = vld [vmem:[%s8090_s3 + $0x22c] ss:$16 sps:$4 sm:$0xff]   ;;  %v7135_v36 = vld [vmem:[%s8090_s3 + $0x220] ss:$16 sps:$4 sm:$0xff]  }
 0x398   : > { %v7138_v48 = vld [vmem:[%s8090_s3 + $0x228] ss:$16 sps:$4 sm:$0xff]   ;;  %v7143_v37 = vld [vmem:[%s8090_s3 + $0x244] ss:$16 sps:$4 sm:$0xff]   ;;  %v7146_v38 = vld [vmem:[%s8090_s3 + $0x24c] ss:$16 sps:$4 sm:$0xff]  }
 0x399   : > { %v7141_v39 = vld [vmem:[%s8090_s3 + $0x240] ss:$16 sps:$4 sm:$0xff]   ;;  %v7144_v33 = vld [vmem:[%s8090_s3 + $0x248] ss:$16 sps:$4 sm:$0xff]   ;;  %v7149_v40 = vld [vmem:[%s8090_s3 + $0x264] ss:$16 sps:$4 sm:$0xff]  }
 0x39a   : > { %5198 = vmatpush1.bf16.msra.mxu0 %v7071_v53  ;;  %5362 = vmatpush1.bf16.msra.mxu1 %v7072_v54  ;;  %v7152_v41 = vld [vmem:[%s8090_s3 + $0x26c] ss:$16 sps:$4 sm:$0xff]   ;;  %v7147_v42 = vld [vmem:[%s8090_s3 + $0x260] ss:$16 sps:$4 sm:$0xff]   ;;  %v7150_v43 = vld [vmem:[%s8090_s3 + $0x268] ss:$16 sps:$4 sm:$0xff]  }
 0x39b   : > { %5199 = vmatprep.subr.bf16.mxu0 %v7073_v55  ;;  %5363 = vmatprep.subr.bf16.mxu1 %v7075_v56  ;;  %v7155_v45 = vld [vmem:[%s8090_s3 + $0x284] ss:$16 sps:$4 sm:$0xff]   ;;  %v7158_v46 = vld [vmem:[%s8090_s3 + $0x28c] ss:$16 sps:$4 sm:$0xff]   ;;  %v7153_v47 = vld [vmem:[%s8090_s3 + $0x280] ss:$16 sps:$4 sm:$0xff]  }
 0x39c   : > { %v7156_v49 = vld [vmem:[%s8090_s3 + $0x288] ss:$16 sps:$4 sm:$0xff]   ;;  %v7161_v50 = vld [vmem:[%s8090_s3 + $0x2a4] ss:$16 sps:$4 sm:$0xff]   ;;  %v7164_v51 = vld [vmem:[%s8090_s3 + $0x2ac] ss:$16 sps:$4 sm:$0xff]  }
 0x39d   : > { %v7159_v52 = vld [vmem:[%s8090_s3 + $0x2a0] ss:$16 sps:$4 sm:$0xff]   ;;  %v7162_v53 = vld [vmem:[%s8090_s3 + $0x2a8] ss:$16 sps:$4 sm:$0xff]   ;;  %v7167_v54 = vld [vmem:[%s8090_s3 + $0x2c4] ss:$16 sps:$4 sm:$0xff]  }
 0x39e   : > { %5200 = vmatpush1.bf16.msra.mxu0 %v7077_v57  ;;  %5364 = vmatpush1.bf16.msra.mxu1 %v7078_v59  ;;  %v7170_v55 = vld [vmem:[%s8090_s3 + $0x2cc] ss:$16 sps:$4 sm:$0xff]   ;;  %v8249_v56 = vld [vmem:[#allocation2 + $0x8] sm:$0xff]  ;;  %v7192_v12 = vld [vmem:[%s8090_s3 + $0x348] ss:$16 sps:$4 sm:$0xff]   ;;  %p6754_p1 = scmp.ne.s32.totalorder %s8566_s19, 3 }
 0x39f   : > { %5201 = vmatprep.subr.bf16.mxu0 %v7079_v60  ;;  %5365 = vmatprep.subr.bf16.mxu1 %v7081_v61  ;;  %v6461_v57 = vcombine.high %v8249_v56, %v8249_v56  ;;  %v7165_v59 = vld [vmem:[%s8090_s3 + $0x2c0] ss:$16 sps:$4 sm:$0xff]   ;;  %v7168_v60 = vld [vmem:[%s8090_s3 + $0x2c8] ss:$16 sps:$4 sm:$0xff]   ;;  %v7173_v61 = vld [vmem:[%s8090_s3 + $0x2e4] ss:$16 sps:$4 sm:$0xff]  }
 0x3a0   : > { %v7194_v10 = vld [vmem:[%s8090_s3 + $0x34c] ss:$16 sps:$4 sm:$0xff]  }
 0x3a2   : > { %5202 = vmatpush1.bf16.msra.mxu0 %v7083_v62  ;;  %5366 = vmatpush1.bf16.msra.mxu1 %v7084_v63  ;;  %v7176_v62 = vld [vmem:[%s8090_s3 + $0x2ec] ss:$16 sps:$4 sm:$0xff]   ;;  %v7171_v63 = vld [vmem:[%s8090_s3 + $0x2e0] ss:$16 sps:$4 sm:$0xff]  }
 0x3a3   : > { %5203 = vmatprep.subr.bf16.mxu0 %v7085_v0  ;;  %5367 = vmatprep.subr.bf16.mxu1 %v7087_v1  ;;  %v7174_v0 = vld [vmem:[%s8090_s3 + $0x2e8] ss:$16 sps:$4 sm:$0xff]   ;;  %v7179_v1 = vld [vmem:[%s8090_s3 + $0x304] ss:$16 sps:$4 sm:$0xff]  }
 0x3a6   : > { %5204 = vmatpush1.bf16.msra.mxu0 %v7089_v2  ;;  %5368 = vmatpush1.bf16.msra.mxu1 %v7090_v3  ;;  %v7182_v2 = vld [vmem:[%s8090_s3 + $0x30c] ss:$16 sps:$4 sm:$0xff]   ;;  %v7177_v3 = vld [vmem:[%s8090_s3 + $0x300] ss:$16 sps:$4 sm:$0xff]  }
 0x3a7   : > { %5205 = vmatprep.subr.bf16.mxu0 %v7091_v4  ;;  %5369 = vmatprep.subr.bf16.mxu1 %v7093_v5  ;;  %v7180_v4 = vld [vmem:[%s8090_s3 + $0x308] ss:$16 sps:$4 sm:$0xff]   ;;  %v7185_v5 = vld [vmem:[%s8090_s3 + $0x324] ss:$16 sps:$4 sm:$0xff]  }
 0x3aa   : > { %5206 = vmatpush1.bf16.msra.mxu0 %v7095_v6  ;;  %5370 = vmatpush1.bf16.msra.mxu1 %v7096_v7  ;;  %v7188_v6 = vld [vmem:[%s8090_s3 + $0x32c] ss:$16 sps:$4 sm:$0xff]   ;;  %v7183_v7 = vld [vmem:[%s8090_s3 + $0x320] ss:$16 sps:$4 sm:$0xff]  }
 0x3ab   : > { %5207 = vmatprep.subr.bf16.mxu0 %v7097_v8  ;;  %5371 = vmatprep.subr.bf16.mxu1 %v7099_v9  ;;  %v7186_v8 = vld [vmem:[%s8090_s3 + $0x328] ss:$16 sps:$4 sm:$0xff]   ;;  %v7191_v9 = vld [vmem:[%s8090_s3 + $0x344] ss:$16 sps:$4 sm:$0xff]  }
 0x3ae   : > { %5208 = vmatpush1.bf16.msra.mxu0 %v7101_v11  ;;  %5372 = vmatpush1.bf16.msra.mxu1 %v7102_v14  ;;  %v7189_v11 = vld [vmem:[%s8090_s3 + $0x340] ss:$16 sps:$4 sm:$0xff]   ;;  %v7197_v14 = vld [vmem:[%s8090_s3 + $0x364] ss:$16 sps:$4 sm:$0xff]  }
 0x3af   : > { %5209 = vmatprep.subr.bf16.mxu0 %v7103_v15  ;;  %5373 = vmatprep.subr.bf16.mxu1 %v7105_v58  ;;  %v7200_v15 = vld [vmem:[%s8090_s3 + $0x36c] ss:$16 sps:$4 sm:$0xff]   ;;  %v7195_v58 = vld [vmem:[%s8090_s3 + $0x360] ss:$16 sps:$4 sm:$0xff]  }
 0x3b2   : > { %5210 = vmatpush1.bf16.msra.mxu0 %v7107_v16  ;;  %5374 = vmatpush1.bf16.msra.mxu1 %v7108_v17  ;;  %v7198_v16 = vld [vmem:[%s8090_s3 + $0x368] ss:$16 sps:$4 sm:$0xff]   ;;  %v7203_v17 = vld [vmem:[%s8090_s3 + $0x384] ss:$16 sps:$4 sm:$0xff]  }
 0x3b3   : > { %5211 = vmatprep.subr.bf16.mxu0 %v7109_v18  ;;  %5375 = vmatprep.subr.bf16.mxu1 %v7111_v13  ;;  %v7206_v18 = vld [vmem:[%s8090_s3 + $0x38c] ss:$16 sps:$4 sm:$0xff]   ;;  %v7201_v13 = vld [vmem:[%s8090_s3 + $0x380] ss:$16 sps:$4 sm:$0xff]  }
 0x3b6   : > { %5212 = vmatpush1.bf16.msra.mxu0 %v7113_v19  ;;  %5376 = vmatpush1.bf16.msra.mxu1 %v7114_v20  ;;  %v7204_v19 = vld [vmem:[%s8090_s3 + $0x388] ss:$16 sps:$4 sm:$0xff]   ;;  %v7209_v20 = vld [vmem:[%s8090_s3 + $0x3a4] ss:$16 sps:$4 sm:$0xff]  }
 0x3b7   : > { %5213 = vmatprep.subr.bf16.mxu0 %v7115_v21  ;;  %5377 = vmatprep.subr.bf16.mxu1 %v7117_v35  ;;  %v7212_v21 = vld [vmem:[%s8090_s3 + $0x3ac] ss:$16 sps:$4 sm:$0xff]   ;;  %v7207_v35 = vld [vmem:[%s8090_s3 + $0x3a0] ss:$16 sps:$4 sm:$0xff]  }
 0x3ba   : > { %5214 = vmatpush1.bf16.msra.mxu0 %v7119_v24  ;;  %5378 = vmatpush1.bf16.msra.mxu1 %v7120_v25  ;;  %v7210_v24 = vld [vmem:[%s8090_s3 + $0x3a8] ss:$16 sps:$4 sm:$0xff]   ;;  %v7215_v25 = vld [vmem:[%s8090_s3 + $0x3c4] ss:$16 sps:$4 sm:$0xff]  }
 0x3bb   : > { %5215 = vmatprep.subr.bf16.mxu0 %v7121_v26  ;;  %5379 = vmatprep.subr.bf16.mxu1 %v7123_v27  ;;  %v7218_v26 = vld [vmem:[%s8090_s3 + $0x3cc] ss:$16 sps:$4 sm:$0xff]   ;;  %v7213_v27 = vld [vmem:[%s8090_s3 + $0x3c0] ss:$16 sps:$4 sm:$0xff]  }
 0x3be   : > { %5216 = vmatpush1.bf16.msra.mxu0 %v7125_v28  ;;  %5380 = vmatpush1.bf16.msra.mxu1 %v7126_v44  ;;  %v7216_v28 = vld [vmem:[%s8090_s3 + $0x3c8] ss:$16 sps:$4 sm:$0xff]   ;;  %v7221_v44 = vld [vmem:[%s8090_s3 + $0x3e4] ss:$16 sps:$4 sm:$0xff]  }
 0x3bf   : > { %5226 = vmatprep.subr.bf16.mxu0 %v7131_v29  ;;  %5390 = vmatprep.subr.bf16.mxu1 %v7134_v22  ;;  %v7224_v29 = vld [vmem:[%s8090_s3 + $0x3ec] ss:$16 sps:$4 sm:$0xff]   ;;  %v7219_v22 = vld [vmem:[%s8090_s3 + $0x3e0] ss:$16 sps:$4 sm:$0xff]  }
 0x3c1   : > { %5218 = vmatmul.mubr.bf16.vlgmr.msra.gmra.mrb[0].mxu0 %v6458_v23  ;;  %5382 = vmatmul.mubr.bf16.vlgmr.msra.gmra.mrb[0].mxu1 %v6458_v23  ;;  %v7222_v23 = vld [vmem:[%s8090_s3 + $0x3e8] ss:$16 sps:$4 sm:$0xff]  }
 0x3c2   : > { %5227 = vmatpush1.bf16.msra.mxu0 %v7129_v30  ;;  %5391 = vmatpush1.bf16.msra.mxu1 %v7132_v31  ;;  %v7229_v30 = vld [vmem:[%s8090_s3 + $0x404] ss:$16 sps:$4 sm:$0xff]   ;;  %v7232_v31 = vld [vmem:[%s8090_s3 + $0x40c] ss:$16 sps:$4 sm:$0xff]  }
 0x3c3   : > { %5228 = vmatprep.subr.bf16.mxu0 %v7137_v32  ;;  %5392 = vmatprep.subr.bf16.mxu1 %v7140_v34  ;;  %v6460_v32 = vcombine.low %v8249_v56, %v8249_v56  ;;  %v7227_v34 = vld [vmem:[%s8090_s3 + $0x400] ss:$16 sps:$4 sm:$0xff]   ;;  %v7262_v56 = vld [vmem:[%s8090_s3 + $0x4ac] ss:$16 sps:$4 sm:$0xff]  }
 0x3c4   : > { %5258 = vmatprep.mubr.bf16.mxu0 %v6461_v57  ;;  %5422 = vmatprep.mubr.bf16.mxu1 %v6461_v57  ;;  %v7257_v57 = vld [vmem:[%s8090_s3 + $0x4a0] ss:$16 sps:$4 sm:$0xff]  }
 0x3c6   : > { %5229 = vmatpush1.bf16.msra.mxu0 %v7135_v36  ;;  %5393 = vmatpush1.bf16.msra.mxu1 %v7138_v48  ;;  %v7230_v36 = vld [vmem:[%s8090_s3 + $0x408] ss:$16 sps:$4 sm:$0xff]   ;;  %v7235_v48 = vld [vmem:[%s8090_s3 + $0x424] ss:$16 sps:$4 sm:$0xff]  }
 0x3c7   : > { %5230 = vmatprep.subr.bf16.mxu0 %v7143_v37  ;;  %5394 = vmatprep.subr.bf16.mxu1 %v7146_v38  ;;  %v8298_v37 = vld [vmem:[#allocation2 + $0x10] sm:$0xff] }
 0x3c8   : > { %v7238_v38 = vld [vmem:[%s8090_s3 + $0x42c] ss:$16 sps:$4 sm:$0xff]  }
 0x3ca   : > { %5231 = vmatpush1.bf16.msra.mxu0 %v7141_v39  ;;  %5395 = vmatpush1.bf16.msra.mxu1 %v7144_v33  ;;  %v6463_v39 = vcombine.high %v8298_v37, %v8298_v37  ;;  %v7233_v33 = vld [vmem:[%s8090_s3 + $0x420] ss:$16 sps:$4 sm:$0xff]  }
 0x3cb   : > { %5232 = vmatprep.subr.bf16.mxu0 %v7149_v40  ;;  %5396 = vmatprep.subr.bf16.mxu1 %v7152_v41  ;;  %v7236_v40 = vld [vmem:[%s8090_s3 + $0x428] ss:$16 sps:$4 sm:$0xff]   ;;  %v7241_v41 = vld [vmem:[%s8090_s3 + $0x444] ss:$16 sps:$4 sm:$0xff]  }
 0x3ce   : > { %5233 = vmatpush1.bf16.msra.mxu0 %v7147_v42  ;;  %5397 = vmatpush1.bf16.msra.mxu1 %v7150_v43  ;;  %v7244_v42 = vld [vmem:[%s8090_s3 + $0x44c] ss:$16 sps:$4 sm:$0xff]   ;;  %v7239_v43 = vld [vmem:[%s8090_s3 + $0x440] ss:$16 sps:$4 sm:$0xff]  }
 0x3cf   : > { %5234 = vmatprep.subr.bf16.mxu0 %v7155_v45  ;;  %5398 = vmatprep.subr.bf16.mxu1 %v7158_v46  ;;  %v7242_v45 = vld [vmem:[%s8090_s3 + $0x448] ss:$16 sps:$4 sm:$0xff]   ;;  %v7247_v46 = vld [vmem:[%s8090_s3 + $0x464] ss:$16 sps:$4 sm:$0xff]  }
 0x3d2   : > { %5235 = vmatpush1.bf16.msra.mxu0 %v7153_v47  ;;  %5399 = vmatpush1.bf16.msra.mxu1 %v7156_v49  ;;  %v7250_v47 = vld [vmem:[%s8090_s3 + $0x46c] ss:$16 sps:$4 sm:$0xff]   ;;  %v7245_v49 = vld [vmem:[%s8090_s3 + $0x460] ss:$16 sps:$4 sm:$0xff]  }
 0x3d3   : > { %5236 = vmatprep.subr.bf16.mxu0 %v7161_v50  ;;  %5400 = vmatprep.subr.bf16.mxu1 %v7164_v51  ;;  %v7248_v50 = vld [vmem:[%s8090_s3 + $0x468] ss:$16 sps:$4 sm:$0xff]   ;;  %v7253_v51 = vld [vmem:[%s8090_s3 + $0x484] ss:$16 sps:$4 sm:$0xff]  }
 0x3d6   : > { %5237 = vmatpush1.bf16.msra.mxu0 %v7159_v52  ;;  %5401 = vmatpush1.bf16.msra.mxu1 %v7162_v53  ;;  %v7256_v52 = vld [vmem:[%s8090_s3 + $0x48c] ss:$16 sps:$4 sm:$0xff]   ;;  %v7251_v53 = vld [vmem:[%s8090_s3 + $0x480] ss:$16 sps:$4 sm:$0xff]  }
 0x3d7   : > { %5238 = vmatprep.subr.bf16.mxu0 %v7167_v54  ;;  %5402 = vmatprep.subr.bf16.mxu1 %v7170_v55  ;;  %v7254_v54 = vld [vmem:[%s8090_s3 + $0x488] ss:$16 sps:$4 sm:$0xff]   ;;  %v7259_v55 = vld [vmem:[%s8090_s3 + $0x4a4] ss:$16 sps:$4 sm:$0xff]  }
 0x3da   : > { %5239 = vmatpush1.bf16.msra.mxu0 %v7165_v59  ;;  %5403 = vmatpush1.bf16.msra.mxu1 %v7168_v60  ;;  %v7260_v59 = vld [vmem:[%s8090_s3 + $0x4a8] ss:$16 sps:$4 sm:$0xff]   ;;  %v7265_v60 = vld [vmem:[%s8090_s3 + $0x4c4] ss:$16 sps:$4 sm:$0xff]  }
 0x3db   : > { %5240 = vmatprep.subr.bf16.mxu0 %v7173_v61  ;;  %5404 = vmatprep.subr.bf16.mxu1 %v7176_v62  ;;  %v7268_v61 = vld [vmem:[%s8090_s3 + $0x4cc] ss:$16 sps:$4 sm:$0xff]   ;;  %v7263_v62 = vld [vmem:[%s8090_s3 + $0x4c0] ss:$16 sps:$4 sm:$0xff]  }
 0x3de   : > { %5241 = vmatpush1.bf16.msra.mxu0 %v7171_v63  ;;  %5405 = vmatpush1.bf16.msra.mxu1 %v7174_v0  ;;  %v7266_v63 = vld [vmem:[%s8090_s3 + $0x4c8] ss:$16 sps:$4 sm:$0xff]   ;;  %v7271_v0 = vld [vmem:[%s8090_s3 + $0x4e4] ss:$16 sps:$4 sm:$0xff]  }
 0x3df   : > { %5242 = vmatprep.subr.bf16.mxu0 %v7179_v1  ;;  %5406 = vmatprep.subr.bf16.mxu1 %v7182_v2  ;;  %v7274_v1 = vld [vmem:[%s8090_s3 + $0x4ec] ss:$16 sps:$4 sm:$0xff]   ;;  %v7269_v2 = vld [vmem:[%s8090_s3 + $0x4e0] ss:$16 sps:$4 sm:$0xff]  }
 0x3e2   : > { %5243 = vmatpush1.bf16.msra.mxu0 %v7177_v3  ;;  %5407 = vmatpush1.bf16.msra.mxu1 %v7180_v4  ;;  %v7272_v3 = vld [vmem:[%s8090_s3 + $0x4e8] ss:$16 sps:$4 sm:$0xff]   ;;  %v7277_v4 = vld [vmem:[%s8090_s3 + $0x504] ss:$16 sps:$4 sm:$0xff]  }
 0x3e3   : > { %5244 = vmatprep.subr.bf16.mxu0 %v7185_v5  ;;  %5408 = vmatprep.subr.bf16.mxu1 %v7188_v6  ;;  %v7280_v5 = vld [vmem:[%s8090_s3 + $0x50c] ss:$16 sps:$4 sm:$0xff]   ;;  %v7275_v6 = vld [vmem:[%s8090_s3 + $0x500] ss:$16 sps:$4 sm:$0xff]  }
 0x3e6   : > { %5245 = vmatpush1.bf16.msra.mxu0 %v7183_v7  ;;  %5409 = vmatpush1.bf16.msra.mxu1 %v7186_v8  ;;  %v7278_v7 = vld [vmem:[%s8090_s3 + $0x508] ss:$16 sps:$4 sm:$0xff]   ;;  %v7283_v8 = vld [vmem:[%s8090_s3 + $0x524] ss:$16 sps:$4 sm:$0xff]  }
 0x3e7   : > { %5246 = vmatprep.subr.bf16.mxu0 %v7191_v9  ;;  %5410 = vmatprep.subr.bf16.mxu1 %v7194_v10  ;;  %v7286_v9 = vld [vmem:[%s8090_s3 + $0x52c] ss:$16 sps:$4 sm:$0xff]   ;;  %v7281_v10 = vld [vmem:[%s8090_s3 + $0x520] ss:$16 sps:$4 sm:$0xff]  }
 0x3ea   : > { %5247 = vmatpush1.bf16.msra.mxu0 %v7189_v11  ;;  %5411 = vmatpush1.bf16.msra.mxu1 %v7192_v12  ;;  %v7284_v11 = vld [vmem:[%s8090_s3 + $0x528] ss:$16 sps:$4 sm:$0xff]   ;;  %v7289_v12 = vld [vmem:[%s8090_s3 + $0x544] ss:$16 sps:$4 sm:$0xff]  }
 0x3eb   : > { %5248 = vmatprep.subr.bf16.mxu0 %v7197_v14  ;;  %5412 = vmatprep.subr.bf16.mxu1 %v7200_v15  ;;  %v7292_v14 = vld [vmem:[%s8090_s3 + $0x54c] ss:$16 sps:$4 sm:$0xff]   ;;  %v7287_v15 = vld [vmem:[%s8090_s3 + $0x540] ss:$16 sps:$4 sm:$0xff]  }
 0x3ee   : > { %5249 = vmatpush1.bf16.msra.mxu0 %v7195_v58  ;;  %5413 = vmatpush1.bf16.msra.mxu1 %v7198_v16  ;;  %v7290_v58 = vld [vmem:[%s8090_s3 + $0x548] ss:$16 sps:$4 sm:$0xff]   ;;  %v7295_v16 = vld [vmem:[%s8090_s3 + $0x564] ss:$16 sps:$4 sm:$0xff]  }
 0x3ef   : > { %5250 = vmatprep.subr.bf16.mxu0 %v7203_v17  ;;  %5414 = vmatprep.subr.bf16.mxu1 %v7206_v18  ;;  %v7298_v17 = vld [vmem:[%s8090_s3 + $0x56c] ss:$16 sps:$4 sm:$0xff]   ;;  %v7293_v18 = vld [vmem:[%s8090_s3 + $0x560] ss:$16 sps:$4 sm:$0xff]  }
 0x3f2   : > { %5251 = vmatpush1.bf16.msra.mxu0 %v7201_v13  ;;  %5415 = vmatpush1.bf16.msra.mxu1 %v7204_v19  ;;  %v7296_v13 = vld [vmem:[%s8090_s3 + $0x568] ss:$16 sps:$4 sm:$0xff]   ;;  %v7301_v19 = vld [vmem:[%s8090_s3 + $0x584] ss:$16 sps:$4 sm:$0xff]  }
 0x3f3   : > { %5252 = vmatprep.subr.bf16.mxu0 %v7209_v20  ;;  %5416 = vmatprep.subr.bf16.mxu1 %v7212_v21  ;;  %v7304_v20 = vld [vmem:[%s8090_s3 + $0x58c] ss:$16 sps:$4 sm:$0xff]   ;;  %v7299_v21 = vld [vmem:[%s8090_s3 + $0x580] ss:$16 sps:$4 sm:$0xff]  }
 0x3f6   : > { %5253 = vmatpush1.bf16.msra.mxu0 %v7207_v35  ;;  %5417 = vmatpush1.bf16.msra.mxu1 %v7210_v24  ;;  %v7302_v35 = vld [vmem:[%s8090_s3 + $0x588] ss:$16 sps:$4 sm:$0xff]   ;;  %v7307_v24 = vld [vmem:[%s8090_s3 + $0x5a4] ss:$16 sps:$4 sm:$0xff]  }
 0x3f7   : > { %5254 = vmatprep.subr.bf16.mxu0 %v7215_v25  ;;  %5418 = vmatprep.subr.bf16.mxu1 %v7218_v26  ;;  %v7310_v25 = vld [vmem:[%s8090_s3 + $0x5ac] ss:$16 sps:$4 sm:$0xff]   ;;  %v7305_v26 = vld [vmem:[%s8090_s3 + $0x5a0] ss:$16 sps:$4 sm:$0xff]  }
 0x3fa   : > { %5255 = vmatpush1.bf16.msra.mxu0 %v7213_v27  ;;  %5419 = vmatpush1.bf16.msra.mxu1 %v7216_v28  ;;  %v7308_v27 = vld [vmem:[%s8090_s3 + $0x5a8] ss:$16 sps:$4 sm:$0xff]   ;;  %v7313_v28 = vld [vmem:[%s8090_s3 + $0x5c4] ss:$16 sps:$4 sm:$0xff]  }
 0x3fb   : > { %5256 = vmatprep.subr.bf16.mxu0 %v7221_v44  ;;  %5420 = vmatprep.subr.bf16.mxu1 %v7224_v29  ;;  %v7316_v44 = vld [vmem:[%s8090_s3 + $0x5cc] ss:$16 sps:$4 sm:$0xff]   ;;  %v7311_v29 = vld [vmem:[%s8090_s3 + $0x5c0] ss:$16 sps:$4 sm:$0xff]  }
 0x3fe   : > { %5257 = vmatpush1.bf16.msra.mxu0 %v7219_v22  ;;  %5421 = vmatpush1.bf16.msra.mxu1 %v7222_v23  ;;  %v7314_v22 = vld [vmem:[%s8090_s3 + $0x5c8] ss:$16 sps:$4 sm:$0xff]   ;;  %v7319_v23 = vld [vmem:[%s8090_s3 + $0x5e4] ss:$16 sps:$4 sm:$0xff]  }
 0x3ff   : > { %5267 = vmatprep.subr.bf16.mxu0 %v7229_v30  ;;  %5431 = vmatprep.subr.bf16.mxu1 %v7232_v31  ;;  %v7322_v30 = vld [vmem:[%s8090_s3 + $0x5ec] ss:$16 sps:$4 sm:$0xff]   ;;  %v7317_v31 = vld [vmem:[%s8090_s3 + $0x5e0] ss:$16 sps:$4 sm:$0xff]  }
 0x401   : > { %5259 = vmatmul.mubr.bf16.vlgmr.msra.gmra.mrb[0].mxu0 %v6460_v32  ;;  %5423 = vmatmul.mubr.bf16.vlgmr.msra.gmra.mrb[0].mxu1 %v6460_v32  ;;  %v7320_v32 = vld [vmem:[%s8090_s3 + $0x5e8] ss:$16 sps:$4 sm:$0xff]  }
 0x402   : > { %5268 = vmatpush1.bf16.msra.mxu0 %v7227_v34  ;;  %5432 = vmatpush1.bf16.msra.mxu1 %v7230_v36  ;;  %v7327_v34 = vld [vmem:[%s8090_s3 + $0x604] ss:$16 sps:$4 sm:$0xff]   ;;  %v7330_v36 = vld [vmem:[%s8090_s3 + $0x60c] ss:$16 sps:$4 sm:$0xff]  }
 0x403   : > { %5269 = vmatprep.subr.bf16.mxu0 %v7235_v48  ;;  %5433 = vmatprep.subr.bf16.mxu1 %v7238_v38  ;;  %v7325_v48 = vld [vmem:[%s8090_s3 + $0x600] ss:$16 sps:$4 sm:$0xff]   ;;  %v7328_v38 = vld [vmem:[%s8090_s3 + $0x608] ss:$16 sps:$4 sm:$0xff]  }
 0x404   : > { %5299 = vmatprep.mubr.bf16.mxu0 %v6463_v39  ;;  %5463 = vmatprep.mubr.bf16.mxu1 %v6463_v39  ;;  %v6462_v39 = vcombine.low %v8298_v37, %v8298_v37  ;;  %v7339_v37 = vld [vmem:[%s8090_s3 + $0x644] ss:$16 sps:$4 sm:$0xff]  }
 0x406   : > { %5270 = vmatpush1.bf16.msra.mxu0 %v7233_v33  ;;  %5434 = vmatpush1.bf16.msra.mxu1 %v7236_v40  ;;  %v8367_v33 = vld [vmem:[#allocation2 + $0x18] sm:$0xff] }
 0x407   : > { %5271 = vmatprep.subr.bf16.mxu0 %v7241_v41  ;;  %5435 = vmatprep.subr.bf16.mxu1 %v7244_v42  ;;  %v7333_v40 = vld [vmem:[%s8090_s3 + $0x624] ss:$16 sps:$4 sm:$0xff]   ;;  %v7336_v41 = vld [vmem:[%s8090_s3 + $0x62c] ss:$16 sps:$4 sm:$0xff]   ;;  %v7331_v42 = vld [vmem:[%s8090_s3 + $0x620] ss:$16 sps:$4 sm:$0xff]  }
 0x40a   : > { %5272 = vmatpush1.bf16.msra.mxu0 %v7239_v43  ;;  %5436 = vmatpush1.bf16.msra.mxu1 %v7242_v45  ;;  %v7334_v43 = vld [vmem:[%s8090_s3 + $0x628] ss:$16 sps:$4 sm:$0xff]   ;;  %v6465_v45 = vcombine.high %v8367_v33, %v8367_v33 }
 0x40b   : > { %5273 = vmatprep.subr.bf16.mxu0 %v7247_v46  ;;  %5437 = vmatprep.subr.bf16.mxu1 %v7250_v47  ;;  %v7342_v46 = vld [vmem:[%s8090_s3 + $0x64c] ss:$16 sps:$4 sm:$0xff]   ;;  %v7337_v47 = vld [vmem:[%s8090_s3 + $0x640] ss:$16 sps:$4 sm:$0xff]  }
 0x40e   : > { %5274 = vmatpush1.bf16.msra.mxu0 %v7245_v49  ;;  %5438 = vmatpush1.bf16.msra.mxu1 %v7248_v50  ;;  %v7340_v49 = vld [vmem:[%s8090_s3 + $0x648] ss:$16 sps:$4 sm:$0xff]   ;;  %v7345_v50 = vld [vmem:[%s8090_s3 + $0x664] ss:$16 sps:$4 sm:$0xff]  }
 0x40f   : > { %5275 = vmatprep.subr.bf16.mxu0 %v7253_v51  ;;  %5439 = vmatprep.subr.bf16.mxu1 %v7256_v52  ;;  %v7348_v51 = vld [vmem:[%s8090_s3 + $0x66c] ss:$16 sps:$4 sm:$0xff]   ;;  %v7343_v52 = vld [vmem:[%s8090_s3 + $0x660] ss:$16 sps:$4 sm:$0xff]  }
 0x412   : > { %5276 = vmatpush1.bf16.msra.mxu0 %v7251_v53  ;;  %5440 = vmatpush1.bf16.msra.mxu1 %v7254_v54  ;;  %v7346_v53 = vld [vmem:[%s8090_s3 + $0x668] ss:$16 sps:$4 sm:$0xff]   ;;  %v7351_v54 = vld [vmem:[%s8090_s3 + $0x684] ss:$16 sps:$4 sm:$0xff]  }
 0x413   : > { %5277 = vmatprep.subr.bf16.mxu0 %v7259_v55  ;;  %5441 = vmatprep.subr.bf16.mxu1 %v7262_v56  ;;  %v7354_v55 = vld [vmem:[%s8090_s3 + $0x68c] ss:$16 sps:$4 sm:$0xff]   ;;  %v7349_v56 = vld [vmem:[%s8090_s3 + $0x680] ss:$16 sps:$4 sm:$0xff]  }
 0x416   : > { %5278 = vmatpush1.bf16.msra.mxu0 %v7257_v57  ;;  %5442 = vmatpush1.bf16.msra.mxu1 %v7260_v59  ;;  %v7352_v57 = vld [vmem:[%s8090_s3 + $0x688] ss:$16 sps:$4 sm:$0xff]   ;;  %v7357_v59 = vld [vmem:[%s8090_s3 + $0x6a4] ss:$16 sps:$4 sm:$0xff]  }
 0x417   : > { %5279 = vmatprep.subr.bf16.mxu0 %v7265_v60  ;;  %5443 = vmatprep.subr.bf16.mxu1 %v7268_v61  ;;  %v7360_v60 = vld [vmem:[%s8090_s3 + $0x6ac] ss:$16 sps:$4 sm:$0xff]   ;;  %v7355_v61 = vld [vmem:[%s8090_s3 + $0x6a0] ss:$16 sps:$4 sm:$0xff]  }
 0x41a   : > { %5280 = vmatpush1.bf16.msra.mxu0 %v7263_v62  ;;  %5444 = vmatpush1.bf16.msra.mxu1 %v7266_v63  ;;  %v7358_v62 = vld [vmem:[%s8090_s3 + $0x6a8] ss:$16 sps:$4 sm:$0xff]   ;;  %v7363_v63 = vld [vmem:[%s8090_s3 + $0x6c4] ss:$16 sps:$4 sm:$0xff]  }
 0x41b   : > { %5281 = vmatprep.subr.bf16.mxu0 %v7271_v0  ;;  %5445 = vmatprep.subr.bf16.mxu1 %v7274_v1  ;;  %v7366_v0 = vld [vmem:[%s8090_s3 + $0x6cc] ss:$16 sps:$4 sm:$0xff]   ;;  %v7361_v1 = vld [vmem:[%s8090_s3 + $0x6c0] ss:$16 sps:$4 sm:$0xff]  }
 0x41e   : > { %5282 = vmatpush1.bf16.msra.mxu0 %v7269_v2  ;;  %5446 = vmatpush1.bf16.msra.mxu1 %v7272_v3  ;;  %v7364_v2 = vld [vmem:[%s8090_s3 + $0x6c8] ss:$16 sps:$4 sm:$0xff]   ;;  %v7369_v3 = vld [vmem:[%s8090_s3 + $0x6e4] ss:$16 sps:$4 sm:$0xff]  }
 0x41f   : > { %5283 = vmatprep.subr.bf16.mxu0 %v7277_v4  ;;  %5447 = vmatprep.subr.bf16.mxu1 %v7280_v5  ;;  %v7372_v4 = vld [vmem:[%s8090_s3 + $0x6ec] ss:$16 sps:$4 sm:$0xff]   ;;  %v7367_v5 = vld [vmem:[%s8090_s3 + $0x6e0] ss:$16 sps:$4 sm:$0xff]  }
 0x422   : > { %5284 = vmatpush1.bf16.msra.mxu0 %v7275_v6  ;;  %5448 = vmatpush1.bf16.msra.mxu1 %v7278_v7  ;;  %v7370_v6 = vld [vmem:[%s8090_s3 + $0x6e8] ss:$16 sps:$4 sm:$0xff]   ;;  %v7375_v7 = vld [vmem:[%s8090_s3 + $0x704] ss:$16 sps:$4 sm:$0xff]  }
 0x423   : > { %5285 = vmatprep.subr.bf16.mxu0 %v7283_v8  ;;  %5449 = vmatprep.subr.bf16.mxu1 %v7286_v9  ;;  %v7378_v8 = vld [vmem:[%s8090_s3 + $0x70c] ss:$16 sps:$4 sm:$0xff]   ;;  %v7373_v9 = vld [vmem:[%s8090_s3 + $0x700] ss:$16 sps:$4 sm:$0xff]  }
 0x426   : > { %5286 = vmatpush1.bf16.msra.mxu0 %v7281_v10  ;;  %5450 = vmatpush1.bf16.msra.mxu1 %v7284_v11  ;;  %v7376_v10 = vld [vmem:[%s8090_s3 + $0x708] ss:$16 sps:$4 sm:$0xff]   ;;  %v7381_v11 = vld [vmem:[%s8090_s3 + $0x724] ss:$16 sps:$4 sm:$0xff]  }
 0x427   : > { %5287 = vmatprep.subr.bf16.mxu0 %v7289_v12  ;;  %5451 = vmatprep.subr.bf16.mxu1 %v7292_v14  ;;  %v7384_v12 = vld [vmem:[%s8090_s3 + $0x72c] ss:$16 sps:$4 sm:$0xff]   ;;  %v7379_v14 = vld [vmem:[%s8090_s3 + $0x720] ss:$16 sps:$4 sm:$0xff]  }
 0x42a   : > { %5288 = vmatpush1.bf16.msra.mxu0 %v7287_v15  ;;  %5452 = vmatpush1.bf16.msra.mxu1 %v7290_v58  ;;  %v7382_v15 = vld [vmem:[%s8090_s3 + $0x728] ss:$16 sps:$4 sm:$0xff]   ;;  %v7387_v58 = vld [vmem:[%s8090_s3 + $0x744] ss:$16 sps:$4 sm:$0xff]  }
 0x42b   : > { %5289 = vmatprep.subr.bf16.mxu0 %v7295_v16  ;;  %5453 = vmatprep.subr.bf16.mxu1 %v7298_v17  ;;  %v7390_v16 = vld [vmem:[%s8090_s3 + $0x74c] ss:$16 sps:$4 sm:$0xff]   ;;  %v7385_v17 = vld [vmem:[%s8090_s3 + $0x740] ss:$16 sps:$4 sm:$0xff]  }
 0x42e   : > { %5290 = vmatpush1.bf16.msra.mxu0 %v7293_v18  ;;  %5454 = vmatpush1.bf16.msra.mxu1 %v7296_v13  ;;  %v7388_v18 = vld [vmem:[%s8090_s3 + $0x748] ss:$16 sps:$4 sm:$0xff]   ;;  %v7393_v13 = vld [vmem:[%s8090_s3 + $0x764] ss:$16 sps:$4 sm:$0xff]  }
 0x42f   : > { %5291 = vmatprep.subr.bf16.mxu0 %v7301_v19  ;;  %5455 = vmatprep.subr.bf16.mxu1 %v7304_v20  ;;  %v7396_v19 = vld [vmem:[%s8090_s3 + $0x76c] ss:$16 sps:$4 sm:$0xff]   ;;  %v7391_v20 = vld [vmem:[%s8090_s3 + $0x760] ss:$16 sps:$4 sm:$0xff]  }
 0x432   : > { %5292 = vmatpush1.bf16.msra.mxu0 %v7299_v21  ;;  %5456 = vmatpush1.bf16.msra.mxu1 %v7302_v35  ;;  %v7394_v21 = vld [vmem:[%s8090_s3 + $0x768] ss:$16 sps:$4 sm:$0xff]   ;;  %v7399_v35 = vld [vmem:[%s8090_s3 + $0x784] ss:$16 sps:$4 sm:$0xff]  }
 0x433   : > { %5293 = vmatprep.subr.bf16.mxu0 %v7307_v24  ;;  %5457 = vmatprep.subr.bf16.mxu1 %v7310_v25  ;;  %v7402_v24 = vld [vmem:[%s8090_s3 + $0x78c] ss:$16 sps:$4 sm:$0xff]   ;;  %v7397_v25 = vld [vmem:[%s8090_s3 + $0x780] ss:$16 sps:$4 sm:$0xff]  }
 0x436   : > { %5294 = vmatpush1.bf16.msra.mxu0 %v7305_v26  ;;  %5458 = vmatpush1.bf16.msra.mxu1 %v7308_v27  ;;  %v7400_v26 = vld [vmem:[%s8090_s3 + $0x788] ss:$16 sps:$4 sm:$0xff]   ;;  %v7405_v27 = vld [vmem:[%s8090_s3 + $0x7a4] ss:$16 sps:$4 sm:$0xff]  }
 0x437   : > { %5295 = vmatprep.subr.bf16.mxu0 %v7313_v28  ;;  %5459 = vmatprep.subr.bf16.mxu1 %v7316_v44  ;;  %v7408_v28 = vld [vmem:[%s8090_s3 + $0x7ac] ss:$16 sps:$4 sm:$0xff]   ;;  %v7403_v44 = vld [vmem:[%s8090_s3 + $0x7a0] ss:$16 sps:$4 sm:$0xff]  }
 0x43a   : > { %5296 = vmatpush1.bf16.msra.mxu0 %v7311_v29  ;;  %5460 = vmatpush1.bf16.msra.mxu1 %v7314_v22  ;;  %v7406_v29 = vld [vmem:[%s8090_s3 + $0x7a8] ss:$16 sps:$4 sm:$0xff]   ;;  %v7411_v22 = vld [vmem:[%s8090_s3 + $0x7c4] ss:$16 sps:$4 sm:$0xff]  }
 0x43b   : > { %5297 = vmatprep.subr.bf16.mxu0 %v7319_v23  ;;  %5461 = vmatprep.subr.bf16.mxu1 %v7322_v30  ;;  %v7414_v23 = vld [vmem:[%s8090_s3 + $0x7cc] ss:$16 sps:$4 sm:$0xff]   ;;  %v7409_v30 = vld [vmem:[%s8090_s3 + $0x7c0] ss:$16 sps:$4 sm:$0xff]  }
 0x43e   : > { %5298 = vmatpush1.bf16.msra.mxu0 %v7317_v31  ;;  %5462 = vmatpush1.bf16.msra.mxu1 %v7320_v32  ;;  %v7412_v31 = vld [vmem:[%s8090_s3 + $0x7c8] ss:$16 sps:$4 sm:$0xff]   ;;  %v7417_v32 = vld [vmem:[%s8090_s3 + $0x7e4] ss:$16 sps:$4 sm:$0xff]  }
 0x43f   : > { %5308 = vmatprep.subr.bf16.mxu0 %v7327_v34  ;;  %5472 = vmatprep.subr.bf16.mxu1 %v7330_v36  ;;  %v7420_v34 = vld [vmem:[%s8090_s3 + $0x7ec] ss:$16 sps:$4 sm:$0xff]   ;;  %v7415_v36 = vld [vmem:[%s8090_s3 + $0x7e0] ss:$16 sps:$4 sm:$0xff]  }
 0x441   : > { %5300 = vmatmul.mubr.bf16.vlgmr.msra.gmra.mrb[0].mxu0 %v6462_v39  ;;  %5464 = vmatmul.mubr.bf16.vlgmr.msra.gmra.mrb[0].mxu1 %v6462_v39  ;;  %v7424_v39 = vld [vmem:[%s8098_s22 + $0xc0] sm:$0xff]  }
 0x442   : > { %5309 = vmatpush1.bf16.msra.mxu0 %v7325_v48  ;;  %5473 = vmatpush1.bf16.msra.mxu1 %v7328_v38  ;;  %v7418_v48 = vld [vmem:[%s8090_s3 + $0x7e8] ss:$16 sps:$4 sm:$0xff]  }
 0x443   : > { %5310 = vmatprep.subr.bf16.mxu0 %v7333_v40  ;;  %5474 = vmatprep.subr.bf16.mxu1 %v7336_v41  ;;  %v7423_v38 = vld [vmem:[%s8098_s22 + $0x40] sm:$0xff]   ;;  %v6464_v40 = vcombine.low %v8367_v33, %v8367_v33  ;;  %v7430_v33 = vld [vmem:[%s8098_s22 + $0x88] sm:$0xff]  }
 0x444   : > { %5340 = vmatprep.mubr.bf16.mxu0 %v6465_v45  ;;  %5504 = vmatprep.mubr.bf16.mxu1 %v6465_v45  ;;  %v7425_v41 = vld [vmem:[%s8098_s22] sm:$0xff]   ;;  %v7428_v45 = vld [vmem:[%s8098_s22 + $0xc8] sm:$0xff]  }
 0x446   : > { %5311 = vmatpush1.bf16.msra.mxu0 %v7331_v42  ;;  %5475 = vmatpush1.bf16.msra.mxu1 %v7334_v43  ;;  %v7426_v42 = vld [vmem:[%s8098_s22 + $0x80] sm:$0xff]   ;;  %v7427_v43 = vld [vmem:[%s8098_s22 + $0x48] sm:$0xff]  }
 0x447   : > { %5312 = vmatprep.subr.bf16.mxu0 %v7339_v37  ;;  %5476 = vmatprep.subr.bf16.mxu1 %v7342_v46  ;;  %v7429_v37 = vld [vmem:[%s8098_s22 + $0x8] sm:$0xff]   ;;  %v7431_v46 = vld [vmem:[%s8098_s22 + $0x50] sm:$0xff]  }
 0x44a   : > { %5313 = vmatpush1.bf16.msra.mxu0 %v7337_v47  ;;  %5477 = vmatpush1.bf16.msra.mxu1 %v7340_v49  ;;  %v7432_v47 = vld [vmem:[%s8098_s22 + $0xd0] sm:$0xff]  }
 0x44b   : > { %5314 = vmatprep.subr.bf16.mxu0 %v7345_v50  ;;  %5478 = vmatprep.subr.bf16.mxu1 %v7348_v51  ;;  %v7433_v49 = vld [vmem:[%s8098_s22 + $0x10] sm:$0xff]   ;;  %v7435_v51 = vld [vmem:[%s8098_s22 + $0x58] sm:$0xff]  }
 0x44c   : > { %v7434_v50 = vld [vmem:[%s8098_s22 + $0x90] sm:$0xff]  }
 0x44e   : > { %5315 = vmatpush1.bf16.msra.mxu0 %v7343_v52  ;;  %5479 = vmatpush1.bf16.msra.mxu1 %v7346_v53  ;;  %v7436_v52 = vld [vmem:[%s8098_s22 + $0xd8] sm:$0xff]  }
 0x44f   : > { %5316 = vmatprep.subr.bf16.mxu0 %v7351_v54  ;;  %5480 = vmatprep.subr.bf16.mxu1 %v7354_v55  ;;  %v7437_v53 = vld [vmem:[%s8098_s22 + $0x18] sm:$0xff]   ;;  %v7439_v55 = vld [vmem:[%s8098_s22 + $0x60] sm:$0xff]  }
 0x450   : > { %v7438_v54 = vld [vmem:[%s8098_s22 + $0x98] sm:$0xff]  }
 0x452   : > { %5317 = vmatpush1.bf16.msra.mxu0 %v7349_v56  ;;  %5481 = vmatpush1.bf16.msra.mxu1 %v7352_v57  ;;  %v7440_v56 = vld [vmem:[%s8098_s22 + $0xe0] sm:$0xff]  }
 0x453   : > { %5318 = vmatprep.subr.bf16.mxu0 %v7357_v59  ;;  %5482 = vmatprep.subr.bf16.mxu1 %v7360_v60  ;;  %v7441_v57 = vld [vmem:[%s8098_s22 + $0x20] sm:$0xff]   ;;  %v7443_v60 = vld [vmem:[%s8098_s22 + $0x68] sm:$0xff]  }
 0x454   : > { %v7442_v59 = vld [vmem:[%s8098_s22 + $0xa0] sm:$0xff]  }
 0x456   : > { %5319 = vmatpush1.bf16.msra.mxu0 %v7355_v61  ;;  %5483 = vmatpush1.bf16.msra.mxu1 %v7358_v62  ;;  %v7444_v61 = vld [vmem:[%s8098_s22 + $0xe8] sm:$0xff]  }
 0x457   : > { %5320 = vmatprep.subr.bf16.mxu0 %v7363_v63  ;;  %5484 = vmatprep.subr.bf16.mxu1 %v7366_v0  ;;  %v7445_v62 = vld [vmem:[%s8098_s22 + $0x28] sm:$0xff]   ;;  %v7447_v0 = vld [vmem:[%s8098_s22 + $0x70] sm:$0xff]  }
 0x458   : > { %v7446_v63 = vld [vmem:[%s8098_s22 + $0xa8] sm:$0xff]  }
 0x45a   : > { %5321 = vmatpush1.bf16.msra.mxu0 %v7361_v1  ;;  %5485 = vmatpush1.bf16.msra.mxu1 %v7364_v2  ;;  %v7448_v1 = vld [vmem:[%s8098_s22 + $0xf0] sm:$0xff]  }
 0x45b   : > { %5322 = vmatprep.subr.bf16.mxu0 %v7369_v3  ;;  %5486 = vmatprep.subr.bf16.mxu1 %v7372_v4  ;;  %v7449_v2 = vld [vmem:[%s8098_s22 + $0x30] sm:$0xff]   ;;  %v7451_v4 = vld [vmem:[%s8098_s22 + $0x78] sm:$0xff]  }
 0x45c   : > { %v7450_v3 = vld [vmem:[%s8098_s22 + $0xb0] sm:$0xff]  }
 0x45e   : > { %5323 = vmatpush1.bf16.msra.mxu0 %v7367_v5  ;;  %5487 = vmatpush1.bf16.msra.mxu1 %v7370_v6  ;;  %v7452_v5 = vld [vmem:[%s8098_s22 + $0xf8] sm:$0xff]  }
 0x45f   : > { %5324 = vmatprep.subr.bf16.mxu0 %v7375_v7  ;;  %5488 = vmatprep.subr.bf16.mxu1 %v7378_v8  ;;  %v7453_v6 = vld [vmem:[%s8098_s22 + $0x38] sm:$0xff]   ;;  %v3857_v8 = vlaneseq }
 0x460   : > { %v7454_v7 = vld [vmem:[%s8098_s22 + $0xb8] sm:$0xff]  }
 0x462   : > { %5325 = vmatpush1.bf16.msra.mxu0 %v7373_v9  ;;  %5489 = vmatpush1.bf16.msra.mxu1 %v7376_v10  ;;  %v3858_v9 = vshrl.u32 %v3857_v8, 7 }
 0x463   : > { %5326 = vmatprep.subr.bf16.mxu0 %v7381_v11  ;;  %5490 = vmatprep.subr.bf16.mxu1 %v7384_v12  ;;  %v3855_v12 = vld [vmem:[%s8096_s12] sm:$0xf] }
 0x464   : > { %v3859_v10 = vsub.s32 0, %v3858_v9  ;;  %v3867_v11 = vsub.s32 2, %v3858_v9 }
 0x466   : > { %5327 = vmatpush1.bf16.msra.mxu0 %v7379_v14  ;;  %5491 = vmatpush1.bf16.msra.mxu1 %v7382_v15  ;;  %v3863_v14 = vsub.s32 1, %v3858_v9  ;;  %v3871_v15 = vsub.s32 3, %v3858_v9 }
 0x467   : > { %5328 = vmatprep.subr.bf16.mxu0 %v7387_v58  ;;  %5492 = vmatprep.subr.bf16.mxu1 %v7390_v16  ;;  %v3860_v58 = vrot.slane %v3855_v12, %v3859_v10  ;;  %v3868_v16 = vrot.slane %v3855_v12, %v3867_v11 }
 0x46a   : > { %5329 = vmatpush1.bf16.msra.mxu0 %v7385_v17  ;;  %5493 = vmatpush1.bf16.msra.mxu1 %v7388_v18  ;;  %v3864_v17 = vrot.slane %v3855_v12, %v3863_v14  ;;  %v3872_v18 = vrot.slane %v3855_v12, %v3871_v15 }
 0x46b   : > { %5330 = vmatprep.subr.bf16.mxu0 %v7393_v13  ;;  %5494 = vmatprep.subr.bf16.mxu1 %v7396_v19 }
 0x46e   : > { %5331 = vmatpush1.bf16.msra.mxu0 %v7391_v20  ;;  %5495 = vmatpush1.bf16.msra.mxu1 %v7394_v21 }
 0x46f   : > { %5332 = vmatprep.subr.bf16.mxu0 %v7399_v35  ;;  %5496 = vmatprep.subr.bf16.mxu1 %v7402_v24 }
 0x472   : > { %5333 = vmatpush1.bf16.msra.mxu0 %v7397_v25  ;;  %5497 = vmatpush1.bf16.msra.mxu1 %v7400_v26 }
 0x473   : > { %5334 = vmatprep.subr.bf16.mxu0 %v7405_v27  ;;  %5498 = vmatprep.subr.bf16.mxu1 %v7408_v28 }
 0x476   : > { %5335 = vmatpush1.bf16.msra.mxu0 %v7403_v44  ;;  %5499 = vmatpush1.bf16.msra.mxu1 %v7406_v29 }
 0x477   : > { %5336 = vmatprep.subr.bf16.mxu0 %v7411_v22  ;;  %5500 = vmatprep.subr.bf16.mxu1 %v7414_v23 }
 0x47a   : > { %5337 = vmatpush1.bf16.msra.mxu0 %v7409_v30  ;;  %5501 = vmatpush1.bf16.msra.mxu1 %v7412_v31 }
 0x47b   : > { %5338 = vmatprep.subr.bf16.mxu0 %v7417_v32  ;;  %5502 = vmatprep.subr.bf16.mxu1 %v7420_v34 }
 0x47e   : > { %5339 = vmatpush1.bf16.msra.mxu0 %v7415_v36  ;;  %5503 = vmatpush1.bf16.msra.mxu1 %v7418_v48 }
 0x47f   : > { %6766 = vmatprep.subr.bf16.mxu0 %v7423_v38  ;;  %6788 = vmatprep.subr.bf16.mxu1 %v7424_v39 }
 0x481   : > { %5341 = vmatmul.mubr.bf16.vlgmr.msra.gmra.mrb[0].mxu0 %v6464_v40  ;;  %5505 = vmatmul.mubr.bf16.vlgmr.msra.gmra.mrb[0].mxu1 %v6464_v40 }
 0x482   : > { %6767 = vmatpush3.bf16.msra.mxu0 %v7425_v41  ;;  %6789 = vmatpush3.bf16.msra.mxu1 %v7426_v42 }
 0x483   : > { %6768 = vmatprep.subr.bf16.mxu0 %v7427_v43  ;;  %6790 = vmatprep.subr.bf16.mxu1 %v7428_v45 }
 0x486   : > { %6769 = vmatpush3.bf16.msra.mxu0 %v7429_v37  ;;  %6791 = vmatpush3.bf16.msra.mxu1 %v7430_v33  ;;  %v5517_v33 = vld [vmem:[#allocation3] sm:$0xff] }
 0x487   : > { %6770 = vmatprep.subr.bf16.mxu0 %v7431_v46  ;;  %6792 = vmatprep.subr.bf16.mxu1 %v7432_v47 }
 0x48a   : > { %6771 = vmatpush3.bf16.msra.mxu0 %v7433_v49  ;;  %6793 = vmatpush3.bf16.msra.mxu1 %v7434_v50 }
 0x48b   : > { %6772 = vmatprep.subr.bf16.mxu0 %v7435_v51  ;;  %6794 = vmatprep.subr.bf16.mxu1 %v7436_v52 }
 0x48e   : > { %6773 = vmatpush3.bf16.msra.mxu0 %v7437_v53  ;;  %6795 = vmatpush3.bf16.msra.mxu1 %v7438_v54 }
 0x48f   : > { %6774 = vmatprep.subr.bf16.mxu0 %v7439_v55  ;;  %6796 = vmatprep.subr.bf16.mxu1 %v7440_v56 }
 0x492   : > { %6775 = vmatpush3.bf16.msra.mxu0 %v7441_v57  ;;  %6797 = vmatpush3.bf16.msra.mxu1 %v7442_v59 }
 0x493   : > { %6776 = vmatprep.subr.bf16.mxu0 %v7443_v60  ;;  %6798 = vmatprep.subr.bf16.mxu1 %v7444_v61 }
 0x496   : > { %6777 = vmatpush3.bf16.msra.mxu0 %v7445_v62  ;;  %6799 = vmatpush3.bf16.msra.mxu1 %v7446_v63 }
 0x497   : > { %6778 = vmatprep.subr.bf16.mxu0 %v7447_v0  ;;  %6800 = vmatprep.subr.bf16.mxu1 %v7448_v1 }
 0x49a   : > { %6779 = vmatpush3.bf16.msra.mxu0 %v7449_v2  ;;  %6801 = vmatpush3.bf16.msra.mxu1 %v7450_v3 }
 0x49b   : > { %6780 = vmatprep.subr.bf16.mxu0 %v7451_v4  ;;  %6802 = vmatprep.subr.bf16.mxu1 %v7452_v5 }
 0x49e   : > { %6781 = vmatpush3.bf16.msra.mxu0 %v7453_v6  ;;  %6803 = vmatpush3.bf16.msra.mxu1 %v7454_v7 }
 0x554   : > { %v5342_v13 = vpop.f32.mrb[0].mxu0  ;;  %v5506_v19 = vpop.f32.mrb[0].mxu1 }
 0x555   : > { %v6866_v20 = vadd.f32 %v5342_v13, %v3860_v58  ;;  %v6868_v21 = vadd.f32 %v5506_v19, %v3868_v16  ;;  %v5344_v35 = vpop.f32.mrb[1].mxu0  ;;  %v5508_v24 = vpop.f32.mrb[1].mxu1 }
 0x556   : > { %v6867_v25 = vadd.f32 %v5344_v35, %v3864_v17  ;;  %v6869_v26 = vadd.f32 %v5508_v24, %v3872_v18  ;;  %v5346_v27 = vpop.f32.mrb[2].mxu0  ;;  %v5510_v28 = vpop.f32.mrb[2].mxu1 }
 0x557   : > { %v5513_v44 = vmax.f32 %v6866_v20, 0.0  ;;  %v5515_v29 = vmax.f32 %v6868_v21, 0.0  ;;  %v5347_v22 = vpop.f32.mrb[3].mxu0  ;;  %v5511_v23 = vpop.f32.mrb[3].mxu1 }
 0x558   : > { %v5514_v30 = vmax.f32 %v6867_v25, 0.0  ;;  %v5516_v31 = vmax.f32 %v6869_v26, 0.0 }
 0x559   : > { %v5518_v36 = vpack.c.bf16 %v5513_v44, %v5513_v44  ;;  %v5520_v48 = vpack.c.bf16 %v5515_v29, %v5515_v29 }
 0x55a   : > { %v5519_v32 = vpack.c.bf16 %v5514_v30, %v5514_v30  ;;  %v5521_v34 = vpack.c.bf16 %v5516_v31, %v5516_v31 }
 0x55c   : > { %5810 = vmatprep.mubr.bf16.mxu0 %v5519_v32  ;;  %5850 = vmatprep.mubr.bf16.mxu1 %v5521_v34 }
 0x55d   : > { %5811 = vmatmul.mubr.bf16.vlgmr.msra.gmra.mrb[4].mxu0 %v5518_v36  ;;  %5851 = vmatmul.mubr.bf16.vlgmr.msra.gmra.mrb[4].mxu1 %v5520_v48 }
 0x630   : > { %v6782_v38 = vpop.f32.mrb[4].mxu0  ;;  %v6804_v39 = vpop.f32.mrb[4].mxu1 }
 0x631   : > { %v6783_v40 = vpop.f32.mrb[5].mxu0  ;;  %v6805_v41 = vpop.f32.mrb[5].mxu1 }
 0x632   : > { %v6784_v42 = vadd.f32 %v6783_v40, %v6782_v38  ;;  %v6806_v43 = vadd.f32 %v6805_v41, %v6804_v39  ;;  %v6785_v45 = vpop.f32.mrb[6].mxu0  ;;  %v6807_v37 = vpop.f32.mrb[6].mxu1  ;;  %5863 = sbr.rel (%p6754_p1) target bundleno = 1917 (0x77d), region = 84 }
 0x633   : > { %v6786_v46 = vpop.f32.mrb[7].mxu0  ;;  %v6808_v47 = vpop.f32.mrb[7].mxu1 }
 0x634   : > { %v5853_v49 = vadd.f32 %v6806_v43, %v6784_v42 }
 0x636   : > { %v5858_v50 = vadd.f32 %v5853_v49, %v5517_v33 }
 0x638   : > { %5859 = vst [vmem:[#allocation3] sm:$0xff] %v5858_v50 }
 0x63f   : > { %v5864_v51 = vld [vmem:[#allocation3] sm:$0xff] }
 0x640   : > { %5865 = vmax.xlane.f32.xlu0 %v5864_v51 }
 0x6cd   : > { %v5866_v52 = vpop.xlane.xlu0 %5865 }
 0x6ce   : > { %v5867_v53 = vsub.f32 %v5864_v51, %v5866_v52 }
 0x6d0   : > { %v5868_v54 = vmul.f32 1.442695, %v5867_v53 }
 0x6d2   : > { %7455 = vpow2.f32 %v5868_v54 }
 0x6dc   : > { %v7456_v55 = vpop.eup %7455 }
 0x6dd   : > { %5870 = vadd.xlane.f32.xlu0 %v7456_v55 }
 0x76a   : > { %v5871_v56 = vpop.xlane.xlu0 %5870 }
 0x76b   : > { %7457 = vlog2.f32 %v5871_v56 }
 0x775   : > { %v7458_v57 = vpop.eup %7457 }
 0x776   : > { %v5873_v59 = vmul.f32 0.6931472, %v7458_v57 }
 0x778   : > { %v5874_v60 = vadd.f32 %v5873_v59, %v5866_v52 }
 0x77a   : > { %v5875_v61 = vsub.f32 %v5864_v51, %v5874_v60 }
 0x77c   : > { %5876 = vst [vmem:[#allocation16] sm:$0xff] %v5875_v61 }
 0x77d PF: > { %p6952_p12 = scmp.eq.s32.totalorder %s7844_s30, 3  ;;  %s7774_s16 = smov [#allocation16]  }
 0x77e   : > { %s5886_s20 = sshll.u32 %s7774_s16, 4  ;;  %s5887_s20 = int_to_ptr.vmem [resolvable:$true] %s5886_s20 }
 0x77f   : > { %s7661_s8 = scalar_lea.vmem %s5887_s20, 128  ;;  %p7668_p9 = scmp.lt.s32.totalorder %s5887_s20, %s5887_s20 }
 0x780   : > { %p7662_p4 = scmp.ne.s32.totalorder %s5887_s20, %s7661_s8  ;;  %p7669_p5 = scmp.lt.s32.totalorder %s7661_s8, %s7661_s8 }
 0x782   : > { %p7663_p10 = pnand %p7662_p4, %p6952_p12  ;;  %p7670_p13 = por %p7669_p5, %p7668_p9 }
 0x784   : > { %p7664_p11 = pneg %p7663_p10 }
 0x786   : > { %p7671_p2 = pnand %p7670_p13, %p7664_p11 }
 0x788   : > { %7674 = shalt.err (!%p7671_p2)
}
 0x789   : > { %s8567_s27 = sld [smem:[#allocation31_spill]] }
 0x78f   : > { %s8568_s10 = smov %s8567_s27  ;;  %s7675_s21 = scalar_lea.hbm %s8567_s27, 128 }
 0x790   : > { %p7676_p6 = scmp.ne.s32.totalorder %s8568_s10, %s7675_s21  ;;  %p7681_p0 = scmp.lt.u32.totalorder %s7675_s21, %s8568_s10 }
 0x792   : > { %p7677_p7 = pnand %p7676_p6, %p6952_p12 }
 0x794   : > { %p7678_p8 = pneg %p7677_p7 }
 0x796   : > { %p7683_p3 = pnand %p7681_p0, %p7678_p8 }
 0x798   : > { %7686 = shalt.err (!%p7683_p3)
}
 0x799   : > { %6917 = dma.vmem_to_hbm [thread:$0]  (%p6952_p12), %s5887_s20, 128, %s8568_s10, [#allocation6]  }
 0x79a   : > { %7732 = dma.done.wait (%p6952_p12), [#allocation6], 128  }
 0x79b   : > { %7734 = vsyncadd (%p6952_p12), [#allocation6], 4294967168 }
 0x79c PF: > { %s26_s29 = sadd.s32 1, %s7757_s29   ;;  %s8569_s9 = sld [smem:[#allocation23_spill]] }
 0x79d   : > { %p23_p1 = scmp.ge.s32.totalorder %s26_s29, 6   ;;  %s8570_s26 = sld [smem:[#allocation27_spill]] }
 0x79e   : > { %s8571_s3 = sld [smem:[#allocation26_spill]]  ;;  %s8572_s24 = smov %s7741_s25 }
 0x79f   : > { %s8574_s27 = smov %s7753_s28  ;;  %25 = sbr.rel (!%p23_p1) target bundleno = 14 (0xe), region = 136 }
 0x7a2   : > { %s8573_s25 = smov %s8569_s9 }
 0x7a4   : > { %s8575_s28 = smov %s8571_s3 }
 0x7a6   :  { %5899 = vsyncpa [#allocation5], 1 }
 0x7a7   :  { %5901 = vsyncpa [#allocation5 + $0x1], 1 }
 0x7a8   :  { %5902 = vsyncpa [#allocation8], 1 }
 0x7a9   :  { %5903 = vsyncpa [#allocation11], 1 }
 0x7aa   :  { %5905 = vsyncpa [#allocation11 + $0x1], 1 }
 0x7ab   :  { %5906 = vsyncpa [#allocation14], 1 }
 0x7ac   :  { %5908 = vsyncpa [#allocation14 + $0x1], 1 }
 0x7ad   :  { %5909 = vsyncpa [#allocation6], 1 }
 0x7ae   :  { %5911 = vsyncpa [#allocation6 + $0x1], 1 }

</bundles_post_ra>
